<compile_context>
chip_gen: v7x
topology: tpu7x:2x2x1
jax: 0.10.0
libtpu: 0.0.40
codegen_flags: <defaults>
</compile_context>

<pallas_src>
import functools

import jax
import jax.numpy as jnp
from jax import lax
from jax.experimental import pallas as pl
from jax.experimental.pallas import tpu as pltpu

_BN_EPS = 1e-5


# ----------------------------------------------------------------------------
# Fused Pallas kernel: the entire PolyPreCBlock for one batch chunk.
# ----------------------------------------------------------------------------
def _fused_block_kernel(h, w, x_ref, w11_ref, b11_ref, w2_ref, b2_ref,
                        w3_ref, b3_ref, o_ref, y1p_ref, y2p_ref):
    # x_ref:   (bt*H*W, Cin) bf16       flattened input rows (bt batch images)
    # w11_ref: (Cin, 192+192) bf16      merged [b1c1 | b2c1] 1x1 weights, BN scale folded
    # b11_ref: (1, 384) f32             merged folded BN bias
    # w2_ref:  (3, 192, 224) bf16       (1,3) conv weights (taps along W), BN scale folded
    # b2_ref:  (1, 224) f32
    # w3_ref:  (3, 224, 256) bf16       (3,1) conv weights (taps along H), BN scale folded
    # b3_ref:  (1, 256) f32
    # o_ref:   (bt*H*W, 256+192) f32    [branch1 | branch2] along channels
    # y1p_ref: VMEM (bt, H, W+2, 192) f32   W-padded scratch for the (1,3) conv
    # y2p_ref: VMEM (bt, H+2, W, 224) f32   H-padded scratch for the (3,1) conv
    m, _ = x_ref.shape
    bt = m // (h * w)
    _, c1, c2 = w2_ref.shape          # 192, 224
    c3 = w3_ref.shape[2]              # 256
    cb2 = w11_ref.shape[1] - c1       # 192 (branch2)

    # Zero only the pad halo (interior is fully overwritten every step).
    y1p_ref[:, :, 0:1, :] = jnp.zeros((bt, h, 1, c1), y1p_ref.dtype)
    y1p_ref[:, :, w + 1:w + 2, :] = jnp.zeros((bt, h, 1, c1), y1p_ref.dtype)
    y2p_ref[:, 0:1, :, :] = jnp.zeros((bt, 1, w, c2), y2p_ref.dtype)
    y2p_ref[:, h + 1:h + 2, :, :] = jnp.zeros((bt, 1, w, c2), y2p_ref.dtype)

    # --- merged 1x1 convs (branch1.conv1 + branch2): one (M,2048)x(2048,384) bf16 matmul
    y0 = jnp.dot(x_ref[...], w11_ref[...], preferred_element_type=jnp.float32)
    y0 = jnp.maximum(y0 + b11_ref[...], 0.0)          # folded-BN bias + ReLU in f32

    # --- branch2 slab stored right away (frees its vregs before the tap loops) ---
    o_ref[:, c3:c3 + cb2] = y0[:, c1:].astype(o_ref.dtype)

    # --- branch1.conv2: (1,3) conv, padding (0,1): 3 taps shifted along W ---------
    y1p_ref[:, :, 1:w + 1, :] = y0[:, :c1].reshape(bt, h, w, c1)
    acc2 = jnp.dot(y1p_ref[:, :, 0:w, :].reshape(m, c1).astype(jnp.bfloat16),
                   w2_ref[0], preferred_element_type=jnp.float32)
    for j in range(1, 3):     # static taps -> unrolled MXU matmuls
        acc2 += jnp.dot(y1p_ref[:, :, j:j + w, :].reshape(m, c1).astype(jnp.bfloat16),
                        w2_ref[j], preferred_element_type=jnp.float32)
    yb = jnp.maximum(acc2 + b2_ref[...], 0.0)          # (M, 224) f32

    # --- branch1.conv3: (3,1) conv, padding (1,0): taps shift the untiled H axis ---
    y2p_ref[:, 1:h + 1, :, :] = yb.reshape(bt, h, w, c2)
    acc3 = jnp.dot(y2p_ref[:, 0:h, :, :].reshape(m, c2).astype(jnp.bfloat16),
                   w3_ref[0], preferred_element_type=jnp.float32)
    for i in range(1, 3):
        acc3 += jnp.dot(y2p_ref[:, i:i + h, :, :].reshape(m, c2).astype(jnp.bfloat16),
                        w3_ref[i], preferred_element_type=jnp.float32)
    yc = jnp.maximum(acc3 + b3_ref[...], 0.0)          # (M, 256) f32

    # --- write branch1 as a lane-dense 2-D store (channels 0..255) ---------------
    o_ref[:, 0:c3] = yc.astype(o_ref.dtype)


def _fused_block_call(x2d, h, w, w11, b11, w2, b2, w3, b3, *, batch_tile=None):
    m_total, cin = x2d.shape
    assert m_total % (h * w) == 0
    n = m_total // (h * w)
    c_merged = w11.shape[1]          # 384
    _, c1, c2 = w2.shape             # 192, 224
    c3 = w3.shape[2]                 # 256
    cout = c3 + (c_merged - c1)      # 448

    if batch_tile is None:
        batch_tile = n
        # Largest divisor of n that keeps the per-step matmul M modest.
        while batch_tile > 1 and (n % batch_tile != 0 or batch_tile * h * w > 1024):
            batch_tile -= 1
    bt = batch_tile
    assert n % bt == 0, (n, bt)
    rows = bt * h * w

    kernel = functools.partial(_fused_block_kernel, h, w)
    return pl.pallas_call(
        kernel,
        out_shape=jax.ShapeDtypeStruct((m_total, cout), jnp.float32),
        grid=(n // bt,),
        in_specs=[
            pl.BlockSpec((rows, cin), lambda b: (b, 0)),
            pl.BlockSpec((cin, c_merged), lambda b: (0, 0)),
            pl.BlockSpec((1, c_merged), lambda b: (0, 0)),
            pl.BlockSpec((3, c1, c2), lambda b: (0, 0, 0)),
            pl.BlockSpec((1, c2), lambda b: (0, 0)),
            pl.BlockSpec((3, c2, c3), lambda b: (0, 0, 0)),
            pl.BlockSpec((1, c3), lambda b: (0, 0)),
        ],
        out_specs=pl.BlockSpec((rows, cout), lambda b: (b, 0)),
        scratch_shapes=[
            pltpu.VMEM((bt, h, w + 2, c1), jnp.float32),
            pltpu.VMEM((bt, h + 2, w, c2), jnp.float32),
        ],
        compiler_params=pltpu.CompilerParams(
            dimension_semantics=("parallel",),        # batch chunks across TCs
            vmem_limit_bytes=32 * 1024 * 1024),       # explicit budget (v5e default is 16 MiB)
    )(x2d, w11, b11, w2, b2, w3, b3)


# ----------------------------------------------------------------------------
# Parameter construction (deterministic, synthetic) and BN folding
# ----------------------------------------------------------------------------
def init_polyconv(key, cin, cout, kh, kw, num_blocks):
    k1, k2, k3, k4, k5 = jax.random.split(key, 5)
    return dict(
        w=0.05 * jax.random.normal(k1, (cout, cin, kh, kw), jnp.float32),
        gamma=1.0 + 0.1 * jax.random.normal(k2, (num_blocks, cout), jnp.float32),
        beta=0.1 * jax.random.normal(k3, (num_blocks, cout), jnp.float32),
        mean=0.1 * jax.random.normal(k4, (num_blocks, cout), jnp.float32),
        var=0.5 + jnp.abs(jax.random.normal(k5, (num_blocks, cout), jnp.float32)),
    )


def init_poly_pre_c_block(key, num_blocks, in_channels=2048):
    ks = jax.random.split(key, 4)
    return dict(
        b1c1=init_polyconv(ks[0], in_channels, 192, 1, 1, num_blocks),
        b1c2=init_polyconv(ks[1], 192, 224, 1, 3, num_blocks),
        b1c3=init_polyconv(ks[2], 224, 256, 3, 1, num_blocks),
        b2c1=init_polyconv(ks[3], in_channels, 192, 1, 1, num_blocks),
    )


def _folded_bn(p, index):
    # TODO(synk): BatchNorm implemented in inference form (running stats);
    # training-mode batch statistics are out of scope for this kernel.
    scale = p["gamma"][index] * lax.rsqrt(p["var"][index] + _BN_EPS)
    bias = p["beta"][index] - p["mean"][index] * scale
    return scale, bias


def prepare_fused_params(params, index):
    """Fold BN[index] scale into conv weights, merge the two 1x1 convs, cast to bf16."""
    s1, b1 = _folded_bn(params["b1c1"], index)
    s4, b4 = _folded_bn(params["b2c1"], index)
    w_a = jnp.transpose(params["b1c1"]["w"][:, :, 0, 0], (1, 0)) * s1[None, :]  # (Cin,192)
    w_b = jnp.transpose(params["b2c1"]["w"][:, :, 0, 0], (1, 0)) * s4[None, :]  # (Cin,192)
    w11 = jnp.concatenate([w_a, w_b], axis=1).astype(jnp.bfloat16)              # (Cin,384)
    b11 = jnp.concatenate([b1, b4])[None, :].astype(jnp.float32)                # (1,384)

    s2, bb2 = _folded_bn(params["b1c2"], index)
    w2 = (jnp.transpose(params["b1c2"]["w"][:, :, 0, :], (2, 1, 0))
          * s2[None, None, :]).astype(jnp.bfloat16)                             # (3,192,224)
    s3, bb3 = _folded_bn(params["b1c3"], index)
    w3 = (jnp.transpose(params["b1c3"]["w"][:, :, :, 0], (2, 1, 0))
          * s3[None, None, :]).astype(jnp.bfloat16)                             # (3,224,256)
    return (w11, b11, w2, bb2[None, :].astype(jnp.float32),
            w3, bb3[None, :].astype(jnp.float32))


# ----------------------------------------------------------------------------
# Block forward passes
# ----------------------------------------------------------------------------
def poly_pre_c_block_nhwc(params, x_nhwc, index, *, batch_tile=None):
    """Transpose-free NHWC path (use this when the surrounding model is NHWC)."""
    n, h, w, cin = x_nhwc.shape
    fused = prepare_fused_params(params, index)
    x2d = x_nhwc.astype(jnp.bfloat16).reshape(n * h * w, cin)   # free XLA reshape
    y2d = _fused_block_call(x2d, h, w, *fused, batch_tile=batch_tile)
    return y2d.reshape(n, h, w, -1)


def poly_pre_c_block(params, x_nchw, index):
    """PyTorch-parity entry point: NCHW in, NCHW out."""
    x = jnp.transpose(x_nchw, (0, 2, 3, 1))
    y = poly_pre_c_block_nhwc(params, x, index)
    return jnp.transpose(y, (0, 3, 1, 2))


# ----------------------------------------------------------------------------
# Pure-JAX reference (full-precision sanity check)
# ----------------------------------------------------------------------------
def _ref_conv_bn_relu(x_nhwc, p, index, pad_hw):
    scale, bias = _folded_bn(p, index)
    w_hwio = jnp.transpose(p["w"], (2, 3, 1, 0))
    y = lax.conv_general_dilated(
        x_nhwc, w_hwio, window_strides=(1, 1),
        padding=((pad_hw[0], pad_hw[0]), (pad_hw[1], pad_hw[1])),
        dimension_numbers=("NHWC", "HWIO", "NHWC"),
        precision=lax.Precision.HIGHEST)
    return jnp.maximum(y * scale + bias, 0.0)


def _ref_poly_pre_c_block(params, x_nchw, index):
    x = jnp.transpose(x_nchw, (0, 2, 3, 1))
    y1 = _ref_conv_bn_relu(x, params["b1c1"], index, (0, 0))
    y1 = _ref_conv_bn_relu(y1, params["b1c2"], index, (0, 1))
    y1 = _ref_conv_bn_relu(y1, params["b1c3"], index, (1, 0))
    y2 = _ref_conv_bn_relu(x, params["b2c1"], index, (0, 0))
    return jnp.transpose(jnp.concatenate([y1, y2], axis=-1), (0, 3, 1, 2))


# ----------------------------------------------------------------------------
if __name__ == "__main__":
    key = jax.random.PRNGKey(0)
    k_params, k_x = jax.random.split(key)

    num_blocks = 3
    index = 1
    N, C, H, W = 2, 2048, 8, 8       # C=2048 is fixed by the module definition

    params = init_poly_pre_c_block(k_params, num_blocks, in_channels=C)
    x = jax.random.normal(k_x, (N, C, H, W), jnp.float32)

    fwd = jax.jit(lambda xx: poly_pre_c_block(params, xx, index))
    out = jax.block_until_ready(fwd(x))

    assert out.shape == (N, 448, H, W), out.shape

    ref = _ref_poly_pre_c_block(params, x, index)
    max_err = float(jnp.max(jnp.abs(out - ref)))
    ref_scale = float(jnp.max(jnp.abs(ref)))
    # Tolerance sized for bf16 weights/activations with f32 accumulation
    # (reference is full f32); typical observed error is well below this.
    assert max_err <= 5e-2 * max(1.0, ref_scale), (max_err, ref_scale)

    print("KERNEL_OK")
</pallas_src>

<mosaic_0001>
module attributes {stable_mosaic.version = 11 : i64} {
  func.func @_fused_block_kernel(%arg0: i32, %arg1: memref<128x2048xbf16, #tpu.memory_space<vmem>>, %arg2: memref<2048x384xbf16, #tpu.memory_space<vmem>>, %arg3: memref<1x384xf32, #tpu.memory_space<vmem>>, %arg4: memref<3x192x224xbf16, #tpu.memory_space<vmem>>, %arg5: memref<1x224xf32, #tpu.memory_space<vmem>>, %arg6: memref<3x224x256xbf16, #tpu.memory_space<vmem>>, %arg7: memref<1x256xf32, #tpu.memory_space<vmem>>, %arg8: memref<128x448xf32, #tpu.memory_space<vmem>>, %arg9: memref<2x8x10x192xf32, #tpu.memory_space<vmem>>, %arg10: memref<2x10x8x224xf32, #tpu.memory_space<vmem>>) attributes {dimension_semantics = [#tpu.dimension_semantics<parallel>], iteration_bounds = array<i64: 1>, scalar_prefetch = 0 : i64, scratch_operands = 2 : i64, tpu.core_type = #tpu.core_type<tc>, window_params = [{transform_indices = @transform_0, window_bounds = array<i64: 128, 2048>}, {pipeline_mode = #tpu.pipeline_mode<synchronous>, transform_indices = @transform_1, window_bounds = array<i64: 2048, 384>}, {pipeline_mode = #tpu.pipeline_mode<synchronous>, transform_indices = @transform_2, window_bounds = array<i64: 1, 384>}, {pipeline_mode = #tpu.pipeline_mode<synchronous>, transform_indices = @transform_3, window_bounds = array<i64: 3, 192, 224>}, {pipeline_mode = #tpu.pipeline_mode<synchronous>, transform_indices = @transform_4, window_bounds = array<i64: 1, 224>}, {pipeline_mode = #tpu.pipeline_mode<synchronous>, transform_indices = @transform_5, window_bounds = array<i64: 3, 224, 256>}, {pipeline_mode = #tpu.pipeline_mode<synchronous>, transform_indices = @transform_6, window_bounds = array<i64: 1, 256>}, {transform_indices = @transform_7, window_bounds = array<i64: 128, 448>}]} {
    %cst = arith.constant 0.000000e+00 : f32
    %0 = vector.broadcast %cst : f32 to vector<2x8x1x192xf32>
    %c0 = arith.constant 0 : index
    %c0_0 = arith.constant 0 : index
    %c0_1 = arith.constant 0 : index
    %c0_2 = arith.constant 0 : index
    %1 = vector.load %arg9[%c0, %c0_0, %c0_1, %c0_2] : memref<2x8x10x192xf32, #tpu.memory_space<vmem>>, vector<2x8x1x192xf32>
    tpu.vector_store %arg9[%c0, %c0_0, %c0_1, %c0_2], %0 {strides = array<i32>} : memref<2x8x10x192xf32, #tpu.memory_space<vmem>>, vector<2x8x1x192xf32>,
    %cst_3 = arith.constant 0.000000e+00 : f32
    %2 = vector.broadcast %cst_3 : f32 to vector<2x8x1x192xf32>
    %c0_4 = arith.constant 0 : index
    %c0_5 = arith.constant 0 : index
    %c9 = arith.constant 9 : index
    %c0_6 = arith.constant 0 : index
    %3 = vector.load %arg9[%c0_4, %c0_5, %c9, %c0_6] : memref<2x8x10x192xf32, #tpu.memory_space<vmem>>, vector<2x8x1x192xf32>
    tpu.vector_store %arg9[%c0_4, %c0_5, %c9, %c0_6], %2 {strides = array<i32>} : memref<2x8x10x192xf32, #tpu.memory_space<vmem>>, vector<2x8x1x192xf32>,
    %cst_7 = arith.constant 0.000000e+00 : f32
    %4 = vector.broadcast %cst_7 : f32 to vector<2x1x8x224xf32>
    %c0_8 = arith.constant 0 : index
    %c0_9 = arith.constant 0 : index
    %c0_10 = arith.constant 0 : index
    %c0_11 = arith.constant 0 : index
    %5 = vector.load %arg10[%c0_8, %c0_9, %c0_10, %c0_11] : memref<2x10x8x224xf32, #tpu.memory_space<vmem>>, vector<2x1x8x224xf32>
    tpu.vector_store %arg10[%c0_8, %c0_9, %c0_10, %c0_11], %4 {strides = array<i32>} : memref<2x10x8x224xf32, #tpu.memory_space<vmem>>, vector<2x1x8x224xf32>,
    %cst_12 = arith.constant 0.000000e+00 : f32
    %6 = vector.broadcast %cst_12 : f32 to vector<2x1x8x224xf32>
    %c0_13 = arith.constant 0 : index
    %c9_14 = arith.constant 9 : index
    %c0_15 = arith.constant 0 : index
    %c0_16 = arith.constant 0 : index
    %7 = vector.load %arg10[%c0_13, %c9_14, %c0_15, %c0_16] : memref<2x10x8x224xf32, #tpu.memory_space<vmem>>, vector<2x1x8x224xf32>
    tpu.vector_store %arg10[%c0_13, %c9_14, %c0_15, %c0_16], %6 {strides = array<i32>} : memref<2x10x8x224xf32, #tpu.memory_space<vmem>>, vector<2x1x8x224xf32>,
    %c0_17 = arith.constant 0 : index
    %c0_18 = arith.constant 0 : index
    %8 = vector.load %arg1[%c0_17, %c0_18] : memref<128x2048xbf16, #tpu.memory_space<vmem>>, vector<128x2048xbf16>
    %c0_19 = arith.constant 0 : index
    %c0_20 = arith.constant 0 : index
    %9 = vector.load %arg2[%c0_19, %c0_20] : memref<2048x384xbf16, #tpu.memory_space<vmem>>, vector<2048x384xbf16>
    %cst_21 = arith.constant dense<0.000000e+00> : vector<128x384xf32>
    %10 = tpu.matmul %8, %9, %cst_21 {dimension_numbers = #tpu.dot_dimension_numbers<[1], [0], [0], [1], [0, 0, 1, 1], [], []>} : vector<128x2048xbf16>, vector<2048x384xbf16>, vector<128x384xf32> -> vector<128x384xf32>
    %c0_22 = arith.constant 0 : index
    %c0_23 = arith.constant 0 : index
    %11 = vector.load %arg3[%c0_22, %c0_23] : memref<1x384xf32, #tpu.memory_space<vmem>>, vector<1x384xf32>
    %12 = vector.broadcast %11 : vector<1x384xf32> to vector<128x384xf32>
    %13 = arith.addf %10, %12 : vector<128x384xf32>
    %cst_24 = arith.constant 0.000000e+00 : f32
    %14 = vector.broadcast %cst_24 : f32 to vector<128x384xf32>
    %15 = arith.maximumf %13, %14 : vector<128x384xf32>
    %16 = vector.extract_strided_slice %15 {offsets = [0, 192], sizes = [128, 192], strides = [1, 1]} : vector<128x384xf32> to vector<128x192xf32>
    %c0_25 = arith.constant 0 : index
    %c256 = arith.constant 256 : index
    %17 = vector.load %arg8[%c0_25, %c256] : memref<128x448xf32, #tpu.memory_space<vmem>>, vector<128x192xf32>
    tpu.vector_store %arg8[%c0_25, %c256], %16 {strides = array<i32>} : memref<128x448xf32, #tpu.memory_space<vmem>>, vector<128x192xf32>,
    %18 = vector.extract_strided_slice %15 {offsets = [0, 0], sizes = [128, 192], strides = [1, 1]} : vector<128x384xf32> to vector<128x192xf32>
    %19 = vector.shape_cast %18 : vector<128x192xf32> to vector<2x8x8x192xf32>
    %c0_26 = arith.constant 0 : index
    %c0_27 = arith.constant 0 : index
    %c1 = arith.constant 1 : index
    %c0_28 = arith.constant 0 : index
    %20 = vector.load %arg9[%c0_26, %c0_27, %c1, %c0_28] : memref<2x8x10x192xf32, #tpu.memory_space<vmem>>, vector<2x8x8x192xf32>
    tpu.vector_store %arg9[%c0_26, %c0_27, %c1, %c0_28], %19 {strides = array<i32>} : memref<2x8x10x192xf32, #tpu.memory_space<vmem>>, vector<2x8x8x192xf32>,
    %c0_29 = arith.constant 0 : index
    %c0_30 = arith.constant 0 : index
    %c0_31 = arith.constant 0 : index
    %c0_32 = arith.constant 0 : index
    %21 = vector.load %arg9[%c0_29, %c0_30, %c0_31, %c0_32] : memref<2x8x10x192xf32, #tpu.memory_space<vmem>>, vector<2x8x8x192xf32>
    %22 = vector.shape_cast %21 : vector<2x8x8x192xf32> to vector<128x192xf32>
    %23 = arith.truncf %22 : vector<128x192xf32> to vector<128x192xbf16>
    %c0_33 = arith.constant 0 : index
    %c0_34 = arith.constant 0 : index
    %c0_35 = arith.constant 0 : index
    %24 = vector.load %arg4[%c0_33, %c0_34, %c0_35] : memref<3x192x224xbf16, #tpu.memory_space<vmem>>, vector<1x192x224xbf16>
    %25 = vector.shape_cast %24 : vector<1x192x224xbf16> to vector<192x224xbf16>
    %cst_36 = arith.constant dense<0.000000e+00> : vector<128x224xf32>
    %26 = tpu.matmul %23, %25, %cst_36 {dimension_numbers = #tpu.dot_dimension_numbers<[1], [0], [0], [1], [0, 0, 1, 1], [], []>} : vector<128x192xbf16>, vector<192x224xbf16>, vector<128x224xf32> -> vector<128x224xf32>
    %c0_37 = arith.constant 0 : index
    %c0_38 = arith.constant 0 : index
    %c1_39 = arith.constant 1 : index
    %c0_40 = arith.constant 0 : index
    %27 = vector.load %arg9[%c0_37, %c0_38, %c1_39, %c0_40] : memref<2x8x10x192xf32, #tpu.memory_space<vmem>>, vector<2x8x8x192xf32>
    %28 = vector.shape_cast %27 : vector<2x8x8x192xf32> to vector<128x192xf32>
    %29 = arith.truncf %28 : vector<128x192xf32> to vector<128x192xbf16>
    %c1_41 = arith.constant 1 : index
    %c0_42 = arith.constant 0 : index
    %c0_43 = arith.constant 0 : index
    %30 = vector.load %arg4[%c1_41, %c0_42, %c0_43] : memref<3x192x224xbf16, #tpu.memory_space<vmem>>, vector<1x192x224xbf16>
    %31 = vector.shape_cast %30 : vector<1x192x224xbf16> to vector<192x224xbf16>
    %cst_44 = arith.constant dense<0.000000e+00> : vector<128x224xf32>
    %32 = tpu.matmul %29, %31, %cst_44 {dimension_numbers = #tpu.dot_dimension_numbers<[1], [0], [0], [1], [0, 0, 1, 1], [], []>} : vector<128x192xbf16>, vector<192x224xbf16>, vector<128x224xf32> -> vector<128x224xf32>
    %33 = arith.addf %26, %32 : vector<128x224xf32>
    %c0_45 = arith.constant 0 : index
    %c0_46 = arith.constant 0 : index
    %c2 = arith.constant 2 : index
    %c0_47 = arith.constant 0 : index
    %34 = vector.load %arg9[%c0_45, %c0_46, %c2, %c0_47] : memref<2x8x10x192xf32, #tpu.memory_space<vmem>>, vector<2x8x8x192xf32>
    %35 = vector.shape_cast %34 : vector<2x8x8x192xf32> to vector<128x192xf32>
    %36 = arith.truncf %35 : vector<128x192xf32> to vector<128x192xbf16>
    %c2_48 = arith.constant 2 : index
    %c0_49 = arith.constant 0 : index
    %c0_50 = arith.constant 0 : index
    %37 = vector.load %arg4[%c2_48, %c0_49, %c0_50] : memref<3x192x224xbf16, #tpu.memory_space<vmem>>, vector<1x192x224xbf16>
    %38 = vector.shape_cast %37 : vector<1x192x224xbf16> to vector<192x224xbf16>
    %cst_51 = arith.constant dense<0.000000e+00> : vector<128x224xf32>
    %39 = tpu.matmul %36, %38, %cst_51 {dimension_numbers = #tpu.dot_dimension_numbers<[1], [0], [0], [1], [0, 0, 1, 1], [], []>} : vector<128x192xbf16>, vector<192x224xbf16>, vector<128x224xf32> -> vector<128x224xf32>
    %40 = arith.addf %33, %39 : vector<128x224xf32>
    %c0_52 = arith.constant 0 : index
    %c0_53 = arith.constant 0 : index
    %41 = vector.load %arg5[%c0_52, %c0_53] : memref<1x224xf32, #tpu.memory_space<vmem>>, vector<1x224xf32>
    %42 = vector.broadcast %41 : vector<1x224xf32> to vector<128x224xf32>
    %43 = arith.addf %40, %42 : vector<128x224xf32>
    %cst_54 = arith.constant 0.000000e+00 : f32
    %44 = vector.broadcast %cst_54 : f32 to vector<128x224xf32>
    %45 = arith.maximumf %43, %44 : vector<128x224xf32>
    %46 = vector.shape_cast %45 : vector<128x224xf32> to vector<2x8x8x224xf32>
    %c0_55 = arith.constant 0 : index
    %c1_56 = arith.constant 1 : index
    %c0_57 = arith.constant 0 : index
    %c0_58 = arith.constant 0 : index
    %47 = vector.load %arg10[%c0_55, %c1_56, %c0_57, %c0_58] : memref<2x10x8x224xf32, #tpu.memory_space<vmem>>, vector<2x8x8x224xf32>
    tpu.vector_store %arg10[%c0_55, %c1_56, %c0_57, %c0_58], %46 {strides = array<i32>} : memref<2x10x8x224xf32, #tpu.memory_space<vmem>>, vector<2x8x8x224xf32>,
    %c0_59 = arith.constant 0 : index
    %c0_60 = arith.constant 0 : index
    %c0_61 = arith.constant 0 : index
    %c0_62 = arith.constant 0 : index
    %48 = vector.load %arg10[%c0_59, %c0_60, %c0_61, %c0_62] : memref<2x10x8x224xf32, #tpu.memory_space<vmem>>, vector<2x8x8x224xf32>
    %49 = vector.shape_cast %48 : vector<2x8x8x224xf32> to vector<128x224xf32>
    %50 = arith.truncf %49 : vector<128x224xf32> to vector<128x224xbf16>
    %c0_63 = arith.constant 0 : index
    %c0_64 = arith.constant 0 : index
    %c0_65 = arith.constant 0 : index
    %51 = vector.load %arg6[%c0_63, %c0_64, %c0_65] : memref<3x224x256xbf16, #tpu.memory_space<vmem>>, vector<1x224x256xbf16>
    %52 = vector.shape_cast %51 : vector<1x224x256xbf16> to vector<224x256xbf16>
    %cst_66 = arith.constant dense<0.000000e+00> : vector<128x256xf32>
    %53 = tpu.matmul %50, %52, %cst_66 {dimension_numbers = #tpu.dot_dimension_numbers<[1], [0], [0], [1], [0, 0, 1, 1], [], []>} : vector<128x224xbf16>, vector<224x256xbf16>, vector<128x256xf32> -> vector<128x256xf32>
    %c0_67 = arith.constant 0 : index
    %c1_68 = arith.constant 1 : index
    %c0_69 = arith.constant 0 : index
    %c0_70 = arith.constant 0 : index
    %54 = vector.load %arg10[%c0_67, %c1_68, %c0_69, %c0_70] : memref<2x10x8x224xf32, #tpu.memory_space<vmem>>, vector<2x8x8x224xf32>
    %55 = vector.shape_cast %54 : vector<2x8x8x224xf32> to vector<128x224xf32>
    %56 = arith.truncf %55 : vector<128x224xf32> to vector<128x224xbf16>
    %c1_71 = arith.constant 1 : index
    %c0_72 = arith.constant 0 : index
    %c0_73 = arith.constant 0 : index
    %57 = vector.load %arg6[%c1_71, %c0_72, %c0_73] : memref<3x224x256xbf16, #tpu.memory_space<vmem>>, vector<1x224x256xbf16>
    %58 = vector.shape_cast %57 : vector<1x224x256xbf16> to vector<224x256xbf16>
    %cst_74 = arith.constant dense<0.000000e+00> : vector<128x256xf32>
    %59 = tpu.matmul %56, %58, %cst_74 {dimension_numbers = #tpu.dot_dimension_numbers<[1], [0], [0], [1], [0, 0, 1, 1], [], []>} : vector<128x224xbf16>, vector<224x256xbf16>, vector<128x256xf32> -> vector<128x256xf32>
    %60 = arith.addf %53, %59 : vector<128x256xf32>
    %c0_75 = arith.constant 0 : index
    %c2_76 = arith.constant 2 : index
    %c0_77 = arith.constant 0 : index
    %c0_78 = arith.constant 0 : index
    %61 = vector.load %arg10[%c0_75, %c2_76, %c0_77, %c0_78] : memref<2x10x8x224xf32, #tpu.memory_space<vmem>>, vector<2x8x8x224xf32>
    %62 = vector.shape_cast %61 : vector<2x8x8x224xf32> to vector<128x224xf32>
    %63 = arith.truncf %62 : vector<128x224xf32> to vector<128x224xbf16>
    %c2_79 = arith.constant 2 : index
    %c0_80 = arith.constant 0 : index
    %c0_81 = arith.constant 0 : index
    %64 = vector.load %arg6[%c2_79, %c0_80, %c0_81] : memref<3x224x256xbf16, #tpu.memory_space<vmem>>, vector<1x224x256xbf16>
    %65 = vector.shape_cast %64 : vector<1x224x256xbf16> to vector<224x256xbf16>
    %cst_82 = arith.constant dense<0.000000e+00> : vector<128x256xf32>
    %66 = tpu.matmul %63, %65, %cst_82 {dimension_numbers = #tpu.dot_dimension_numbers<[1], [0], [0], [1], [0, 0, 1, 1], [], []>} : vector<128x224xbf16>, vector<224x256xbf16>, vector<128x256xf32> -> vector<128x256xf32>
    %67 = arith.addf %60, %66 : vector<128x256xf32>
    %c0_83 = arith.constant 0 : index
    %c0_84 = arith.constant 0 : index
    %68 = vector.load %arg7[%c0_83, %c0_84] : memref<1x256xf32, #tpu.memory_space<vmem>>, vector<1x256xf32>
    %69 = vector.broadcast %68 : vector<1x256xf32> to vector<128x256xf32>
    %70 = arith.addf %67, %69 : vector<128x256xf32>
    %cst_85 = arith.constant 0.000000e+00 : f32
    %71 = vector.broadcast %cst_85 : f32 to vector<128x256xf32>
    %72 = arith.maximumf %70, %71 : vector<128x256xf32>
    %c0_86 = arith.constant 0 : index
    %c0_87 = arith.constant 0 : index
    %73 = vector.load %arg8[%c0_86, %c0_87] : memref<128x448xf32, #tpu.memory_space<vmem>>, vector<128x256xf32>
    tpu.vector_store %arg8[%c0_86, %c0_87], %72 {strides = array<i32>} : memref<128x448xf32, #tpu.memory_space<vmem>>, vector<128x256xf32>,
    return
  }
  func.func @transform_0(%arg0: i32) -> (i32, i32) {
    %c0_i32 = arith.constant 0 : i32
    %c0_i32_0 = arith.constant 0 : i32
    return %arg0, %c0_i32 : i32, i32
  }
  func.func @transform_1(%arg0: i32) -> (i32, i32) {
    %c0_i32 = arith.constant 0 : i32
    %c0_i32_0 = arith.constant 0 : i32
    %c0_i32_1 = arith.constant 0 : i32
    return %c0_i32, %c0_i32_0 : i32, i32
  }
  func.func @transform_2(%arg0: i32) -> (i32, i32) {
    %c0_i32 = arith.constant 0 : i32
    %c0_i32_0 = arith.constant 0 : i32
    %c0_i32_1 = arith.constant 0 : i32
    return %c0_i32, %c0_i32_0 : i32, i32
  }
  func.func @transform_3(%arg0: i32) -> (i32, i32, i32) {
    %c0_i32 = arith.constant 0 : i32
    %c0_i32_0 = arith.constant 0 : i32
    %c0_i32_1 = arith.constant 0 : i32
    %c0_i32_2 = arith.constant 0 : i32
    return %c0_i32, %c0_i32_0, %c0_i32_1 : i32, i32, i32
  }
  func.func @transform_4(%arg0: i32) -> (i32, i32) {
    %c0_i32 = arith.constant 0 : i32
    %c0_i32_0 = arith.constant 0 : i32
    %c0_i32_1 = arith.constant 0 : i32
    return %c0_i32, %c0_i32_0 : i32, i32
  }
  func.func @transform_5(%arg0: i32) -> (i32, i32, i32) {
    %c0_i32 = arith.constant 0 : i32
    %c0_i32_0 = arith.constant 0 : i32
    %c0_i32_1 = arith.constant 0 : i32
    %c0_i32_2 = arith.constant 0 : i32
    return %c0_i32, %c0_i32_0, %c0_i32_1 : i32, i32, i32
  }
  func.func @transform_6(%arg0: i32) -> (i32, i32) {
    %c0_i32 = arith.constant 0 : i32
    %c0_i32_0 = arith.constant 0 : i32
    %c0_i32_1 = arith.constant 0 : i32
    return %c0_i32, %c0_i32_0 : i32, i32
  }
  func.func @transform_7(%arg0: i32) -> (i32, i32) {
    %c0_i32 = arith.constant 0 : i32
    %c0_i32_0 = arith.constant 0 : i32
    return %arg0, %c0_i32 : i32, i32
  }
}

</mosaic_0001>

<bundles_post_ra>
// kernel: _lambda_.1
= control target key start
LH: loop header
LB: loop body
LE: loop exit
PB: predicated region body
PF: predicated region fallthrough
CT: control target
= control target key end

     0   :  { %s14526_s0 = inlined_call_operand.vmem [shape: bf16[128,2048], index: 0, kind: input, shape index: {}]   ;;  %s14527_s1 = inlined_call_operand.vmem [shape: bf16[2048,384], index: 1, kind: input, shape index: {}]   ;;  %s14528_s2 = inlined_call_operand.vmem [shape: f32[1,384], index: 2, kind: input, shape index: {}]   ;;  %s14529_s3 = inlined_call_operand.vmem [shape: bf16[3,192,224], index: 3, kind: input, shape index: {}]   ;;  %s14530_s4 = inlined_call_operand.vmem [shape: f32[1,224], index: 4, kind: input, shape index: {}]   ;;  %s14531_s5 = inlined_call_operand.vmem [shape: bf16[3,224,256], index: 5, kind: input, shape index: {}]   ;;  %s14532_s6 = inlined_call_operand.vmem [shape: f32[1,256], index: 6, kind: input, shape index: {}]   ;;  %s14533_s7 = inlined_call_operand.hbm [shape: f32[128,448], index: 7, kind: output, shape index: {}]  }
   0x1   :  { %v10080_v0 = vld [vmem:[%s14527_s1 + $0x4] ss:$12 sps:$4 sm:$0xff]   ;;  %v10082_v1 = vld [vmem:[%s14527_s1 + $0xc8] ss:$12 sps:$4 sm:$0xff]   ;;  %v10083_v2 = vld [vmem:[%s14527_s1] ss:$12 sps:$4 sm:$0xff]  }
   0x2   :  { %3482 = vmatprep.subr.bf16.mxu0 %v10080_v0  ;;  %9151 = vmatprep.subr.bf16.mxu1 %v10082_v1  ;;  %v10084_v3 = vld [vmem:[%s14527_s1 + $0x8] ss:$12 sps:$4 sm:$0xff]   ;;  %v10087_v5 = vld [vmem:[%s14527_s1 + $0xe0] ss:$12 sps:$4 sm:$0xff]   ;;  %v10088_v6 = vld [vmem:[%s14527_s1 + $0x18] ss:$12 sps:$4 sm:$0xff]  }
   0x3   :  { %3483 = vmatpush1.bf16.msra.mxu0 %v10083_v2  ;;  %v10085_v4 = vld [vmem:[%s14527_s1 + $0x1c] ss:$12 sps:$4 sm:$0xff]   ;;  %9152 = vmatpush3.bf16.msra.mxu1 %v10084_v3  ;;  %v10089_v7 = vld [vmem:[%s14527_s1 + $0x20] ss:$12 sps:$4 sm:$0xff]   ;;  %v10092_v9 = vld [vmem:[%s14527_s1 + $0xf8] ss:$12 sps:$4 sm:$0xff]  }
   0x4   :  { %3484 = vmatprep.subr.bf16.mxu0 %v10085_v4  ;;  %9153 = vmatprep.subr.bf16.mxu1 %v10087_v5  ;;  %v10090_v8 = vld [vmem:[%s14527_s1 + $0x34] ss:$12 sps:$4 sm:$0xff]   ;;  %v10093_v10 = vld [vmem:[%s14527_s1 + $0x30] ss:$12 sps:$4 sm:$0xff]   ;;  %v10094_v11 = vld [vmem:[%s14527_s1 + $0x38] ss:$12 sps:$4 sm:$0xff]  }
   0x5   :  { %v10095_v12 = vld [vmem:[%s14527_s1 + $0x4c] ss:$12 sps:$4 sm:$0xff]   ;;  %v10097_v13 = vld [vmem:[%s14527_s1 + $0x110] ss:$12 sps:$4 sm:$0xff]   ;;  %v10098_v14 = vld [vmem:[%s14527_s1 + $0x48] ss:$12 sps:$4 sm:$0xff]  }
   0x6   :  { %v10099_v15 = vld [vmem:[%s14527_s1 + $0x50] ss:$12 sps:$4 sm:$0xff]   ;;  %v10102_v17 = vld [vmem:[%s14527_s1 + $0x128] ss:$12 sps:$4 sm:$0xff]   ;;  %v10103_v18 = vld [vmem:[%s14527_s1 + $0x60] ss:$12 sps:$4 sm:$0xff]  }
   0x7   :  { %3485 = vmatpush1.bf16.msra.mxu0 %v10088_v6  ;;  %9154 = vmatpush3.bf16.msra.mxu1 %v10089_v7  ;;  %v10100_v16 = vld [vmem:[%s14527_s1 + $0x64] ss:$12 sps:$4 sm:$0xff]   ;;  %v10104_v19 = vld [vmem:[%s14527_s1 + $0x68] ss:$12 sps:$4 sm:$0xff]   ;;  %v10107_v21 = vld [vmem:[%s14527_s1 + $0x140] ss:$12 sps:$4 sm:$0xff]  }
   0x8   :  { %3486 = vmatprep.subr.bf16.mxu0 %v10090_v8  ;;  %9155 = vmatprep.subr.bf16.mxu1 %v10092_v9  ;;  %v10105_v20 = vld [vmem:[%s14527_s1 + $0x7c] ss:$12 sps:$4 sm:$0xff]   ;;  %v10108_v22 = vld [vmem:[%s14527_s1 + $0x78] ss:$12 sps:$4 sm:$0xff]   ;;  %v10109_v23 = vld [vmem:[%s14527_s1 + $0x80] ss:$12 sps:$4 sm:$0xff]  }
   0x9   :  { %v10110_v24 = vld [vmem:[%s14527_s1 + $0x94] ss:$12 sps:$4 sm:$0xff]   ;;  %v10112_v25 = vld [vmem:[%s14527_s1 + $0x158] ss:$12 sps:$4 sm:$0xff]   ;;  %v10113_v26 = vld [vmem:[%s14527_s1 + $0x90] ss:$12 sps:$4 sm:$0xff]  }
   0xa   :  { %v10114_v27 = vld [vmem:[%s14527_s1 + $0x98] ss:$12 sps:$4 sm:$0xff]   ;;  %v10117_v29 = vld [vmem:[%s14527_s1 + $0x170] ss:$12 sps:$4 sm:$0xff]   ;;  %v10118_v32 = vld [vmem:[%s14527_s1 + $0xa8] ss:$12 sps:$4 sm:$0xff]  }
   0xb   :  { %3487 = vmatpush1.bf16.msra.mxu0 %v10093_v10  ;;  %9156 = vmatpush3.bf16.msra.mxu1 %v10094_v11  ;;  %v10115_v28 = vld [vmem:[%s14527_s1 + $0xac] ss:$12 sps:$4 sm:$0xff]   ;;  %v137_v30 = vld [vmem:[%s14526_s0] sm:$0xff]  ;;  %v10119_v34 = vld [vmem:[%s14527_s1 + $0xb0] ss:$12 sps:$4 sm:$0xff]  }
   0xc   :  { %3488 = vmatprep.subr.bf16.mxu0 %v10095_v12  ;;  %9157 = vmatprep.subr.bf16.mxu1 %v10097_v13  ;;  %v145_v31 = vld [vmem:[%s14526_s0 + $0x40] sm:$0xff]  ;;  %v10123_v40 = vld [vmem:[%s14527_s1 + $0xdc] ss:$12 sps:$4 sm:$0xff]   ;;  %v10129_v48 = vld [vmem:[%s14527_s1 + $0x10c] ss:$12 sps:$4 sm:$0xff]  }
   0xd   :  { %v8332_v33 = vcombine.high %v137_v30, %v145_v31  ;;  %v10120_v35 = vld [vmem:[%s14527_s1 + $0xc4] ss:$12 sps:$4 sm:$0xff]   ;;  %v11008_v38 = vcombine.low %v137_v30, %v145_v31  ;;  %v10122_v39 = vld [vmem:[%s14527_s1 + $0xc0] ss:$12 sps:$4 sm:$0xff]   ;;  %v10131_v50 = vld [vmem:[%s14527_s1 + $0x108] ss:$12 sps:$4 sm:$0xff]  }
   0xe   :  { %v153_v36 = vld [vmem:[%s14526_s0 + $0x80] sm:$0xff]  ;;  %v10128_v47 = vld [vmem:[%s14527_s1 + $0xf0] ss:$12 sps:$4 sm:$0xff]   ;;  %v10147_v51 = vld [vmem:[%s14527_s1 + $0x248] ss:$12 sps:$4 sm:$0xff]  }
   0xf   :  { %3489 = vmatpush1.bf16.msra.mxu0 %v10098_v14  ;;  %9158 = vmatpush3.bf16.msra.mxu1 %v10099_v15  ;;  %v161_v37 = vld [vmem:[%s14526_s0 + $0xc0] sm:$0xff]  ;;  %v10148_v53 = vld [vmem:[%s14527_s1 + $0x188] ss:$12 sps:$4 sm:$0xff]   ;;  %v10162_v2 = vld [vmem:[%s14527_s1 + $0x290] ss:$12 sps:$4 sm:$0xff]  }
  0x10   :  { %3490 = vmatprep.subr.bf16.mxu0 %v10100_v16  ;;  %9159 = vmatprep.subr.bf16.mxu1 %v10102_v17  ;;  %v11016_v41 = vcombine.high %v153_v36, %v161_v37  ;;  %v10125_v42 = vld [vmem:[%s14527_s1 + $0xd8] ss:$12 sps:$4 sm:$0xff]   ;;  %v10126_v43 = vld [vmem:[%s14527_s1 + $0xf4] ss:$12 sps:$4 sm:$0xff]   ;;  %v11032_v46 = vcombine.low %v153_v36, %v161_v37  ;;  %v10135_v60 = vld [vmem:[%s14527_s1 + $0x13c] ss:$12 sps:$4 sm:$0xff]  }
  0x11   :  { %4418 = vmatprep.mubr.bf16.mxu1 %v8332_v33  ;;  %3514 = vmatprep.mubr.bf16.mxu0 %v8332_v33  ;;  %v169_v44 = vld [vmem:[%s14526_s0 + $0x100] sm:$0xff]  ;;  %v10163_v5 = vld [vmem:[%s14527_s1 + $0x1d0] ss:$12 sps:$4 sm:$0xff]   ;;  %v10141_v8 = vld [vmem:[%s14527_s1 + $0x16c] ss:$12 sps:$4 sm:$0xff]  }
  0x12   :  { %v177_v45 = vld [vmem:[%s14526_s0 + $0x140] sm:$0xff]  ;;  %v10140_v7 = vld [vmem:[%s14527_s1 + $0x150] ss:$12 sps:$4 sm:$0xff]   ;;  %v10167_v10 = vld [vmem:[%s14527_s1 + $0x2a8] ss:$12 sps:$4 sm:$0xff]  }
  0x13   :  { %3491 = vmatpush1.bf16.msra.mxu0 %v10103_v18  ;;  %9160 = vmatpush3.bf16.msra.mxu1 %v10104_v19  ;;  %v11040_v49 = vcombine.high %v169_v44, %v177_v45  ;;  %v10132_v52 = vld [vmem:[%s14527_s1 + $0x124] ss:$12 sps:$4 sm:$0xff]   ;;  %v10152_v56 = vld [vmem:[%s14527_s1 + $0x260] ss:$12 sps:$4 sm:$0xff]   ;;  %v11068_v58 = vcombine.low %v169_v44, %v177_v45  ;;  %v10143_v11 = vld [vmem:[%s14527_s1 + $0x168] ss:$12 sps:$4 sm:$0xff]  }
  0x14   :  { %3492 = vmatprep.subr.bf16.mxu0 %v10105_v20  ;;  %9161 = vmatprep.subr.bf16.mxu1 %v10107_v21  ;;  %v185_v54 = vld [vmem:[%s14526_s0 + $0x180] sm:$0xff]  ;;  %v10168_v12 = vld [vmem:[%s14527_s1 + $0x1e8] ss:$12 sps:$4 sm:$0xff]   ;;  %v10154_v30 = vld [vmem:[%s14527_s1 + $0x1b0] ss:$12 sps:$4 sm:$0xff]  }
  0x15   :  { %v193_v55 = vld [vmem:[%s14526_s0 + $0x1c0] sm:$0xff]  ;;  %v10151_v20 = vld [vmem:[%s14527_s1 + $0x19c] ss:$12 sps:$4 sm:$0xff]  }
  0x16   :  { %v10153_v57 = vld [vmem:[%s14527_s1 + $0x1a0] ss:$12 sps:$4 sm:$0xff]   ;;  %v11076_v61 = vcombine.high %v185_v54, %v193_v55  ;;  %v10157_v62 = vld [vmem:[%s14527_s1 + $0x278] ss:$12 sps:$4 sm:$0xff]   ;;  %v11104_v6 = vcombine.low %v185_v54, %v193_v55  ;;  %v10211_v44 = vld [vmem:[%s14527_s1 + $0x3c8] ss:$12 sps:$4 sm:$0xff]  }
  0x17   :  { %3493 = vmatpush1.bf16.msra.mxu0 %v10108_v22  ;;  %9162 = vmatpush3.bf16.msra.mxu1 %v10109_v23  ;;  %v10134_v59 = vld [vmem:[%s14527_s1 + $0x120] ss:$12 sps:$4 sm:$0xff]   ;;  %v10158_v63 = vld [vmem:[%s14527_s1 + $0x1b8] ss:$12 sps:$4 sm:$0xff]  }
  0x18   :  { %3494 = vmatprep.subr.bf16.mxu0 %v10110_v24  ;;  %9163 = vmatprep.subr.bf16.mxu1 %v10112_v25  ;;  %v10137_v0 = vld [vmem:[%s14527_s1 + $0x138] ss:$12 sps:$4 sm:$0xff]   ;;  %v10138_v1 = vld [vmem:[%s14527_s1 + $0x154] ss:$12 sps:$4 sm:$0xff]   ;;  %v10182_v25 = vld [vmem:[%s14527_s1 + $0x2f0] ss:$12 sps:$4 sm:$0xff]  }
  0x19   :  { %v201_v3 = vld [vmem:[%s14526_s0 + $0x200] sm:$0xff]  ;;  %v138_v45 = vld [vmem:[%s14526_s0 + $0x8] sm:$0xff] }
  0x1a   :  { %v209_v4 = vld [vmem:[%s14526_s0 + $0x240] sm:$0xff]  ;;  %v162_v54 = vld [vmem:[%s14526_s0 + $0xc8] sm:$0xff] }
  0x1b   :  { %3495 = vmatpush1.bf16.msra.mxu0 %v10113_v26  ;;  %9164 = vmatpush3.bf16.msra.mxu1 %v10114_v27  ;;  %v11112_v9 = vcombine.high %v201_v3, %v209_v4  ;;  %v10172_v13 = vld [vmem:[%s14527_s1 + $0x2c0] ss:$12 sps:$4 sm:$0xff]   ;;  %v10146_v14 = vld [vmem:[%s14527_s1 + $0x184] ss:$12 sps:$4 sm:$0xff]   ;;  %v11143_v19 = vcombine.low %v201_v3, %v209_v4 }
  0x1c   :  { %3496 = vmatprep.subr.bf16.mxu0 %v10115_v28  ;;  %9165 = vmatprep.subr.bf16.mxu1 %v10117_v29  ;;  %v217_v15 = vld [vmem:[%s14526_s0 + $0x280] sm:$0xff]  ;;  %v10183_v29 = vld [vmem:[%s14527_s1 + $0x230] ss:$12 sps:$4 sm:$0xff]  }
  0x1d   :  { %v225_v16 = vld [vmem:[%s14526_s0 + $0x2c0] sm:$0xff]  ;;  %v10190_v3 = vld [vmem:[%s14527_s1 + $0x270] ss:$12 sps:$4 sm:$0xff]  }
  0x1e   :  { %v10173_v17 = vld [vmem:[%s14527_s1 + $0x200] ss:$12 sps:$4 sm:$0xff]   ;;  %v10149_v21 = vld [vmem:[%s14527_s1 + $0x198] ss:$12 sps:$4 sm:$0xff]   ;;  %v11151_v22 = vcombine.high %v217_v15, %v225_v16  ;;  %v11181_v31 = vcombine.low %v217_v15, %v225_v16 }
  0x1f   :  { %3497 = vmatpush1.bf16.msra.mxu0 %v10118_v32  ;;  %9166 = vmatpush3.bf16.msra.mxu1 %v10119_v34  ;;  %v10144_v18 = vld [vmem:[%s14527_s1 + $0x180] ss:$12 sps:$4 sm:$0xff]   ;;  %v10177_v23 = vld [vmem:[%s14527_s1 + $0x2d8] ss:$12 sps:$4 sm:$0xff]   ;;  %v10159_v34 = vld [vmem:[%s14527_s1 + $0x1c8] ss:$12 sps:$4 sm:$0xff]  }
  0x20   :  { %3498 = vmatprep.subr.bf16.mxu0 %v10120_v35  ;;  %9215 = vmatprep.subr.bf16.mxu1 %v10147_v51  ;;  %v10178_v24 = vld [vmem:[%s14527_s1 + $0x218] ss:$12 sps:$4 sm:$0xff]   ;;  %v10156_v26 = vld [vmem:[%s14527_s1 + $0x1b4] ss:$12 sps:$4 sm:$0xff]  }
  0x21   :  { %v233_v27 = vld [vmem:[%s14526_s0 + $0x300] sm:$0xff]  ;;  %v10161_v32 = vld [vmem:[%s14527_s1 + $0x1cc] ss:$12 sps:$4 sm:$0xff]   ;;  %v10179_v51 = vld [vmem:[%s14527_s1 + $0x228] ss:$12 sps:$4 sm:$0xff]  }
  0x22   :  { %4419 = vmatmul.mubr.bf16.vlgmr.msra.gmra.mrb[0].mxu1 %v11008_v38  ;;  %v241_v28 = vld [vmem:[%s14526_s0 + $0x340] sm:$0xff] }
  0x23   :  { %3499 = vmatpush1.bf16.msra.mxu0 %v10122_v39  ;;  %4426 = vmatprep.mubr.bf16.mxu1 %v11016_v41  ;;  %v11186_v33 = vcombine.high %v233_v27, %v241_v28  ;;  %v10166_v35 = vld [vmem:[%s14527_s1 + $0x1e4] ss:$12 sps:$4 sm:$0xff]   ;;  %v11207_v39 = vcombine.low %v233_v27, %v241_v28  ;;  %v10196_v15 = vld [vmem:[%s14527_s1 + $0x2a0] ss:$12 sps:$4 sm:$0xff]  }
  0x24   :  { %3500 = vmatprep.subr.bf16.mxu0 %v10123_v40  ;;  %9216 = vmatpush3.bf16.msra.mxu1 %v10148_v53  ;;  %v249_v36 = vld [vmem:[%s14526_s0 + $0x380] sm:$0xff]  ;;  %v10171_v40 = vld [vmem:[%s14527_s1 + $0x1fc] ss:$12 sps:$4 sm:$0xff]  }
  0x25   :  { %9217 = vmatprep.subr.bf16.mxu1 %v10152_v56  ;;  %v257_v37 = vld [vmem:[%s14526_s0 + $0x3c0] sm:$0xff]  ;;  %v154_v53 = vld [vmem:[%s14526_s0 + $0x88] sm:$0xff]  ;;  %v10202_v27 = vld [vmem:[%s14527_s1 + $0x2d0] ss:$12 sps:$4 sm:$0xff]  }
  0x26   :  { %v10184_v56 = vld [vmem:[%s14527_s1 + $0x240] ss:$12 sps:$4 sm:$0xff]   ;;  %v11300_v4 = vcombine.low %v154_v53, %v162_v54 }
  0x27   :  { %3501 = vmatpush1.bf16.msra.mxu0 %v10125_v42  ;;  %v10169_v42 = vld [vmem:[%s14527_s1 + $0x1f8] ss:$12 sps:$4 sm:$0xff]  }
  0x28   :  { %3502 = vmatprep.subr.bf16.mxu0 %v10126_v43  ;;  %9218 = vmatpush3.bf16.msra.mxu1 %v10153_v57  ;;  %v10176_v43 = vld [vmem:[%s14527_s1 + $0x214] ss:$12 sps:$4 sm:$0xff]   ;;  %v10189_v57 = vld [vmem:[%s14527_s1 + $0x25c] ss:$12 sps:$4 sm:$0xff]  }
  0x29   :  { %9219 = vmatprep.subr.bf16.mxu1 %v10157_v62  ;;  %v10192_v62 = vld [vmem:[%s14527_s1 + $0x274] ss:$12 sps:$4 sm:$0xff]  }
  0x2a   :  { %4427 = vmatmul.mubr.bf16.gmra.mrb[4].mxu1 %v11032_v46 }
  0x2b   :  { %3503 = vmatpush1.bf16.msra.mxu0 %v10128_v47  ;;  %4434 = vmatprep.mubr.bf16.mxu1 %v11040_v49  ;;  %v10174_v47 = vld [vmem:[%s14527_s1 + $0x210] ss:$12 sps:$4 sm:$0xff]  }
  0x2c   :  { %3504 = vmatprep.subr.bf16.mxu0 %v10129_v48  ;;  %9220 = vmatpush3.bf16.msra.mxu1 %v10158_v63  ;;  %v11236_v48 = vcombine.low %v249_v36, %v257_v37  ;;  %v170_v63 = vld [vmem:[%s14526_s0 + $0x108] sm:$0xff] }
  0x2d   :  { %9221 = vmatprep.subr.bf16.mxu1 %v10162_v2  ;;  %v10221_v2 = vld [vmem:[%s14527_s1 + $0x3f8] ss:$12 sps:$4 sm:$0xff]  }
  0x2f   :  { %3505 = vmatpush1.bf16.msra.mxu0 %v10131_v50 }
  0x30   :  { %3506 = vmatprep.subr.bf16.mxu0 %v10132_v52  ;;  %9222 = vmatpush3.bf16.msra.mxu1 %v10163_v5  ;;  %v10186_v52 = vld [vmem:[%s14527_s1 + $0x244] ss:$12 sps:$4 sm:$0xff]   ;;  %v10195_v5 = vld [vmem:[%s14527_s1 + $0x28c] ss:$12 sps:$4 sm:$0xff]  }
  0x31   :  { %9223 = vmatprep.subr.bf16.mxu1 %v10167_v10  ;;  %v10198_v10 = vld [vmem:[%s14527_s1 + $0x2a4] ss:$12 sps:$4 sm:$0xff]  }
  0x32   :  { %4435 = vmatmul.mubr.bf16.gmra.mrb[8].mxu1 %v11068_v58 }
  0x33   :  { %3507 = vmatpush1.bf16.msra.mxu0 %v10134_v59  ;;  %4442 = vmatprep.mubr.bf16.mxu1 %v11076_v61  ;;  %v11270_v59 = vcombine.high %v154_v53, %v162_v54  ;;  %v250_v53 = vld [vmem:[%s14526_s0 + $0x388] sm:$0xff] }
  0x34   :  { %3508 = vmatprep.subr.bf16.mxu0 %v10135_v60  ;;  %9224 = vmatpush3.bf16.msra.mxu1 %v10168_v12  ;;  %v10212_v60 = vld [vmem:[%s14527_s1 + $0x308] ss:$12 sps:$4 sm:$0xff]  }
  0x35   :  { %9225 = vmatprep.subr.bf16.mxu1 %v10172_v13  ;;  %v194_v12 = vld [vmem:[%s14526_s0 + $0x1c8] sm:$0xff]  ;;  %v10227_v13 = vld [vmem:[%s14527_s1 + $0x350] ss:$12 sps:$4 sm:$0xff]  }
  0x36   :  { %v258_v54 = vld [vmem:[%s14526_s0 + $0x3c8] sm:$0xff] }
  0x37   :  { %3509 = vmatpush1.bf16.msra.mxu0 %v10137_v0  ;;  %v178_v0 = vld [vmem:[%s14526_s0 + $0x148] sm:$0xff] }
  0x38   :  { %3510 = vmatprep.subr.bf16.mxu0 %v10138_v1  ;;  %9226 = vmatpush3.bf16.msra.mxu1 %v10173_v17  ;;  %v10217_v1 = vld [vmem:[%s14527_s1 + $0x320] ss:$12 sps:$4 sm:$0xff]   ;;  %v11338_v16 = vcombine.low %v170_v63, %v178_v0  ;;  %v10201_v17 = vld [vmem:[%s14527_s1 + $0x2bc] ss:$12 sps:$4 sm:$0xff]  }
  0x39   :  { %9227 = vmatprep.subr.bf16.mxu1 %v10177_v23  ;;  %v202_v23 = vld [vmem:[%s14526_s0 + $0x208] sm:$0xff] }
  0x3a   :  { %4443 = vmatmul.mubr.bf16.gmra.mrb[12].mxu1 %v11104_v6 }
  0x3b   :  { %3511 = vmatpush1.bf16.msra.mxu0 %v10140_v7  ;;  %4450 = vmatprep.mubr.bf16.mxu1 %v11112_v9  ;;  %v11308_v7 = vcombine.high %v170_v63, %v178_v0  ;;  %v10238_v63 = vld [vmem:[%s14527_s1 + $0x390] ss:$12 sps:$4 sm:$0xff]   ;;  %v11492_v0 = vcombine.low %v250_v53, %v258_v54 }
  0x3c   :  { %3512 = vmatprep.subr.bf16.mxu0 %v10141_v8  ;;  %9228 = vmatpush3.bf16.msra.mxu1 %v10178_v24  ;;  %v10222_v8 = vld [vmem:[%s14527_s1 + $0x338] ss:$12 sps:$4 sm:$0xff]   ;;  %v210_v24 = vld [vmem:[%s14526_s0 + $0x248] sm:$0xff] }
  0x3d   :  { %9229 = vmatprep.subr.bf16.mxu1 %v10182_v25  ;;  %v10237_v25 = vld [vmem:[%s14527_s1 + $0x380] ss:$12 sps:$4 sm:$0xff]  }
  0x3f   :  { %3513 = vmatpush1.bf16.msra.mxu0 %v10143_v11  ;;  %v186_v11 = vld [vmem:[%s14526_s0 + $0x188] sm:$0xff] }
  0x40   :  { %3595 = vmatprep.subr.bf16.mxu0 %v10146_v14  ;;  %9230 = vmatpush3.bf16.msra.mxu1 %v10183_v29  ;;  %v10231_v14 = vld [vmem:[%s14527_s1 + $0x428] ss:$12 sps:$4 sm:$0xff]   ;;  %v11376_v28 = vcombine.low %v186_v11, %v194_v12  ;;  %v10207_v29 = vld [vmem:[%s14527_s1 + $0x2ec] ss:$12 sps:$4 sm:$0xff]  }
  0x41   :  { %9279 = vmatprep.subr.bf16.mxu1 %v10211_v44  ;;  %v10220_v44 = vld [vmem:[%s14527_s1 + $0x334] ss:$12 sps:$4 sm:$0xff]  }
  0x42   :  { %3515 = vmatmul.mubr.bf16.vlgmr.msra.gmra.mrb[0].mxu0 %v11008_v38  ;;  %4451 = vmatmul.mubr.bf16.gmra.mrb[16].mxu1 %v11143_v19  ;;  %v10164_v38 = vld [vmem:[%s14527_s1 + $0x1e0] ss:$12 sps:$4 sm:$0xff]  }
  0x43   :  { %3596 = vmatpush1.bf16.msra.mxu0 %v10144_v18  ;;  %3524 = vmatprep.mubr.bf16.mxu0 %v11016_v41  ;;  %v11212_v41 = vcombine.high %v249_v36, %v257_v37  ;;  %v11343_v18 = vcombine.high %v186_v11, %v194_v12  ;;  %v10208_v36 = vld [vmem:[%s14527_s1 + $0x300] ss:$12 sps:$4 sm:$0xff]   ;;  %v10247_v37 = vld [vmem:[%s14527_s1 + $0x3b0] ss:$12 sps:$4 sm:$0xff]   ;;  %v10276_v11 = vld [vmem:[%s14527_s1 + $0x488] ss:$12 sps:$4 sm:$0xff]  }
  0x44   :  { %3597 = vmatprep.subr.bf16.mxu0 %v10151_v20  ;;  %4458 = vmatprep.mubr.bf16.mxu1 %v11151_v22  ;;  %v10236_v20 = vld [vmem:[%s14527_s1 + $0x440] ss:$12 sps:$4 sm:$0xff]  }
  0x45   :  { %v10280_v12 = vld [vmem:[%s14527_s1 + $0x560] ss:$12 sps:$4 sm:$0xff]  }
  0x47   :  { %3598 = vmatpush1.bf16.msra.mxu0 %v10149_v21  ;;  %v10199_v21 = vld [vmem:[%s14527_s1 + $0x2b8] ss:$12 sps:$4 sm:$0xff]  }
  0x48   :  { %3599 = vmatprep.subr.bf16.mxu0 %v10156_v26  ;;  %v10241_v26 = vld [vmem:[%s14527_s1 + $0x458] ss:$12 sps:$4 sm:$0xff]  }
  0x4a   :  { %3525 = vmatmul.mubr.bf16.gmra.mrb[4].mxu0 %v11032_v46  ;;  %4459 = vmatmul.mubr.bf16.gmra.mrb[20].mxu1 %v11181_v31  ;;  %v146_v46 = vld [vmem:[%s14526_s0 + $0x48] sm:$0xff] }
  0x4b   :  { %3600 = vmatpush1.bf16.msra.mxu0 %v10154_v30  ;;  %3534 = vmatprep.mubr.bf16.mxu0 %v11040_v49  ;;  %v10181_v49 = vld [vmem:[%s14527_s1 + $0x22c] ss:$12 sps:$4 sm:$0xff]   ;;  %v11241_v50 = vcombine.high %v138_v45, %v146_v46  ;;  %v11259_v55 = vcombine.low %v138_v45, %v146_v46  ;;  %v11381_v30 = vcombine.high %v202_v23, %v210_v24 }
  0x4c   :  { %3601 = vmatprep.subr.bf16.mxu0 %v10161_v32  ;;  %4466 = vmatprep.mubr.bf16.mxu1 %v11186_v33  ;;  %v10246_v32 = vld [vmem:[%s14527_s1 + $0x470] ss:$12 sps:$4 sm:$0xff]   ;;  %v234_v45 = vld [vmem:[%s14526_s0 + $0x308] sm:$0xff] }
  0x4d   :  { %v242_v46 = vld [vmem:[%s14526_s0 + $0x348] sm:$0xff] }
  0x4f   :  { %3602 = vmatpush1.bf16.msra.mxu0 %v10159_v34  ;;  %v10210_v34 = vld [vmem:[%s14527_s1 + $0x304] ss:$12 sps:$4 sm:$0xff]  }
  0x50   :  { %3603 = vmatprep.subr.bf16.mxu0 %v10166_v35  ;;  %v218_v35 = vld [vmem:[%s14526_s0 + $0x288] sm:$0xff] }
  0x52   :  { %3535 = vmatmul.mubr.bf16.gmra.mrb[8].mxu0 %v11068_v58  ;;  %4467 = vmatmul.mubr.bf16.gmra.mrb[24].mxu1 %v11207_v39  ;;  %v10187_v58 = vld [vmem:[%s14527_s1 + $0x258] ss:$12 sps:$4 sm:$0xff]  }
  0x53   :  { %3604 = vmatpush1.bf16.msra.mxu0 %v10164_v38  ;;  %3544 = vmatprep.mubr.bf16.mxu0 %v11076_v61  ;;  %v10216_v61 = vld [vmem:[%s14527_s1 + $0x3e0] ss:$12 sps:$4 sm:$0xff]  }
  0x54   :  { %3605 = vmatprep.subr.bf16.mxu0 %v10171_v40  ;;  %4474 = vmatprep.mubr.bf16.mxu1 %v11212_v41  ;;  %v226_v38 = vld [vmem:[%s14526_s0 + $0x2c8] sm:$0xff] }
  0x55   :  { %v10275_v40 = vld [vmem:[%s14527_s1 + $0x548] ss:$12 sps:$4 sm:$0xff]  }
  0x57   :  { %3606 = vmatpush1.bf16.msra.mxu0 %v10169_v42  ;;  %v11419_v42 = vcombine.high %v218_v35, %v226_v38 }
  0x58   :  { %3607 = vmatprep.subr.bf16.mxu0 %v10176_v43  ;;  %v10213_v43 = vld [vmem:[%s14527_s1 + $0x318] ss:$12 sps:$4 sm:$0xff]  }
  0x5a   :  { %3545 = vmatmul.mubr.bf16.gmra.mrb[12].mxu0 %v11104_v6  ;;  %4475 = vmatmul.mubr.bf16.gmra.mrb[28].mxu1 %v11236_v48  ;;  %v10193_v6 = vld [vmem:[%s14527_s1 + $0x288] ss:$12 sps:$4 sm:$0xff]  }
  0x5b   :  { %3608 = vmatpush1.bf16.msra.mxu0 %v10174_v47  ;;  %3554 = vmatprep.mubr.bf16.mxu0 %v11112_v9  ;;  %v10226_v9 = vld [vmem:[%s14527_s1 + $0x410] ss:$12 sps:$4 sm:$0xff]  }
  0x5c   :  { %3609 = vmatprep.subr.bf16.mxu0 %v10181_v49  ;;  %4515 = vmatprep.mubr.bf16.mxu1 %v11241_v50  ;;  %v10218_v47 = vld [vmem:[%s14527_s1 + $0x330] ss:$12 sps:$4 sm:$0xff]   ;;  %v10225_v49 = vld [vmem:[%s14527_s1 + $0x34c] ss:$12 sps:$4 sm:$0xff]  }
  0x5f   :  { %3610 = vmatpush1.bf16.msra.mxu0 %v10179_v51  ;;  %v10223_v51 = vld [vmem:[%s14527_s1 + $0x348] ss:$12 sps:$4 sm:$0xff]  }
  0x60   :  { %3611 = vmatprep.subr.bf16.mxu0 %v10186_v52  ;;  %v10230_v52 = vld [vmem:[%s14527_s1 + $0x364] ss:$12 sps:$4 sm:$0xff]  }
  0x62   :  { %3555 = vmatmul.mubr.bf16.gmra.mrb[16].mxu0 %v11143_v19  ;;  %4516 = vmatmul.mubr.bf16.vlgmr.msra.gmra.mrb[32].mxu1 %v11259_v55  ;;  %v10232_v19 = vld [vmem:[%s14527_s1 + $0x368] ss:$12 sps:$4 sm:$0xff]  }
  0x63   :  { %3612 = vmatpush1.bf16.msra.mxu0 %v10184_v56  ;;  %3564 = vmatprep.mubr.bf16.mxu0 %v11151_v22  ;;  %v10204_v22 = vld [vmem:[%s14527_s1 + $0x2d4] ss:$12 sps:$4 sm:$0xff]   ;;  %v11466_v56 = vcombine.low %v234_v45, %v242_v46 }
  0x64   :  { %3613 = vmatprep.subr.bf16.mxu0 %v10189_v57  ;;  %4523 = vmatprep.mubr.bf16.mxu1 %v11270_v59  ;;  %v10235_v57 = vld [vmem:[%s14527_s1 + $0x37c] ss:$12 sps:$4 sm:$0xff]  }
  0x65   :  { %9280 = vmatpush3.bf16.msra.mxu1 %v10212_v60  ;;  %v10240_v60 = vld [vmem:[%s14527_s1 + $0x394] ss:$12 sps:$4 sm:$0xff]  }
  0x66   :  { %9281 = vmatprep.subr.bf16.mxu1 %v10216_v61  ;;  %v139_v61 = vld [vmem:[%s14526_s0 + $0x10] sm:$0xff] }
  0x67   :  { %3614 = vmatpush1.bf16.msra.mxu0 %v10187_v58  ;;  %v11471_v58 = vcombine.high %v250_v53, %v258_v54  ;;  %v227_v53 = vld [vmem:[%s14526_s0 + $0x2d0] sm:$0xff] }
  0x68   :  { %3615 = vmatprep.subr.bf16.mxu0 %v10192_v62  ;;  %v147_v62 = vld [vmem:[%s14526_s0 + $0x50] sm:$0xff] }
  0x69   :  { %9282 = vmatpush3.bf16.msra.mxu1 %v10217_v1  ;;  %v10245_v1 = vld [vmem:[%s14527_s1 + $0x3ac] ss:$12 sps:$4 sm:$0xff]   ;;  %v10339_v54 = vld [vmem:[%s14527_s1 + $0x6c8] ss:$12 sps:$4 sm:$0xff]  }
  0x6a   :  { %3565 = vmatmul.mubr.bf16.gmra.mrb[20].mxu0 %v11181_v31  ;;  %9283 = vmatprep.subr.bf16.mxu1 %v10221_v2  ;;  %v10242_v31 = vld [vmem:[%s14527_s1 + $0x398] ss:$12 sps:$4 sm:$0xff]   ;;  %v11497_v2 = vcombine.high %v139_v61, %v147_v62 }
  0x6b   :  { %4524 = vmatmul.mubr.bf16.gmra.mrb[36].mxu1 %v11300_v4  ;;  %3616 = vmatpush1.bf16.msra.mxu0 %v10190_v3  ;;  %v10243_v3 = vld [vmem:[%s14527_s1 + $0x3a8] ss:$12 sps:$4 sm:$0xff]  }
  0x6c   :  { %3617 = vmatprep.subr.bf16.mxu0 %v10195_v5  ;;  %3574 = vmatprep.mubr.bf16.mxu0 %v11186_v33  ;;  %v10205_v33 = vld [vmem:[%s14527_s1 + $0x2e8] ss:$12 sps:$4 sm:$0xff]  }
  0x6d   :  { %4531 = vmatprep.mubr.bf16.mxu1 %v11308_v7  ;;  %9284 = vmatpush3.bf16.msra.mxu1 %v10222_v8  ;;  %v155_v5 = vld [vmem:[%s14526_s0 + $0x90] sm:$0xff]  ;;  %v10248_v8 = vld [vmem:[%s14527_s1 + $0x3c0] ss:$12 sps:$4 sm:$0xff]  }
  0x6e   :  { %9285 = vmatprep.subr.bf16.mxu1 %v10226_v9  ;;  %v10253_v9 = vld [vmem:[%s14527_s1 + $0x3dc] ss:$12 sps:$4 sm:$0xff]  }
  0x6f   :  { %3618 = vmatpush1.bf16.msra.mxu0 %v10193_v6  ;;  %v163_v6 = vld [vmem:[%s14526_s0 + $0xd0] sm:$0xff] }
  0x70   :  { %3619 = vmatprep.subr.bf16.mxu0 %v10198_v10  ;;  %v11523_v10 = vcombine.high %v155_v5, %v163_v6 }
  0x71   :  { %9286 = vmatpush3.bf16.msra.mxu1 %v10227_v13  ;;  %v10251_v13 = vld [vmem:[%s14527_s1 + $0x3d8] ss:$12 sps:$4 sm:$0xff]  }
  0x72   :  { %3575 = vmatmul.mubr.bf16.gmra.mrb[24].mxu0 %v11207_v39  ;;  %9287 = vmatprep.subr.bf16.mxu1 %v10231_v14  ;;  %v11411_v39 = vcombine.low %v202_v23, %v210_v24  ;;  %v10256_v14 = vld [vmem:[%s14527_s1 + $0x3f4] ss:$12 sps:$4 sm:$0xff]   ;;  %v10286_v23 = vld [vmem:[%s14527_s1 + $0x4b8] ss:$12 sps:$4 sm:$0xff]   ;;  %v10290_v24 = vld [vmem:[%s14527_s1 + $0x590] ss:$12 sps:$4 sm:$0xff]  }
  0x73   :  { %4532 = vmatmul.mubr.bf16.gmra.mrb[40].mxu1 %v11338_v16  ;;  %3620 = vmatpush1.bf16.msra.mxu0 %v10196_v15  ;;  %v171_v15 = vld [vmem:[%s14526_s0 + $0x110] sm:$0xff] }
  0x74   :  { %3621 = vmatprep.subr.bf16.mxu0 %v10201_v17  ;;  %3584 = vmatprep.mubr.bf16.mxu0 %v11212_v41  ;;  %v10215_v41 = vld [vmem:[%s14527_s1 + $0x31c] ss:$12 sps:$4 sm:$0xff]   ;;  %v179_v17 = vld [vmem:[%s14526_s0 + $0x150] sm:$0xff] }
  0x75   :  { %4539 = vmatprep.mubr.bf16.mxu1 %v11343_v18  ;;  %9288 = vmatpush3.bf16.msra.mxu1 %v10232_v19  ;;  %v10254_v19 = vld [vmem:[%s14527_s1 + $0x3f0] ss:$12 sps:$4 sm:$0xff]  }
  0x76   :  { %9289 = vmatprep.subr.bf16.mxu1 %v10236_v20  ;;  %v11556_v20 = vcombine.low %v155_v5, %v163_v6  ;;  %v251_v5 = vld [vmem:[%s14526_s0 + $0x390] sm:$0xff] }
  0x77   :  { %3622 = vmatpush1.bf16.msra.mxu0 %v10199_v21  ;;  %v10259_v21 = vld [vmem:[%s14527_s1 + $0x40c] ss:$12 sps:$4 sm:$0xff]   ;;  %v259_v6 = vld [vmem:[%s14526_s0 + $0x3d0] sm:$0xff] }
  0x78   :  { %3623 = vmatprep.subr.bf16.mxu0 %v10204_v22  ;;  %v11561_v22 = vcombine.high %v171_v15, %v179_v17 }
  0x79   :  { %9290 = vmatpush3.bf16.msra.mxu1 %v10237_v25  ;;  %v10257_v25 = vld [vmem:[%s14527_s1 + $0x408] ss:$12 sps:$4 sm:$0xff]  }
  0x7a   :  { %3585 = vmatmul.mubr.bf16.gmra.mrb[28].mxu0 %v11236_v48  ;;  %9291 = vmatprep.subr.bf16.mxu1 %v10241_v26  ;;  %v11440_v48 = vcombine.low %v218_v35, %v226_v38  ;;  %v10262_v26 = vld [vmem:[%s14527_s1 + $0x424] ss:$12 sps:$4 sm:$0xff]   ;;  %v10296_v35 = vld [vmem:[%s14527_s1 + $0x4e8] ss:$12 sps:$4 sm:$0xff]  }
  0x7b   :  { %4540 = vmatmul.mubr.bf16.gmra.mrb[44].mxu1 %v11376_v28  ;;  %3624 = vmatpush1.bf16.msra.mxu0 %v10202_v27  ;;  %v10291_v27 = vld [vmem:[%s14527_s1 + $0x4d0] ss:$12 sps:$4 sm:$0xff]   ;;  %v10268_v38 = vld [vmem:[%s14527_s1 + $0x454] ss:$12 sps:$4 sm:$0xff]  }
  0x7c   :  { %3625 = vmatprep.subr.bf16.mxu0 %v10207_v29  ;;  %3627 = vmatprep.mubr.bf16.mxu0 %v11241_v50  ;;  %v11445_v50 = vcombine.high %v234_v45, %v242_v46  ;;  %v195_v29 = vld [vmem:[%s14526_s0 + $0x1d0] sm:$0xff]  ;;  %v10271_v45 = vld [vmem:[%s14527_s1 + $0x46c] ss:$12 sps:$4 sm:$0xff]  }
  0x7d   :  { %4547 = vmatprep.mubr.bf16.mxu1 %v11381_v30  ;;  %9292 = vmatpush3.bf16.msra.mxu1 %v10242_v31  ;;  %v10260_v31 = vld [vmem:[%s14527_s1 + $0x420] ss:$12 sps:$4 sm:$0xff]  }
  0x7e   :  { %9293 = vmatprep.subr.bf16.mxu1 %v10246_v32  ;;  %v11594_v32 = vcombine.low %v171_v15, %v179_v17  ;;  %v10302_v15 = vld [vmem:[%s14527_s1 + $0x510] ss:$12 sps:$4 sm:$0xff]   ;;  %v10309_v17 = vld [vmem:[%s14527_s1 + $0x52c] ss:$12 sps:$4 sm:$0xff]  }
  0x7f   :  { %3626 = vmatpush1.bf16.msra.mxu0 %v10205_v33  ;;  %v10265_v33 = vld [vmem:[%s14527_s1 + $0x43c] ss:$12 sps:$4 sm:$0xff]  }
  0x80   :  { %3708 = vmatprep.subr.bf16.mxu0 %v10210_v34 }
  0x81   :  { %9294 = vmatpush3.bf16.msra.mxu1 %v10247_v37  ;;  %v10263_v37 = vld [vmem:[%s14527_s1 + $0x438] ss:$12 sps:$4 sm:$0xff]  }
  0x82   :  { %3628 = vmatmul.mubr.bf16.vlgmr.msra.gmra.mrb[0].mxu0 %v11259_v55  ;;  %9343 = vmatprep.subr.bf16.mxu1 %v10275_v40  ;;  %v10228_v55 = vld [vmem:[%s14527_s1 + $0x360] ss:$12 sps:$4 sm:$0xff]   ;;  %v211_v40 = vld [vmem:[%s14526_s0 + $0x250] sm:$0xff] }
  0x83   :  { %4548 = vmatmul.mubr.bf16.gmra.mrb[48].mxu1 %v11411_v39  ;;  %3709 = vmatpush1.bf16.msra.mxu0 %v10208_v36  ;;  %v10300_v36 = vld [vmem:[%s14527_s1 + $0x5c0] ss:$12 sps:$4 sm:$0xff]  }
  0x84   :  { %3710 = vmatprep.subr.bf16.mxu0 %v10215_v41  ;;  %3637 = vmatprep.mubr.bf16.mxu0 %v11270_v59  ;;  %v10233_v59 = vld [vmem:[%s14527_s1 + $0x378] ss:$12 sps:$4 sm:$0xff]   ;;  %v10301_v41 = vld [vmem:[%s14527_s1 + $0x500] ss:$12 sps:$4 sm:$0xff]  }
  0x85   :  { %4555 = vmatprep.mubr.bf16.mxu1 %v11419_v42 }
  0x87   :  { %3711 = vmatpush1.bf16.msra.mxu0 %v10213_v43  ;;  %v10266_v43 = vld [vmem:[%s14527_s1 + $0x450] ss:$12 sps:$4 sm:$0xff]  }
  0x88   :  { %3712 = vmatprep.subr.bf16.mxu0 %v10220_v44 }
  0x8a   :  { %3638 = vmatmul.mubr.bf16.gmra.mrb[4].mxu0 %v11300_v4  ;;  %v10250_v4 = vld [vmem:[%s14527_s1 + $0x3c4] ss:$12 sps:$4 sm:$0xff]  }
  0x8b   :  { %4556 = vmatmul.mubr.bf16.gmra.mrb[52].mxu1 %v11440_v48  ;;  %3713 = vmatpush1.bf16.msra.mxu0 %v10218_v47  ;;  %v10306_v47 = vld [vmem:[%s14527_s1 + $0x518] ss:$12 sps:$4 sm:$0xff]  }
  0x8c   :  { %3714 = vmatprep.subr.bf16.mxu0 %v10225_v49  ;;  %3647 = vmatprep.mubr.bf16.mxu0 %v11308_v7  ;;  %v11515_v7 = vcombine.low %v139_v61, %v147_v62  ;;  %v10269_v49 = vld [vmem:[%s14527_s1 + $0x468] ss:$12 sps:$4 sm:$0xff]  }
  0x8d   :  { %4563 = vmatprep.mubr.bf16.mxu1 %v11445_v50  ;;  %v235_v61 = vld [vmem:[%s14526_s0 + $0x310] sm:$0xff] }
  0x8e   :  { %v243_v62 = vld [vmem:[%s14526_s0 + $0x350] sm:$0xff] }
  0x8f   :  { %3715 = vmatpush1.bf16.msra.mxu0 %v10223_v51  ;;  %v219_v51 = vld [vmem:[%s14526_s0 + $0x290] sm:$0xff] }
  0x90   :  { %3716 = vmatprep.subr.bf16.mxu0 %v10230_v52  ;;  %v10311_v52 = vld [vmem:[%s14527_s1 + $0x530] ss:$12 sps:$4 sm:$0xff]  }
  0x92   :  { %3648 = vmatmul.mubr.bf16.gmra.mrb[8].mxu0 %v11338_v16  ;;  %v10281_v16 = vld [vmem:[%s14527_s1 + $0x4a0] ss:$12 sps:$4 sm:$0xff]  }
  0x93   :  { %4564 = vmatmul.mubr.bf16.gmra.mrb[56].mxu1 %v11466_v56  ;;  %3717 = vmatpush1.bf16.msra.mxu0 %v10228_v55  ;;  %v10272_v55 = vld [vmem:[%s14527_s1 + $0x480] ss:$12 sps:$4 sm:$0xff]  }
  0x94   :  { %3718 = vmatprep.subr.bf16.mxu0 %v10235_v57  ;;  %3657 = vmatprep.mubr.bf16.mxu0 %v11343_v18  ;;  %v10285_v18 = vld [vmem:[%s14527_s1 + $0x578] ss:$12 sps:$4 sm:$0xff]   ;;  %v10279_v57 = vld [vmem:[%s14527_s1 + $0x49c] ss:$12 sps:$4 sm:$0xff]  }
  0x95   :  { %4571 = vmatprep.mubr.bf16.mxu1 %v11471_v58 }
  0x97   :  { %3719 = vmatpush1.bf16.msra.mxu0 %v10233_v59  ;;  %v10277_v59 = vld [vmem:[%s14527_s1 + $0x498] ss:$12 sps:$4 sm:$0xff]  }
  0x98   :  { %3720 = vmatprep.subr.bf16.mxu0 %v10240_v60  ;;  %v10284_v60 = vld [vmem:[%s14527_s1 + $0x4b4] ss:$12 sps:$4 sm:$0xff]  }
  0x9a   :  { %3658 = vmatmul.mubr.bf16.gmra.mrb[12].mxu0 %v11376_v28  ;;  %v187_v28 = vld [vmem:[%s14526_s0 + $0x190] sm:$0xff] }
  0x9b   :  { %4572 = vmatmul.mubr.bf16.gmra.mrb[60].mxu1 %v11492_v0  ;;  %3721 = vmatpush1.bf16.msra.mxu0 %v10238_v63  ;;  %v11599_v34 = vcombine.high %v187_v28, %v195_v29  ;;  %v11632_v44 = vcombine.low %v187_v28, %v195_v29  ;;  %v10282_v63 = vld [vmem:[%s14527_s1 + $0x4b0] ss:$12 sps:$4 sm:$0xff]   ;;  %v10340_v28 = vld [vmem:[%s14527_s1 + $0x608] ss:$12 sps:$4 sm:$0xff]   ;;  %v10344_v29 = vld [vmem:[%s14527_s1 + $0x6e0] ss:$12 sps:$4 sm:$0xff]  }
  0x9c   :  { %3722 = vmatprep.subr.bf16.mxu0 %v10245_v1  ;;  %3667 = vmatprep.mubr.bf16.mxu0 %v11381_v30  ;;  %v10295_v30 = vld [vmem:[%s14527_s1 + $0x5a8] ss:$12 sps:$4 sm:$0xff]   ;;  %v10289_v1 = vld [vmem:[%s14527_s1 + $0x4cc] ss:$12 sps:$4 sm:$0xff]  }
  0x9d   :  { %4612 = vmatprep.mubr.bf16.mxu1 %v11497_v2 }
  0x9f   :  { %3723 = vmatpush1.bf16.msra.mxu0 %v10243_v3  ;;  %v10287_v3 = vld [vmem:[%s14527_s1 + $0x4c8] ss:$12 sps:$4 sm:$0xff]  }
  0xa0   :  { %3724 = vmatprep.subr.bf16.mxu0 %v10250_v4  ;;  %v10294_v4 = vld [vmem:[%s14527_s1 + $0x4e4] ss:$12 sps:$4 sm:$0xff]  }
  0xa2   :  { %3668 = vmatmul.mubr.bf16.gmra.mrb[16].mxu0 %v11411_v39  ;;  %v203_v39 = vld [vmem:[%s14526_s0 + $0x210] sm:$0xff] }
  0xa3   :  { %4613 = vmatmul.mubr.bf16.vlgmr.msra.gmra.mrb[64].mxu1 %v11515_v7  ;;  %3725 = vmatpush1.bf16.msra.mxu0 %v10248_v8  ;;  %v11637_v46 = vcombine.high %v203_v39, %v211_v40  ;;  %v11722_v8 = vcombine.low %v235_v61, %v243_v62 }
  0xa4   :  { %3726 = vmatprep.subr.bf16.mxu0 %v10253_v9  ;;  %3677 = vmatprep.mubr.bf16.mxu0 %v11419_v42  ;;  %v10305_v42 = vld [vmem:[%s14527_s1 + $0x5d8] ss:$12 sps:$4 sm:$0xff]   ;;  %v10299_v9 = vld [vmem:[%s14527_s1 + $0x4fc] ss:$12 sps:$4 sm:$0xff]  }
  0xa5   :  { %4620 = vmatprep.mubr.bf16.mxu1 %v11523_v10  ;;  %9344 = vmatpush3.bf16.msra.mxu1 %v10276_v11  ;;  %v10297_v11 = vld [vmem:[%s14527_s1 + $0x4f8] ss:$12 sps:$4 sm:$0xff]  }
  0xa6   :  { %9345 = vmatprep.subr.bf16.mxu1 %v10280_v12  ;;  %v10304_v12 = vld [vmem:[%s14527_s1 + $0x514] ss:$12 sps:$4 sm:$0xff]  }
  0xa7   :  { %3727 = vmatpush1.bf16.msra.mxu0 %v10251_v13  ;;  %v140_v13 = vld [vmem:[%s14526_s0 + $0x18] sm:$0xff] }
  0xa8   :  { %3728 = vmatprep.subr.bf16.mxu0 %v10256_v14  ;;  %v148_v14 = vld [vmem:[%s14526_s0 + $0x58] sm:$0xff] }
  0xa9   :  { %9346 = vmatpush3.bf16.msra.mxu1 %v10281_v16  ;;  %v11748_v16 = vcombine.low %v251_v5, %v259_v6 }
  0xaa   :  { %3678 = vmatmul.mubr.bf16.gmra.mrb[20].mxu0 %v11440_v48  ;;  %9347 = vmatprep.subr.bf16.mxu1 %v10285_v18  ;;  %v10310_v48 = vld [vmem:[%s14527_s1 + $0x5f0] ss:$12 sps:$4 sm:$0xff]   ;;  %v11753_v18 = vcombine.high %v140_v13, %v148_v14 }
  0xab   :  { %4621 = vmatmul.mubr.bf16.gmra.mrb[68].mxu1 %v11556_v20  ;;  %3729 = vmatpush1.bf16.msra.mxu0 %v10254_v19  ;;  %v10307_v19 = vld [vmem:[%s14527_s1 + $0x528] ss:$12 sps:$4 sm:$0xff]  }
  0xac   :  { %3730 = vmatprep.subr.bf16.mxu0 %v10259_v21  ;;  %3687 = vmatprep.mubr.bf16.mxu0 %v11445_v50  ;;  %v10274_v50 = vld [vmem:[%s14527_s1 + $0x484] ss:$12 sps:$4 sm:$0xff]   ;;  %v156_v21 = vld [vmem:[%s14526_s0 + $0x98] sm:$0xff] }
  0xad   :  { %4628 = vmatprep.mubr.bf16.mxu1 %v11561_v22  ;;  %9348 = vmatpush3.bf16.msra.mxu1 %v10286_v23  ;;  %v11771_v23 = vcombine.low %v140_v13, %v148_v14  ;;  %v10343_v14 = vld [vmem:[%s14527_s1 + $0x61c] ss:$12 sps:$4 sm:$0xff]  }
  0xae   :  { %9349 = vmatprep.subr.bf16.mxu1 %v10290_v24  ;;  %v10312_v24 = vld [vmem:[%s14527_s1 + $0x540] ss:$12 sps:$4 sm:$0xff]  }
  0xaf   :  { %3731 = vmatpush1.bf16.msra.mxu0 %v10257_v25  ;;  %v10317_v25 = vld [vmem:[%s14527_s1 + $0x55c] ss:$12 sps:$4 sm:$0xff]  }
  0xb0   :  { %3732 = vmatprep.subr.bf16.mxu0 %v10262_v26  ;;  %v10315_v26 = vld [vmem:[%s14527_s1 + $0x558] ss:$12 sps:$4 sm:$0xff]  }
  0xb1   :  { %9350 = vmatpush3.bf16.msra.mxu1 %v10291_v27 }
  0xb2   :  { %3688 = vmatmul.mubr.bf16.gmra.mrb[24].mxu0 %v11466_v56  ;;  %9351 = vmatprep.subr.bf16.mxu1 %v10295_v30  ;;  %v11670_v56 = vcombine.low %v203_v39, %v211_v40  ;;  %v10320_v30 = vld [vmem:[%s14527_s1 + $0x574] ss:$12 sps:$4 sm:$0xff]   ;;  %v10350_v40 = vld [vmem:[%s14527_s1 + $0x638] ss:$12 sps:$4 sm:$0xff]  }
  0xb3   :  { %4629 = vmatmul.mubr.bf16.gmra.mrb[72].mxu1 %v11594_v32  ;;  %3733 = vmatpush1.bf16.msra.mxu0 %v10260_v31  ;;  %v172_v31 = vld [vmem:[%s14526_s0 + $0x118] sm:$0xff] }
  0xb4   :  { %3734 = vmatprep.subr.bf16.mxu0 %v10265_v33  ;;  %3697 = vmatprep.mubr.bf16.mxu0 %v11471_v58  ;;  %v11675_v58 = vcombine.high %v219_v51, %v227_v53  ;;  %v10345_v33 = vld [vmem:[%s14527_s1 + $0x620] ss:$12 sps:$4 sm:$0xff]  }
  0xb5   :  { %4636 = vmatprep.mubr.bf16.mxu1 %v11599_v34  ;;  %9352 = vmatpush3.bf16.msra.mxu1 %v10296_v35  ;;  %v10318_v35 = vld [vmem:[%s14527_s1 + $0x570] ss:$12 sps:$4 sm:$0xff]  }
  0xb6   :  { %9353 = vmatprep.subr.bf16.mxu1 %v10300_v36 }
  0xb7   :  { %3735 = vmatpush1.bf16.msra.mxu0 %v10263_v37  ;;  %v10323_v37 = vld [vmem:[%s14527_s1 + $0x58c] ss:$12 sps:$4 sm:$0xff]  }
  0xb8   :  { %3736 = vmatprep.subr.bf16.mxu0 %v10268_v38  ;;  %v10321_v38 = vld [vmem:[%s14527_s1 + $0x588] ss:$12 sps:$4 sm:$0xff]  }
  0xb9   :  { %9354 = vmatpush3.bf16.msra.mxu1 %v10301_v41  ;;  %v10354_v41 = vld [vmem:[%s14527_s1 + $0x710] ss:$12 sps:$4 sm:$0xff]  }
  0xba   :  { %3698 = vmatmul.mubr.bf16.gmra.mrb[28].mxu0 %v11492_v0  ;;  %9355 = vmatprep.subr.bf16.mxu1 %v10305_v42  ;;  %v11696_v0 = vcombine.low %v219_v51, %v227_v53  ;;  %v10326_v42 = vld [vmem:[%s14527_s1 + $0x5a4] ss:$12 sps:$4 sm:$0xff]   ;;  %v10360_v51 = vld [vmem:[%s14527_s1 + $0x668] ss:$12 sps:$4 sm:$0xff]  }
  0xbb   :  { %4637 = vmatmul.mubr.bf16.gmra.mrb[76].mxu1 %v11632_v44  ;;  %3737 = vmatpush1.bf16.msra.mxu0 %v10266_v43  ;;  %v188_v43 = vld [vmem:[%s14526_s0 + $0x198] sm:$0xff] }
  0xbc   :  { %3738 = vmatprep.subr.bf16.mxu0 %v10271_v45  ;;  %3740 = vmatprep.mubr.bf16.mxu0 %v11497_v2  ;;  %v11701_v2 = vcombine.high %v235_v61, %v243_v62  ;;  %v10355_v45 = vld [vmem:[%s14527_s1 + $0x650] ss:$12 sps:$4 sm:$0xff]   ;;  %v10327_v53 = vld [vmem:[%s14527_s1 + $0x5b8] ss:$12 sps:$4 sm:$0xff]  }
  0xbd   :  { %4644 = vmatprep.mubr.bf16.mxu1 %v11637_v46  ;;  %9356 = vmatpush3.bf16.msra.mxu1 %v10306_v47  ;;  %v10324_v47 = vld [vmem:[%s14527_s1 + $0x5a0] ss:$12 sps:$4 sm:$0xff]  }
  0xbe   :  { %9357 = vmatprep.subr.bf16.mxu1 %v10310_v48 }
  0xbf   :  { %3739 = vmatpush1.bf16.msra.mxu0 %v10269_v49  ;;  %v10329_v49 = vld [vmem:[%s14527_s1 + $0x5bc] ss:$12 sps:$4 sm:$0xff]  }
  0xc0   :  { %3821 = vmatprep.subr.bf16.mxu0 %v10274_v50 }
  0xc1   :  { %9358 = vmatpush3.bf16.msra.mxu1 %v10311_v52  ;;  %v10364_v52 = vld [vmem:[%s14527_s1 + $0x740] ss:$12 sps:$4 sm:$0xff]  }
  0xc2   :  { %3741 = vmatmul.mubr.bf16.vlgmr.msra.gmra.mrb[0].mxu0 %v11515_v7  ;;  %9407 = vmatprep.subr.bf16.mxu1 %v10339_v54  ;;  %v10292_v7 = vld [vmem:[%s14527_s1 + $0x4e0] ss:$12 sps:$4 sm:$0xff]  }
  0xc3   :  { %4645 = vmatmul.mubr.bf16.gmra.mrb[80].mxu1 %v11670_v56  ;;  %3822 = vmatpush1.bf16.msra.mxu0 %v10272_v55  ;;  %v10332_v54 = vld [vmem:[%s14527_s1 + $0x5d4] ss:$12 sps:$4 sm:$0xff]   ;;  %v204_v55 = vld [vmem:[%s14526_s0 + $0x218] sm:$0xff] }
  0xc4   :  { %3823 = vmatprep.subr.bf16.mxu0 %v10279_v57  ;;  %3750 = vmatprep.mubr.bf16.mxu0 %v11523_v10  ;;  %v11727_v10 = vcombine.high %v251_v5, %v259_v6  ;;  %v10365_v57 = vld [vmem:[%s14527_s1 + $0x680] ss:$12 sps:$4 sm:$0xff]   ;;  %v10338_v5 = vld [vmem:[%s14527_s1 + $0x604] ss:$12 sps:$4 sm:$0xff]  }
  0xc5   :  { %4652 = vmatprep.mubr.bf16.mxu1 %v11675_v58  ;;  %v10374_v6 = vld [vmem:[%s14527_s1 + $0x770] ss:$12 sps:$4 sm:$0xff]  }
  0xc7   :  { %3824 = vmatpush1.bf16.msra.mxu0 %v10277_v59 }
  0xc8   :  { %3825 = vmatprep.subr.bf16.mxu0 %v10284_v60  ;;  %v10330_v60 = vld [vmem:[%s14527_s1 + $0x5d0] ss:$12 sps:$4 sm:$0xff]  }
  0xca   :  { %3751 = vmatmul.mubr.bf16.gmra.mrb[4].mxu0 %v11556_v20  ;;  %v10314_v20 = vld [vmem:[%s14527_s1 + $0x544] ss:$12 sps:$4 sm:$0xff]  }
  0xcb   :  { %4653 = vmatmul.mubr.bf16.gmra.mrb[84].mxu1 %v11696_v0  ;;  %3826 = vmatpush1.bf16.msra.mxu0 %v10282_v63  ;;  %v10335_v63 = vld [vmem:[%s14527_s1 + $0x5ec] ss:$12 sps:$4 sm:$0xff]  }
  0xcc   :  { %3827 = vmatprep.subr.bf16.mxu0 %v10289_v1  ;;  %3760 = vmatprep.mubr.bf16.mxu0 %v11561_v22  ;;  %v164_v22 = vld [vmem:[%s14526_s0 + $0xd8] sm:$0xff]  ;;  %v10333_v1 = vld [vmem:[%s14527_s1 + $0x5e8] ss:$12 sps:$4 sm:$0xff]  }
  0xcd   :  { %4660 = vmatprep.mubr.bf16.mxu1 %v11701_v2  ;;  %v11782_v27 = vcombine.high %v156_v21, %v164_v22  ;;  %v11812_v36 = vcombine.low %v156_v21, %v164_v22  ;;  %v236_v21 = vld [vmem:[%s14526_s0 + $0x318] sm:$0xff] }
  0xce   :  { %v10346_v22 = vld [vmem:[%s14527_s1 + $0x630] ss:$12 sps:$4 sm:$0xff]  }
  0xcf   :  { %3828 = vmatpush1.bf16.msra.mxu0 %v10287_v3  ;;  %v10370_v3 = vld [vmem:[%s14527_s1 + $0x698] ss:$12 sps:$4 sm:$0xff]  }
  0xd0   :  { %3829 = vmatprep.subr.bf16.mxu0 %v10294_v4 }
  0xd2   :  { %3761 = vmatmul.mubr.bf16.gmra.mrb[8].mxu0 %v11594_v32  ;;  %v180_v32 = vld [vmem:[%s14526_s0 + $0x158] sm:$0xff] }
  0xd3   :  { %4661 = vmatmul.mubr.bf16.gmra.mrb[88].mxu1 %v11722_v8  ;;  %3830 = vmatpush1.bf16.msra.mxu0 %v10292_v7  ;;  %v11820_v39 = vcombine.high %v172_v31, %v180_v32  ;;  %v11850_v48 = vcombine.low %v172_v31, %v180_v32  ;;  %v10375_v7 = vld [vmem:[%s14527_s1 + $0x6b0] ss:$12 sps:$4 sm:$0xff]   ;;  %v10351_v31 = vld [vmem:[%s14527_s1 + $0x648] ss:$12 sps:$4 sm:$0xff]  }
  0xd4   :  { %3831 = vmatprep.subr.bf16.mxu0 %v10299_v9  ;;  %3770 = vmatprep.mubr.bf16.mxu0 %v11599_v34  ;;  %v10349_v34 = vld [vmem:[%s14527_s1 + $0x6f8] ss:$12 sps:$4 sm:$0xff]  }
  0xd5   :  { %4668 = vmatprep.mubr.bf16.mxu1 %v11727_v10  ;;  %v228_v9 = vld [vmem:[%s14526_s0 + $0x2d8] sm:$0xff]  ;;  %v10358_v32 = vld [vmem:[%s14527_s1 + $0x664] ss:$12 sps:$4 sm:$0xff]  }
  0xd7   :  { %3832 = vmatpush1.bf16.msra.mxu0 %v10297_v11  ;;  %v10336_v11 = vld [vmem:[%s14527_s1 + $0x600] ss:$12 sps:$4 sm:$0xff]  }
  0xd8   :  { %3833 = vmatprep.subr.bf16.mxu0 %v10304_v12 }
  0xda   :  { %3771 = vmatmul.mubr.bf16.gmra.mrb[12].mxu0 %v11632_v44  ;;  %v196_v44 = vld [vmem:[%s14526_s0 + $0x1d8] sm:$0xff] }
  0xdb   :  { %4669 = vmatmul.mubr.bf16.gmra.mrb[92].mxu1 %v11748_v16  ;;  %3834 = vmatpush1.bf16.msra.mxu0 %v10302_v15  ;;  %v11855_v50 = vcombine.high %v188_v43, %v196_v44  ;;  %v11890_v61 = vcombine.low %v188_v43, %v196_v44 }
  0xdc   :  { %3835 = vmatprep.subr.bf16.mxu0 %v10309_v17  ;;  %3780 = vmatprep.mubr.bf16.mxu0 %v11637_v46  ;;  %v10359_v46 = vld [vmem:[%s14527_s1 + $0x728] ss:$12 sps:$4 sm:$0xff]  }
  0xdd   :  { %4709 = vmatprep.mubr.bf16.mxu1 %v11753_v18 }
  0xdf   :  { %3836 = vmatpush1.bf16.msra.mxu0 %v10307_v19  ;;  %v10341_v19 = vld [vmem:[%s14527_s1 + $0x618] ss:$12 sps:$4 sm:$0xff]  }
  0xe0   :  { %3837 = vmatprep.subr.bf16.mxu0 %v10314_v20  ;;  %v10348_v20 = vld [vmem:[%s14527_s1 + $0x634] ss:$12 sps:$4 sm:$0xff]  }
  0xe2   :  { %3781 = vmatmul.mubr.bf16.gmra.mrb[16].mxu0 %v11670_v56  ;;  %v212_v56 = vld [vmem:[%s14526_s0 + $0x258] sm:$0xff] }
  0xe3   :  { %4710 = vmatmul.mubr.bf16.vlgmr.msra.gmra.mrb[96].mxu1 %v11771_v23  ;;  %3838 = vmatpush1.bf16.msra.mxu0 %v10312_v24  ;;  %v11936_v13 = vcombine.low %v204_v55, %v212_v56 }
  0xe4   :  { %3839 = vmatprep.subr.bf16.mxu0 %v10317_v25  ;;  %3790 = vmatprep.mubr.bf16.mxu0 %v11675_v58  ;;  %v10369_v58 = vld [vmem:[%s14527_s1 + $0x758] ss:$12 sps:$4 sm:$0xff]  }
  0xe5   :  { %4717 = vmatprep.mubr.bf16.mxu1 %v11782_v27  ;;  %9408 = vmatpush3.bf16.msra.mxu1 %v10340_v28 }
  0xe6   :  { %9409 = vmatprep.subr.bf16.mxu1 %v10344_v29 }
  0xe7   :  { %3840 = vmatpush1.bf16.msra.mxu0 %v10315_v26  ;;  %v10353_v26 = vld [vmem:[%s14527_s1 + $0x64c] ss:$12 sps:$4 sm:$0xff]  }
  0xe8   :  { %3841 = vmatprep.subr.bf16.mxu0 %v10320_v30 }
  0xe9   :  { %9410 = vmatpush3.bf16.msra.mxu1 %v10345_v33 }
  0xea   :  { %3791 = vmatmul.mubr.bf16.gmra.mrb[20].mxu0 %v11696_v0  ;;  %9411 = vmatprep.subr.bf16.mxu1 %v10349_v34  ;;  %v252_v34 = vld [vmem:[%s14526_s0 + $0x398] sm:$0xff] }
  0xeb   :  { %4718 = vmatmul.mubr.bf16.gmra.mrb[100].mxu1 %v11812_v36  ;;  %3842 = vmatpush1.bf16.msra.mxu0 %v10318_v35  ;;  %v10356_v35 = vld [vmem:[%s14527_s1 + $0x660] ss:$12 sps:$4 sm:$0xff]  }
  0xec   :  { %3843 = vmatprep.subr.bf16.mxu0 %v10323_v37  ;;  %3800 = vmatprep.mubr.bf16.mxu0 %v11701_v2  ;;  %v11902_v2 = vcombine.high %v204_v55, %v212_v56 }
  0xed   :  { %4725 = vmatprep.mubr.bf16.mxu1 %v11820_v39  ;;  %9412 = vmatpush3.bf16.msra.mxu1 %v10350_v40 }
  0xee   :  { %9413 = vmatprep.subr.bf16.mxu1 %v10354_v41 }
  0xef   :  { %3844 = vmatpush1.bf16.msra.mxu0 %v10321_v38 }
  0xf0   :  { %3845 = vmatprep.subr.bf16.mxu0 %v10326_v42 }
  0xf1   :  { %9414 = vmatpush3.bf16.msra.mxu1 %v10355_v45 }
  0xf2   :  { %3801 = vmatmul.mubr.bf16.gmra.mrb[24].mxu0 %v11722_v8  ;;  %9415 = vmatprep.subr.bf16.mxu1 %v10359_v46  ;;  %v220_v8 = vld [vmem:[%s14526_s0 + $0x298] sm:$0xff] }
  0xf3   :  { %4726 = vmatmul.mubr.bf16.gmra.mrb[104].mxu1 %v11850_v48  ;;  %3846 = vmatpush1.bf16.msra.mxu0 %v10324_v47  ;;  %v11945_v17 = vcombine.high %v220_v8, %v228_v9  ;;  %v11968_v25 = vcombine.low %v220_v8, %v228_v9  ;;  %v10361_v46 = vld [vmem:[%s14527_s1 + $0x678] ss:$12 sps:$4 sm:$0xff]   ;;  %v10368_v47 = vld [vmem:[%s14527_s1 + $0x694] ss:$12 sps:$4 sm:$0xff]  }
  0xf4   :  { %3847 = vmatprep.subr.bf16.mxu0 %v10329_v49  ;;  %3810 = vmatprep.mubr.bf16.mxu0 %v11727_v10  ;;  %v10403_v10 = vld [vmem:[%s14527_s1 + $0x848] ss:$12 sps:$4 sm:$0xff]   ;;  %v141_v49 = vld [vmem:[%s14526_s0 + $0x20] sm:$0xff] }
  0xf5   :  { %4733 = vmatprep.mubr.bf16.mxu1 %v11855_v50  ;;  %9416 = vmatpush3.bf16.msra.mxu1 %v10360_v51  ;;  %v11885_v59 = vpop.f32.mrb[0].mxu1  ;;  %v10376_v8 = vld [vmem:[%s14527_s1 + $0x6c0] ss:$12 sps:$4 sm:$0xff]  }
  0xf6   :  { %9417 = vmatprep.subr.bf16.mxu1 %v10364_v52  ;;  %v11892_v62 = vpop.f32.mrb[1].mxu1 }
  0xf7   :  { %3848 = vmatpush1.bf16.msra.mxu0 %v10327_v53  ;;  %v11897_v0 = vpop.f32.mrb[2].mxu1  ;;  %v10366_v53 = vld [vmem:[%s14527_s1 + $0x690] ss:$12 sps:$4 sm:$0xff]  }
  0xf8   :  { %3849 = vmatprep.subr.bf16.mxu0 %v10332_v54  ;;  %v11907_v4 = vpop.f32.mrb[3].mxu1 }
  0xf9   :  { %9418 = vmatpush3.bf16.msra.mxu1 %v10365_v57 }
  0xfa   :  { %3811 = vmatmul.mubr.bf16.gmra.mrb[28].mxu0 %v11748_v16  ;;  %9419 = vmatprep.subr.bf16.mxu1 %v10369_v58 }
  0xfb   :  { %4734 = vmatmul.mubr.bf16.gmra.mrb[108].mxu1 %v11890_v61  ;;  %3850 = vmatpush1.bf16.msra.mxu0 %v10330_v60 }
  0xfc   :  { %3851 = vmatprep.subr.bf16.mxu0 %v10335_v63  ;;  %3853 = vmatprep.mubr.bf16.mxu0 %v11753_v18 }
  0xfd   :  { %4741 = vmatprep.mubr.bf16.mxu1 %v11902_v2  ;;  %9420 = vmatpush3.bf16.msra.mxu1 %v10370_v3  ;;  %v11934_v12 = vpop.f32.mrb[4].mxu1  ;;  %v10378_v3 = vld [vmem:[%s14527_s1 + $0x6c4] ss:$12 sps:$4 sm:$0xff]  }
  0xfe   :  { %9421 = vmatprep.subr.bf16.mxu1 %v10374_v6  ;;  %v11941_v15 = vpop.f32.mrb[5].mxu1 }
  0xff   :  { %3852 = vmatpush1.bf16.msra.mxu0 %v10333_v1  ;;  %v11943_v16 = vpop.f32.mrb[6].mxu1  ;;  %v10371_v1 = vld [vmem:[%s14527_s1 + $0x6a8] ss:$12 sps:$4 sm:$0xff]  }
 0x100   :  { %3934 = vmatprep.subr.bf16.mxu0 %v10338_v5  ;;  %v11947_v18 = vpop.f32.mrb[7].mxu1  ;;  %v165_v5 = vld [vmem:[%s14526_s0 + $0xe0] sm:$0xff] }
 0x101   :  { %9422 = vmatpush3.bf16.msra.mxu1 %v10375_v7 }
 0x102   :  { %3854 = vmatmul.mubr.bf16.vlgmr.msra.gmra.mrb[0].mxu0 %v11771_v23  ;;  %9471 = vmatprep.subr.bf16.mxu1 %v10403_v10  ;;  %v244_v23 = vld [vmem:[%s14526_s0 + $0x358] sm:$0xff] }
 0x103   :  { %4742 = vmatmul.mubr.bf16.gmra.mrb[112].mxu1 %v11936_v13  ;;  %3935 = vmatpush1.bf16.msra.mxu0 %v10336_v11  ;;  %v11973_v29 = vcombine.high %v236_v21, %v244_v23  ;;  %v11996_v38 = vcombine.low %v236_v21, %v244_v23 }
 0x104   :  { %3936 = vmatprep.subr.bf16.mxu0 %v10343_v14  ;;  %3863 = vmatprep.mubr.bf16.mxu0 %v11782_v27  ;;  %v10379_v14 = vld [vmem:[%s14527_s1 + $0x6d8] ss:$12 sps:$4 sm:$0xff]  }
 0x105   :  { %4749 = vmatprep.mubr.bf16.mxu1 %v11945_v17  ;;  %v9179_v24 = vpop.f32.mrb[8].mxu1 }
 0x106   :  { %v9180_v27 = vpop.f32.mrb[9].mxu1 }
 0x107   :  { %3937 = vmatpush1.bf16.msra.mxu0 %v10341_v19  ;;  %v9182_v28 = vpop.f32.mrb[10].mxu1  ;;  %v11983_v33 = vadd.f32 %v9180_v27, %v9179_v24  ;;  %v10384_v24 = vld [vmem:[%s14527_s1 + $0x6f4] ss:$12 sps:$4 sm:$0xff]  }
 0x108   :  { %3938 = vmatprep.subr.bf16.mxu0 %v10348_v20  ;;  %v9183_v30 = vpop.f32.mrb[11].mxu1  ;;  %v10404_v20 = vld [vmem:[%s14527_s1 + $0x788] ss:$12 sps:$4 sm:$0xff]   ;;  %v173_v27 = vld [vmem:[%s14526_s0 + $0x120] sm:$0xff] }
 0x109   :  { %v12001_v41 = vadd.f32 %v9183_v30, %v9182_v28  ;;  %v181_v28 = vld [vmem:[%s14526_s0 + $0x160] sm:$0xff] }
 0x10a   :  { %3864 = vmatmul.mubr.bf16.gmra.mrb[4].mxu0 %v11812_v36  ;;  %v260_v36 = vld [vmem:[%s14526_s0 + $0x3d8] sm:$0xff] }
 0x10b   :  { %4750 = vmatmul.mubr.bf16.gmra.mrb[116].mxu1 %v11968_v25  ;;  %3939 = vmatpush1.bf16.msra.mxu0 %v10346_v22  ;;  %v12005_v44 = vcombine.high %v252_v34, %v260_v36  ;;  %v12028_v54 = vcombine.low %v252_v34, %v260_v36  ;;  %v10408_v22 = vld [vmem:[%s14527_s1 + $0x860] ss:$12 sps:$4 sm:$0xff]   ;;  %v10413_v30 = vld [vmem:[%s14527_s1 + $0x878] ss:$12 sps:$4 sm:$0xff]   ;;  %v12114_v36 = vadd.f32 %v11907_v4, %v11897_v0  ;;  %v10418_v0 = vld [vmem:[%s14527_s1 + $0x890] ss:$12 sps:$4 sm:$0xff]  }
 0x10c   :  { %3940 = vmatprep.subr.bf16.mxu0 %v10353_v26  ;;  %3873 = vmatprep.mubr.bf16.mxu0 %v11820_v39  ;;  %v10363_v39 = vld [vmem:[%s14527_s1 + $0x67c] ss:$12 sps:$4 sm:$0xff]   ;;  %v10409_v26 = vld [vmem:[%s14527_s1 + $0x7a0] ss:$12 sps:$4 sm:$0xff]   ;;  %v10414_v34 = vld [vmem:[%s14527_s1 + $0x7b8] ss:$12 sps:$4 sm:$0xff]  }
 0x10d   :  { %4757 = vmatprep.mubr.bf16.mxu1 %v11973_v29  ;;  %v9185_v37 = vpop.f32.mrb[12].mxu1 }
 0x10e   :  { %v9186_v40 = vpop.f32.mrb[13].mxu1 }
 0x10f   :  { %3941 = vmatpush1.bf16.msra.mxu0 %v10351_v31  ;;  %v9188_v42 = vpop.f32.mrb[14].mxu1  ;;  %v12003_v43 = vadd.f32 %v9186_v40, %v9185_v37  ;;  %v12118_v37 = vadd.f32 %v11941_v15, %v11934_v12  ;;  %v10390_v12 = vld [vmem:[%s14527_s1 + $0x724] ss:$12 sps:$4 sm:$0xff]  }
 0x110   :  { %3942 = vmatprep.subr.bf16.mxu0 %v10358_v32  ;;  %v9189_v45 = vpop.f32.mrb[15].mxu1  ;;  %v10419_v15 = vld [vmem:[%s14527_s1 + $0x7d0] ss:$12 sps:$4 sm:$0xff]  }
 0x111   :  { %v12019_v51 = vadd.f32 %v9189_v45, %v9188_v42  ;;  %v10385_v42 = vld [vmem:[%s14527_s1 + $0x708] ss:$12 sps:$4 sm:$0xff]   ;;  %v12125_v45 = vcombine.high %v173_v27, %v181_v28 }
 0x112   :  { %3874 = vmatmul.mubr.bf16.gmra.mrb[8].mxu0 %v11850_v48  ;;  %v149_v48 = vld [vmem:[%s14526_s0 + $0x60] sm:$0xff] }
 0x113   :  { %4758 = vmatmul.mubr.bf16.gmra.mrb[120].mxu1 %v11996_v38  ;;  %3943 = vmatpush1.bf16.msra.mxu0 %v10356_v35  ;;  %v12035_v58 = vcombine.high %v141_v49, %v149_v48  ;;  %v12055_v7 = vcombine.low %v141_v49, %v149_v48  ;;  %v189_v49 = vld [vmem:[%s14526_s0 + $0x1a0] sm:$0xff] }
 0x114   :  { %3944 = vmatprep.subr.bf16.mxu0 %v10363_v39  ;;  %3883 = vmatprep.mubr.bf16.mxu0 %v11855_v50  ;;  %v10373_v50 = vld [vmem:[%s14527_s1 + $0x6ac] ss:$12 sps:$4 sm:$0xff]   ;;  %v197_v48 = vld [vmem:[%s14526_s0 + $0x1e0] sm:$0xff] }
 0x115   :  { %4765 = vmatprep.mubr.bf16.mxu1 %v12005_v44  ;;  %v9191_v52 = vpop.f32.mrb[16].mxu1 }
 0x116   :  { %v9192_v55 = vpop.f32.mrb[17].mxu1 }
 0x117   :  { %3945 = vmatpush1.bf16.msra.mxu0 %v10361_v46  ;;  %v9194_v56 = vpop.f32.mrb[18].mxu1  ;;  %v12033_v57 = vadd.f32 %v9192_v55, %v9191_v52  ;;  %v10423_v52 = vld [vmem:[%s14527_s1 + $0x8a8] ss:$12 sps:$4 sm:$0xff]  }
 0x118   :  { %3946 = vmatprep.subr.bf16.mxu0 %v10368_v47  ;;  %v9195_v60 = vpop.f32.mrb[19].mxu1 }
 0x119   :  { %v12038_v63 = vadd.f32 %v9195_v60, %v9194_v56  ;;  %v777_v56 = vld [vmem:[%s14528_s2] sm:$0x7] }
 0x11a   :  { %3884 = vmatmul.mubr.bf16.gmra.mrb[12].mxu0 %v11890_v61  ;;  %v157_v61 = vld [vmem:[%s14526_s0 + $0xa0] sm:$0xff] }
 0x11b   :  { %4766 = vmatmul.mubr.bf16.gmra.mrb[124].mxu1 %v12028_v54  ;;  %3947 = vmatpush1.bf16.msra.mxu0 %v10366_v53  ;;  %v12068_v19 = vcombine.high %v157_v61, %v165_v5  ;;  %v12107_v32 = vcombine.low %v157_v61, %v165_v5  ;;  %v12175_v61 = vcombine.high %v189_v49, %v197_v48  ;;  %v10424_v5 = vld [vmem:[%s14527_s1 + $0x7e8] ss:$12 sps:$4 sm:$0xff]  }
 0x11c   :  { %3948 = vmatprep.subr.bf16.mxu0 %v10373_v50  ;;  %3893 = vmatprep.mubr.bf16.mxu0 %v11902_v2  ;;  %v10381_v2 = vld [vmem:[%s14527_s1 + $0x6dc] ss:$12 sps:$4 sm:$0xff]   ;;  %v12165_v50 = vcombine.low %v173_v27, %v181_v28  ;;  %v12212_v27 = vcombine.low %v189_v49, %v197_v48  ;;  %v10399_v28 = vld [vmem:[%s14527_s1 + $0x76c] ss:$12 sps:$4 sm:$0xff]  }
 0x11d   :  { %4806 = vmatprep.mubr.bf16.mxu1 %v12035_v58  ;;  %v9197_v6 = vpop.f32.mrb[20].mxu1  ;;  %v10467_v49 = vld [vmem:[%s14527_s1 + $0x9c8] ss:$12 sps:$4 sm:$0xff]  }
 0x11e   :  { %v9198_v9 = vpop.f32.mrb[21].mxu1 }
 0x11f   :  { %3949 = vmatpush1.bf16.msra.mxu0 %v10371_v1  ;;  %v9200_v10 = vpop.f32.mrb[22].mxu1  ;;  %v12063_v11 = vadd.f32 %v9198_v9, %v9197_v6 }
 0x120   :  { %3950 = vmatprep.subr.bf16.mxu0 %v10378_v3  ;;  %v9201_v21 = vpop.f32.mrb[23].mxu1  ;;  %v10391_v3 = vld [vmem:[%s14527_s1 + $0x738] ss:$12 sps:$4 sm:$0xff]  }
 0x121   :  { %v12077_v23 = vadd.f32 %v9201_v21, %v9200_v10  ;;  %v10396_v10 = vld [vmem:[%s14527_s1 + $0x754] ss:$12 sps:$4 sm:$0xff]   ;;  %v10433_v21 = vld [vmem:[%s14527_s1 + $0x8d8] ss:$12 sps:$4 sm:$0xff]  }
 0x122   :  { %3894 = vmatmul.mubr.bf16.gmra.mrb[16].mxu0 %v11936_v13  ;;  %v12088_v13 = vadd.f32 %v11892_v62, %v11885_v59  ;;  %v10382_v59 = vld [vmem:[%s14527_s1 + $0x6f0] ss:$12 sps:$4 sm:$0xff]   ;;  %v28_v62 = vlaneseq }
 0x123   :  { %4807 = vmatmul.mubr.bf16.vlgmr.msra.gmra.mrb[128].mxu1 %v12055_v7  ;;  %3951 = vmatpush1.bf16.msra.mxu0 %v10376_v8  ;;  %v10428_v8 = vld [vmem:[%s14527_s1 + $0x8c0] ss:$12 sps:$4 sm:$0xff]  }
 0x124   :  { %3952 = vmatprep.subr.bf16.mxu0 %v10381_v2  ;;  %3903 = vmatprep.mubr.bf16.mxu0 %v11945_v17  ;;  %v10387_v17 = vld [vmem:[%s14527_s1 + $0x70c] ss:$12 sps:$4 sm:$0xff]   ;;  %v12128_v47 = vshrl.u32 %v28_v62, 7 }
 0x125   :  { %4814 = vmatprep.mubr.bf16.mxu1 %v12068_v19  ;;  %9472 = vmatpush3.bf16.msra.mxu1 %v10404_v20  ;;  %v9203_v31 = vpop.f32.mrb[24].mxu1  ;;  %v213_v20 = vld [vmem:[%s14526_s0 + $0x260] sm:$0xff] }
 0x126   :  { %9473 = vmatprep.subr.bf16.mxu1 %v10408_v22  ;;  %v9204_v35 = vpop.f32.mrb[25].mxu1 }
 0x127   :  { %3953 = vmatpush1.bf16.msra.mxu0 %v10379_v14  ;;  %v9206_v39 = vpop.f32.mrb[26].mxu1  ;;  %v12120_v40 = vadd.f32 %v9204_v35, %v9203_v31  ;;  %v10429_v14 = vld [vmem:[%s14527_s1 + $0x800] ss:$12 sps:$4 sm:$0xff]   ;;  %v10434_v35 = vld [vmem:[%s14527_s1 + $0x818] ss:$12 sps:$4 sm:$0xff]  }
 0x128   :  { %3954 = vmatprep.subr.bf16.mxu0 %v10384_v24  ;;  %v9207_v46 = vpop.f32.mrb[27].mxu1 }
 0x129   :  { %9474 = vmatpush3.bf16.msra.mxu1 %v10409_v26  ;;  %v12134_v4 = vadd.f32 %v9207_v46, %v9206_v39  ;;  %v10394_v26 = vld [vmem:[%s14527_s1 + $0x750] ss:$12 sps:$4 sm:$0xff]  }
 0x12a   :  { %3904 = vmatmul.mubr.bf16.gmra.mrb[20].mxu0 %v11968_v25  ;;  %9475 = vmatprep.subr.bf16.mxu1 %v10413_v30  ;;  %v12145_v25 = vadd.f32 %v11947_v18, %v11943_v16  ;;  %v10388_v16 = vld [vmem:[%s14527_s1 + $0x720] ss:$12 sps:$4 sm:$0xff]   ;;  %v789_v18 = vsub.s32 2, %v12128_v47 }
 0x12b   :  { %4815 = vmatmul.mubr.bf16.gmra.mrb[132].mxu1 %v12107_v32  ;;  %3955 = vmatpush1.bf16.msra.mxu0 %v10382_v59 }
 0x12c   :  { %3956 = vmatprep.subr.bf16.mxu0 %v10387_v17  ;;  %3913 = vmatprep.mubr.bf16.mxu0 %v11973_v29  ;;  %v10393_v29 = vld [vmem:[%s14527_s1 + $0x73c] ss:$12 sps:$4 sm:$0xff]   ;;  %v12184_v2 = vrot.slane %v777_v56, %v789_v18 }
 0x12d   :  { %4822 = vmatprep.mubr.bf16.mxu1 %v12125_v45  ;;  %9476 = vmatpush3.bf16.msra.mxu1 %v10414_v34  ;;  %v9209_v53 = vpop.f32.mrb[28].mxu1 }
 0x12e   :  { %9477 = vmatprep.subr.bf16.mxu1 %v10418_v0  ;;  %v9210_v55 = vpop.f32.mrb[29].mxu1  ;;  %v4421_v24 = vadd.f32 %v12088_v13, %v12184_v2  ;;  %v4424_v31 = vadd.f32 %v12114_v36, %v12184_v2  ;;  %v10397_v13 = vld [vmem:[%s14527_s1 + $0x768] ss:$12 sps:$4 sm:$0xff]   ;;  %v10402_v0 = vld [vmem:[%s14527_s1 + $0x784] ss:$12 sps:$4 sm:$0xff]  }
 0x12f   :  { %3957 = vmatpush1.bf16.msra.mxu0 %v10385_v42  ;;  %v9212_v60 = vpop.f32.mrb[30].mxu1  ;;  %v12170_v1 = vadd.f32 %v9210_v55, %v9209_v53  ;;  %v10438_v42 = vld [vmem:[%s14527_s1 + $0x8f0] ss:$12 sps:$4 sm:$0xff]  }
 0x130   :  { %3958 = vmatprep.subr.bf16.mxu0 %v10390_v12  ;;  %v9213_v6 = vpop.f32.mrb[31].mxu1  ;;  %v10439_v12 = vld [vmem:[%s14527_s1 + $0x830] ss:$12 sps:$4 sm:$0xff]  }
 0x131   :  { %9478 = vmatpush3.bf16.msra.mxu1 %v10419_v15  ;;  %v9214_v9 = vadd.f32 %v9213_v6, %v9212_v60  ;;  %v229_v15 = vld [vmem:[%s14526_s0 + $0x2e0] sm:$0xff]  ;;  %v4432_v60 = vadd.f32 %v12145_v25, %v12184_v2 }
 0x132   :  { %3914 = vmatmul.mubr.bf16.gmra.mrb[24].mxu0 %v11996_v38  ;;  %9479 = vmatprep.subr.bf16.mxu1 %v10423_v52  ;;  %v205_v38 = vld [vmem:[%s14526_s0 + $0x220] sm:$0xff] }
 0x133   :  { %4823 = vmatmul.mubr.bf16.gmra.mrb[136].mxu1 %v12165_v50  ;;  %3959 = vmatpush1.bf16.msra.mxu0 %v10388_v16  ;;  %v12204_v22 = vadd.f32 %v9214_v9, %v12184_v2  ;;  %v12222_v34 = vcombine.high %v205_v38, %v213_v20  ;;  %v10400_v16 = vld [vmem:[%s14527_s1 + $0x780] ss:$12 sps:$4 sm:$0xff]   ;;  %v12258_v18 = vcombine.low %v205_v38, %v213_v20 }
 0x134   :  { %3960 = vmatprep.subr.bf16.mxu0 %v10393_v29  ;;  %3923 = vmatprep.mubr.bf16.mxu0 %v12005_v44  ;;  %v10407_v29 = vld [vmem:[%s14527_s1 + $0x79c] ss:$12 sps:$4 sm:$0xff]   ;;  %v10412_v25 = vld [vmem:[%s14527_s1 + $0x7b4] ss:$12 sps:$4 sm:$0xff]   ;;  %v4437_v38 = vadd.f32 %v11983_v33, %v12184_v2 }
 0x135   :  { %4830 = vmatprep.mubr.bf16.mxu1 %v12175_v61  ;;  %9480 = vmatpush3.bf16.msra.mxu1 %v10424_v5  ;;  %v9231_v44 = vpop.f32.mrb[32].mxu1 }
 0x136   :  { %9481 = vmatprep.subr.bf16.mxu1 %v10428_v8  ;;  %v9232_v30 = vpop.f32.mrb[33].mxu1  ;;  %v10405_v8 = vld [vmem:[%s14527_s1 + $0x798] ss:$12 sps:$4 sm:$0xff]  }
 0x137   :  { %3961 = vmatpush1.bf16.msra.mxu0 %v10391_v3  ;;  %v9233_v59 = vadd.f32 %v9232_v30, %v9231_v44  ;;  %v9234_v17 = vpop.f32.mrb[34].mxu1 }
 0x138   :  { %3962 = vmatprep.subr.bf16.mxu0 %v10396_v10  ;;  %v9235_v39 = vpop.f32.mrb[35].mxu1  ;;  %v245_v10 = vld [vmem:[%s14526_s0 + $0x360] sm:$0xff] }
 0x139   :  { %9482 = vmatpush3.bf16.msra.mxu1 %v10429_v14  ;;  %v9236_v36 = vadd.f32 %v9235_v39, %v9234_v17  ;;  %v12231_v46 = vadd.f32 %v9233_v59, %v4421_v24 }
 0x13a   :  { %3924 = vmatmul.mubr.bf16.gmra.mrb[28].mxu0 %v12028_v54  ;;  %9483 = vmatprep.subr.bf16.mxu1 %v10433_v21  ;;  %v221_v54 = vld [vmem:[%s14526_s0 + $0x2a0] sm:$0xff]  ;;  %v10417_v21 = vld [vmem:[%s14527_s1 + $0x7cc] ss:$12 sps:$4 sm:$0xff]  }
 0x13b   :  { %4831 = vmatmul.mubr.bf16.gmra.mrb[140].mxu1 %v12212_v27  ;;  %3963 = vmatpush1.bf16.msra.mxu0 %v10394_v26  ;;  %v12250_v48 = vadd.f32 %v9236_v36, %v4424_v31  ;;  %v12265_v3 = vcombine.high %v221_v54, %v229_v15  ;;  %v12292_v20 = vcombine.low %v221_v54, %v229_v15  ;;  %v10415_v31 = vld [vmem:[%s14527_s1 + $0x7c8] ss:$12 sps:$4 sm:$0xff]  }
 0x13c   :  { %3964 = vmatprep.subr.bf16.mxu0 %v10399_v28  ;;  %3966 = vmatprep.mubr.bf16.mxu0 %v12035_v58  ;;  %v4429_v58 = vadd.f32 %v12118_v37, %v12184_v2  ;;  %v4440_v28 = vadd.f32 %v12001_v41, %v12184_v2  ;;  %v253_v41 = vld [vmem:[%s14526_s0 + $0x3a0] sm:$0xff] }
 0x13d   :  { %4838 = vmatprep.mubr.bf16.mxu1 %v12222_v34  ;;  %9484 = vmatpush3.bf16.msra.mxu1 %v10434_v35  ;;  %v261_v35 = vld [vmem:[%s14526_s0 + $0x3e0] sm:$0xff] }
 0x13e   :  { %9485 = vmatprep.subr.bf16.mxu1 %v10438_v42  ;;  %v9237_v52 = vpop.f32.mrb[36].mxu1  ;;  %v4445_v42 = vadd.f32 %v12003_v43, %v12184_v2 }
 0x13f   :  { %3965 = vmatpush1.bf16.msra.mxu0 %v10397_v13  ;;  %v9238_v53 = vpop.f32.mrb[37].mxu1  ;;  %v10422_v13 = vld [vmem:[%s14527_s1 + $0x7e4] ss:$12 sps:$4 sm:$0xff]  }
 0x140   :  { %4047 = vmatprep.subr.bf16.mxu0 %v10402_v0  ;;  %v9239_v55 = vadd.f32 %v9238_v53, %v9237_v52  ;;  %v9240_v56 = vpop.f32.mrb[38].mxu1  ;;  %v10427_v0 = vld [vmem:[%s14527_s1 + $0x7fc] ss:$12 sps:$4 sm:$0xff]   ;;  %v12333_v52 = vcombine.high %v253_v41, %v261_v35  ;;  %v10432_v53 = vld [vmem:[%s14527_s1 + $0x814] ss:$12 sps:$4 sm:$0xff]  }
 0x141   :  { %9486 = vmatpush3.bf16.msra.mxu1 %v10439_v12  ;;  %v9241_v37 = vpop.f32.mrb[39].mxu1 }
 0x142   :  { %3967 = vmatmul.mubr.bf16.vlgmr.msra.gmra.mrb[0].mxu0 %v12055_v7  ;;  %9535 = vmatprep.subr.bf16.mxu1 %v10467_v49  ;;  %v9242_v5 = vadd.f32 %v9241_v37, %v9240_v56  ;;  %v12268_v6 = vadd.f32 %v9239_v55, %v4429_v58  ;;  %v237_v7 = vld [vmem:[%s14526_s0 + $0x320] sm:$0xff]  ;;  %v4448_v49 = vadd.f32 %v12019_v51, %v12184_v2  ;;  %v142_v51 = vld [vmem:[%s14526_s0 + $0x28] sm:$0xff] }
 0x143   :  { %4839 = vmatmul.mubr.bf16.gmra.mrb[144].mxu1 %v12258_v18  ;;  %4048 = vmatpush1.bf16.msra.mxu0 %v10400_v16  ;;  %v12299_v30 = vcombine.high %v237_v7, %v245_v10  ;;  %v12326_v36 = vcombine.low %v237_v7, %v245_v10  ;;  %v150_v55 = vld [vmem:[%s14526_s0 + $0x68] sm:$0xff]  ;;  %v12360_v37 = vcombine.low %v253_v41, %v261_v35 }
 0x144   :  { %4049 = vmatprep.subr.bf16.mxu0 %v10407_v29  ;;  %3976 = vmatprep.mubr.bf16.mxu0 %v12068_v19  ;;  %v12281_v9 = vadd.f32 %v9242_v5, %v4432_v60  ;;  %v10410_v19 = vld [vmem:[%s14527_s1 + $0x7b0] ss:$12 sps:$4 sm:$0xff]   ;;  %v10425_v29 = vld [vmem:[%s14527_s1 + $0x7f8] ss:$12 sps:$4 sm:$0xff]   ;;  %v4453_v60 = vadd.f32 %v12033_v57, %v12184_v2  ;;  %v4456_v10 = vadd.f32 %v12038_v63, %v12184_v2  ;;  %v158_v63 = vld [vmem:[%s14526_s0 + $0xa8] sm:$0xff] }
 0x145   :  { %4846 = vmatprep.mubr.bf16.mxu1 %v12265_v3  ;;  %v10437_v5 = vld [vmem:[%s14527_s1 + $0x82c] ss:$12 sps:$4 sm:$0xff]   ;;  %v4464_v35 = vadd.f32 %v12077_v23, %v12184_v2 }
 0x146   :  { %v9243_v14 = vpop.f32.mrb[40].mxu1 }
 0x147   :  { %4050 = vmatpush1.bf16.msra.mxu0 %v10405_v8  ;;  %v9244_v44 = vpop.f32.mrb[41].mxu1 }
 0x148   :  { %4051 = vmatprep.subr.bf16.mxu0 %v10412_v25  ;;  %v9245_v24 = vadd.f32 %v9244_v44, %v9243_v14  ;;  %v9246_v26 = vpop.f32.mrb[42].mxu1  ;;  %v12367_v14 = vcombine.high %v142_v51, %v150_v55  ;;  %v10442_v44 = vld [vmem:[%s14527_s1 + $0x844] ss:$12 sps:$4 sm:$0xff]  }
 0x149   :  { %v9247_v33 = vpop.f32.mrb[43].mxu1 }
 0x14a   :  { %3977 = vmatmul.mubr.bf16.gmra.mrb[4].mxu0 %v12107_v32  ;;  %v12302_v59 = vadd.f32 %v9245_v24, %v4437_v38  ;;  %v9248_v17 = vadd.f32 %v9247_v33, %v9246_v26  ;;  %v166_v24 = vld [vmem:[%s14526_s0 + $0xe8] sm:$0xff]  ;;  %v12391_v33 = vcombine.low %v142_v51, %v150_v55 }
 0x14b   :  { %4847 = vmatmul.mubr.bf16.gmra.mrb[148].mxu1 %v12292_v20  ;;  %4052 = vmatpush1.bf16.msra.mxu0 %v10410_v19  ;;  %v12440_v51 = vcombine.low %v158_v63, %v166_v24  ;;  %v10451_v55 = vld [vmem:[%s14527_s1 + $0x88c] ss:$12 sps:$4 sm:$0xff]  }
 0x14c   :  { %4053 = vmatprep.subr.bf16.mxu0 %v10417_v21  ;;  %3986 = vmatprep.mubr.bf16.mxu0 %v12125_v45  ;;  %v12315_v32 = vadd.f32 %v9248_v17, %v4440_v28  ;;  %v10420_v45 = vld [vmem:[%s14527_s1 + $0x7e0] ss:$12 sps:$4 sm:$0xff]   ;;  %v10435_v21 = vld [vmem:[%s14527_s1 + $0x828] ss:$12 sps:$4 sm:$0xff]   ;;  %v4461_v28 = vadd.f32 %v12063_v11, %v12184_v2  ;;  %v10443_v11 = vld [vmem:[%s14527_s1 + $0x858] ss:$12 sps:$4 sm:$0xff]  }
 0x14d   :  { %4854 = vmatprep.mubr.bf16.mxu1 %v12299_v30  ;;  %v10445_v17 = vld [vmem:[%s14527_s1 + $0x85c] ss:$12 sps:$4 sm:$0xff]  }
 0x14e   :  { %v9249_v39 = vpop.f32.mrb[44].mxu1 }
 0x14f   :  { %4054 = vmatpush1.bf16.msra.mxu0 %v10415_v31  ;;  %v9250_v12 = vpop.f32.mrb[45].mxu1 }
 0x150   :  { %4055 = vmatprep.subr.bf16.mxu0 %v10422_v13  ;;  %v9251_v54 = vadd.f32 %v9250_v12, %v9249_v39  ;;  %v9252_v15 = vpop.f32.mrb[46].mxu1  ;;  %v12404_v39 = vcombine.high %v158_v63, %v166_v24  ;;  %v10487_v63 = vld [vmem:[%s14527_s1 + $0xa28] ss:$12 sps:$4 sm:$0xff]  }
 0x151   :  { %v9253_v43 = vpop.f32.mrb[47].mxu1 }
 0x152   :  { %3987 = vmatmul.mubr.bf16.gmra.mrb[8].mxu0 %v12165_v50  ;;  %v12336_v58 = vadd.f32 %v9251_v54, %v4445_v42  ;;  %v9254_v16 = vadd.f32 %v9253_v43, %v9252_v15  ;;  %v10468_v42 = vld [vmem:[%s14527_s1 + $0x908] ss:$12 sps:$4 sm:$0xff]   ;;  %v10473_v15 = vld [vmem:[%s14527_s1 + $0x920] ss:$12 sps:$4 sm:$0xff]   ;;  %v10477_v43 = vld [vmem:[%s14527_s1 + $0x9f8] ss:$12 sps:$4 sm:$0xff]  }
 0x153   :  { %4855 = vmatmul.mubr.bf16.gmra.mrb[152].mxu1 %v12326_v36  ;;  %4056 = vmatpush1.bf16.msra.mxu0 %v10420_v45  ;;  %v10448_v54 = vld [vmem:[%s14527_s1 + $0x874] ss:$12 sps:$4 sm:$0xff]  }
 0x154   :  { %4057 = vmatprep.subr.bf16.mxu0 %v10427_v0  ;;  %3996 = vmatprep.mubr.bf16.mxu0 %v12175_v61  ;;  %v12349_v50 = vadd.f32 %v9254_v16, %v4448_v49  ;;  %v10430_v61 = vld [vmem:[%s14527_s1 + $0x810] ss:$12 sps:$4 sm:$0xff]   ;;  %v10472_v0 = vld [vmem:[%s14527_s1 + $0x9e0] ss:$12 sps:$4 sm:$0xff]  }
 0x155   :  { %4862 = vmatprep.mubr.bf16.mxu1 %v12333_v52  ;;  %v182_v49 = vld [vmem:[%s14526_s0 + $0x168] sm:$0xff] }
 0x156   :  { %v9255_v56 = vpop.f32.mrb[48].mxu1 }
 0x157   :  { %4058 = vmatpush1.bf16.msra.mxu0 %v10425_v29  ;;  %v9256_v8 = vpop.f32.mrb[49].mxu1 }
 0x158   :  { %4059 = vmatprep.subr.bf16.mxu0 %v10432_v53  ;;  %v9257_v25 = vadd.f32 %v9256_v8, %v9255_v56  ;;  %v9258_v7 = vpop.f32.mrb[50].mxu1  ;;  %v10446_v53 = vld [vmem:[%s14527_s1 + $0x870] ss:$12 sps:$4 sm:$0xff]  }
 0x159   :  { %v9259_v57 = vpop.f32.mrb[51].mxu1 }
 0x15a   :  { %3997 = vmatmul.mubr.bf16.gmra.mrb[12].mxu0 %v12212_v27  ;;  %v12370_v38 = vadd.f32 %v9257_v25, %v4453_v60  ;;  %v9260_v19 = vadd.f32 %v9259_v57, %v9258_v7  ;;  %v10478_v25 = vld [vmem:[%s14527_s1 + $0x938] ss:$12 sps:$4 sm:$0xff]  }
 0x15b   :  { %4863 = vmatmul.mubr.bf16.gmra.mrb[156].mxu1 %v12360_v37  ;;  %4060 = vmatpush1.bf16.msra.mxu0 %v10430_v61 }
 0x15c   :  { %4061 = vmatprep.subr.bf16.mxu0 %v10437_v5  ;;  %4006 = vmatprep.mubr.bf16.mxu0 %v12222_v34  ;;  %v12383_v27 = vadd.f32 %v9260_v19, %v4456_v10  ;;  %v10440_v34 = vld [vmem:[%s14527_s1 + $0x840] ss:$12 sps:$4 sm:$0xff]   ;;  %v4472_v5 = vadd.f32 %v12134_v4, %v12184_v2  ;;  %v10482_v10 = vld [vmem:[%s14527_s1 + $0xa10] ss:$12 sps:$4 sm:$0xff]  }
 0x15d   :  { %4903 = vmatprep.mubr.bf16.mxu1 %v12367_v14  ;;  %v10454_v19 = vld [vmem:[%s14527_s1 + $0x8a4] ss:$12 sps:$4 sm:$0xff]  }
 0x15e   :  { %v9261_v26 = vpop.f32.mrb[52].mxu1 }
 0x15f   :  { %4062 = vmatpush1.bf16.msra.mxu0 %v10435_v21  ;;  %v9262_v31 = vpop.f32.mrb[53].mxu1  ;;  %v10483_v21 = vld [vmem:[%s14527_s1 + $0x950] ss:$12 sps:$4 sm:$0xff]  }
 0x160   :  { %4063 = vmatprep.subr.bf16.mxu0 %v10442_v44  ;;  %v9263_v13 = vadd.f32 %v9262_v31, %v9261_v26  ;;  %v9264_v41 = vpop.f32.mrb[54].mxu1  ;;  %v198_v44 = vld [vmem:[%s14526_s0 + $0x1e8] sm:$0xff] }
 0x161   :  { %v9265_v45 = vpop.f32.mrb[55].mxu1 }
 0x162   :  { %4007 = vmatmul.mubr.bf16.gmra.mrb[16].mxu0 %v12258_v18  ;;  %v12413_v12 = vadd.f32 %v9263_v13, %v4461_v28  ;;  %v9266_v23 = vadd.f32 %v9265_v45, %v9264_v41  ;;  %v174_v18 = vld [vmem:[%s14526_s0 + $0x128] sm:$0xff] }
 0x163   :  { %4904 = vmatmul.mubr.bf16.vlgmr.msra.gmra.mrb[160].mxu1 %v12391_v33  ;;  %4064 = vmatpush1.bf16.msra.mxu0 %v10440_v34  ;;  %v12450_v8 = vcombine.high %v174_v18, %v182_v49  ;;  %v10452_v28 = vld [vmem:[%s14527_s1 + $0x8a0] ss:$12 sps:$4 sm:$0xff]   ;;  %v12486_v34 = vcombine.low %v174_v18, %v182_v49 }
 0x164   :  { %4065 = vmatprep.subr.bf16.mxu0 %v10445_v17  ;;  %4016 = vmatprep.mubr.bf16.mxu0 %v12265_v3  ;;  %v12432_v16 = vadd.f32 %v9266_v23, %v4464_v35  ;;  %v4469_v3 = vadd.f32 %v12120_v40, %v12184_v2  ;;  %v10449_v40 = vld [vmem:[%s14527_s1 + $0x888] ss:$12 sps:$4 sm:$0xff]   ;;  %v10455_v35 = vld [vmem:[%s14527_s1 + $0x8b8] ss:$12 sps:$4 sm:$0xff]   ;;  %v10492_v45 = vld [vmem:[%s14527_s1 + $0xa40] ss:$12 sps:$4 sm:$0xff]  }
 0x165   :  { %4911 = vmatprep.mubr.bf16.mxu1 %v12404_v39  ;;  %9536 = vmatpush3.bf16.msra.mxu1 %v10468_v42  ;;  %v10457_v17 = vld [vmem:[%s14527_s1 + $0x8bc] ss:$12 sps:$4 sm:$0xff]   ;;  %v10460_v42 = vld [vmem:[%s14527_s1 + $0x8d4] ss:$12 sps:$4 sm:$0xff]  }
 0x166   :  { %9537 = vmatprep.subr.bf16.mxu1 %v10472_v0  ;;  %v9267_v29 = vpop.f32.mrb[56].mxu1  ;;  %v10493_v18 = vld [vmem:[%s14527_s1 + $0x980] ss:$12 sps:$4 sm:$0xff]  }
 0x167   :  { %4066 = vmatpush1.bf16.msra.mxu0 %v10443_v11  ;;  %v9268_v56 = vpop.f32.mrb[57].mxu1 }
 0x168   :  { %4067 = vmatprep.subr.bf16.mxu0 %v10448_v54  ;;  %v9269_v60 = vadd.f32 %v9268_v56, %v9267_v29  ;;  %v9270_v61 = vpop.f32.mrb[58].mxu1  ;;  %v214_v54 = vld [vmem:[%s14526_s0 + $0x268] sm:$0xff] }
 0x169   :  { %9538 = vmatpush3.bf16.msra.mxu1 %v10473_v15  ;;  %v9271_v7 = vpop.f32.mrb[59].mxu1  ;;  %v10463_v29 = vld [vmem:[%s14527_s1 + $0x8ec] ss:$12 sps:$4 sm:$0xff]   ;;  %v10461_v56 = vld [vmem:[%s14527_s1 + $0x8e8] ss:$12 sps:$4 sm:$0xff]  }
 0x16a   :  { %4017 = vmatmul.mubr.bf16.gmra.mrb[20].mxu0 %v12292_v20  ;;  %9539 = vmatprep.subr.bf16.mxu1 %v10477_v43  ;;  %v12459_v4 = vadd.f32 %v9269_v60, %v4469_v3  ;;  %v9272_v57 = vadd.f32 %v9271_v7, %v9270_v61  ;;  %v190_v20 = vld [vmem:[%s14526_s0 + $0x1a8] sm:$0xff]  ;;  %v10458_v43 = vld [vmem:[%s14527_s1 + $0x8d0] ss:$12 sps:$4 sm:$0xff]   ;;  %v10498_v61 = vld [vmem:[%s14527_s1 + $0x998] ss:$12 sps:$4 sm:$0xff]  }
 0x16b   :  { %4912 = vmatmul.mubr.bf16.gmra.mrb[164].mxu1 %v12440_v51  ;;  %4068 = vmatpush1.bf16.msra.mxu0 %v10446_v53 }
 0x16c   :  { %4069 = vmatprep.subr.bf16.mxu0 %v10451_v55  ;;  %4026 = vmatprep.mubr.bf16.mxu0 %v12299_v30  ;;  %v12478_v24 = vadd.f32 %v9272_v57, %v4472_v5  ;;  %v4477_v30 = vadd.f32 %v12170_v1, %v12184_v2  ;;  %v12494_v1 = vcombine.high %v190_v20, %v198_v44  ;;  %v10488_v2 = vld [vmem:[%s14527_s1 + $0x968] ss:$12 sps:$4 sm:$0xff]  }
 0x16d   :  { %4919 = vmatprep.mubr.bf16.mxu1 %v12450_v8  ;;  %9540 = vmatpush3.bf16.msra.mxu1 %v10478_v25  ;;  %v10502_v25 = vld [vmem:[%s14527_s1 + $0xa70] ss:$12 sps:$4 sm:$0xff]   ;;  %v230_v57 = vld [vmem:[%s14526_s0 + $0x2e8] sm:$0xff] }
 0x16e   :  { %9541 = vmatprep.subr.bf16.mxu1 %v10482_v10  ;;  %v9273_v26 = vpop.f32.mrb[60].mxu1 }
 0x16f   :  { %4070 = vmatpush1.bf16.msra.mxu0 %v10449_v40  ;;  %v9274_v31 = vpop.f32.mrb[61].mxu1  ;;  %v10466_v40 = vld [vmem:[%s14527_s1 + $0x904] ss:$12 sps:$4 sm:$0xff]  }
 0x170   :  { %4071 = vmatprep.subr.bf16.mxu0 %v10454_v19  ;;  %v9275_v13 = vadd.f32 %v9274_v31, %v9273_v26  ;;  %v9276_v41 = vpop.f32.mrb[62].mxu1 }
 0x171   :  { %9542 = vmatpush3.bf16.msra.mxu1 %v10483_v21  ;;  %v9277_v11 = vpop.f32.mrb[63].mxu1  ;;  %v10531_v21 = vld [vmem:[%s14527_s1 + $0xb48] ss:$12 sps:$4 sm:$0xff]  }
 0x172   :  { %4027 = vmatmul.mubr.bf16.gmra.mrb[24].mxu0 %v12326_v36  ;;  %9543 = vmatprep.subr.bf16.mxu1 %v10487_v63  ;;  %v12506_v0 = vadd.f32 %v9275_v13, %v4477_v30  ;;  %v9278_v23 = vadd.f32 %v9277_v11, %v9276_v41  ;;  %v206_v36 = vld [vmem:[%s14526_s0 + $0x228] sm:$0xff]  ;;  %v10476_v13 = vld [vmem:[%s14527_s1 + $0x934] ss:$12 sps:$4 sm:$0xff]  }
 0x173   :  { %4920 = vmatmul.mubr.bf16.gmra.mrb[168].mxu1 %v12486_v34  ;;  %4072 = vmatpush1.bf16.msra.mxu0 %v10452_v28  ;;  %v12537_v60 = vcombine.high %v206_v36, %v214_v54  ;;  %v10469_v28 = vld [vmem:[%s14527_s1 + $0x918] ss:$12 sps:$4 sm:$0xff]  }
 0x174   :  { %4073 = vmatprep.subr.bf16.mxu0 %v10457_v17  ;;  %4036 = vmatprep.mubr.bf16.mxu0 %v12333_v52  ;;  %v12517_v15 = vadd.f32 %v9278_v23, %v12204_v22  ;;  %v10497_v52 = vld [vmem:[%s14527_s1 + $0xa58] ss:$12 sps:$4 sm:$0xff]   ;;  %v12529_v22 = vcombine.low %v190_v20, %v198_v44  ;;  %v10464_v20 = vld [vmem:[%s14527_s1 + $0x900] ss:$12 sps:$4 sm:$0xff]   ;;  %v10471_v44 = vld [vmem:[%s14527_s1 + $0x91c] ss:$12 sps:$4 sm:$0xff]  }
 0x175   :  { %4927 = vmatprep.mubr.bf16.mxu1 %v12494_v1  ;;  %9544 = vmatpush3.bf16.msra.mxu1 %v10488_v2  ;;  %v238_v2 = vld [vmem:[%s14526_s0 + $0x328] sm:$0xff] }
 0x176   :  { %9545 = vmatprep.subr.bf16.mxu1 %v10492_v45  ;;  %v9295_v49 = vpop.f32.mrb[64].mxu1 }
 0x177   :  { %4074 = vmatpush1.bf16.msra.mxu0 %v10455_v35  ;;  %v9296_v3 = vpop.f32.mrb[65].mxu1 }
 0x178   :  { %4075 = vmatprep.subr.bf16.mxu0 %v10460_v42  ;;  %v9297_v53 = vadd.f32 %v9296_v3, %v9295_v49  ;;  %v9298_v55 = vpop.f32.mrb[66].mxu1 }
 0x179   :  { %9546 = vmatpush3.bf16.msra.mxu1 %v10493_v18  ;;  %v9299_v5 = vpop.f32.mrb[67].mxu1 }
 0x17a   :  { %4037 = vmatmul.mubr.bf16.gmra.mrb[28].mxu0 %v12360_v37  ;;  %9547 = vmatprep.subr.bf16.mxu1 %v10497_v52  ;;  %v12550_v7 = vadd.f32 %v9297_v53, %v12231_v46  ;;  %v9300_v10 = vadd.f32 %v9299_v5, %v9298_v55  ;;  %v222_v37 = vld [vmem:[%s14526_s0 + $0x2a8] sm:$0xff]  ;;  %v10503_v46 = vld [vmem:[%s14527_s1 + $0x9b0] ss:$12 sps:$4 sm:$0xff]  }
 0x17b   :  { %4928 = vmatmul.mubr.bf16.gmra.mrb[172].mxu1 %v12529_v22  ;;  %4076 = vmatpush1.bf16.msra.mxu0 %v10458_v43  ;;  %v12581_v17 = vcombine.high %v222_v37, %v230_v57 }
 0x17c   :  { %4077 = vmatprep.subr.bf16.mxu0 %v10463_v29  ;;  %4079 = vmatprep.mubr.bf16.mxu0 %v12367_v14  ;;  %v12561_v19 = vadd.f32 %v9300_v10, %v12250_v48  ;;  %v12573_v48 = vcombine.low %v206_v36, %v214_v54 }
 0x17d   :  { %4935 = vmatprep.mubr.bf16.mxu1 %v12537_v60  ;;  %9548 = vmatpush3.bf16.msra.mxu1 %v10498_v61 }
 0x17e   :  { %9549 = vmatprep.subr.bf16.mxu1 %v10502_v25  ;;  %v9301_v14 = vpop.f32.mrb[68].mxu1 }
 0x17f   :  { %4078 = vmatpush1.bf16.msra.mxu0 %v10461_v56  ;;  %v9302_v63 = vpop.f32.mrb[69].mxu1 }
 0x180   :  { %4160 = vmatprep.subr.bf16.mxu0 %v10466_v40  ;;  %v9303_v26 = vadd.f32 %v9302_v63, %v9301_v14  ;;  %v9304_v30 = vpop.f32.mrb[70].mxu1 }
 0x181   :  { %9550 = vmatpush3.bf16.msra.mxu1 %v10503_v46  ;;  %v9305_v31 = vpop.f32.mrb[71].mxu1 }
 0x182   :  { %4080 = vmatmul.mubr.bf16.vlgmr.msra.gmra.mrb[0].mxu0 %v12391_v33  ;;  %v12588_v41 = vadd.f32 %v9303_v26, %v12268_v6  ;;  %v9306_v35 = vadd.f32 %v9305_v31, %v9304_v30  ;;  %9599 = vmatprep.subr.bf16.mxu1 %v10531_v21  ;;  %v246_v33 = vld [vmem:[%s14526_s0 + $0x368] sm:$0xff] }
 0x183   :  { %4936 = vmatmul.mubr.bf16.gmra.mrb[176].mxu1 %v12573_v48  ;;  %4161 = vmatpush1.bf16.msra.mxu0 %v10464_v20 }
 0x184   :  { %4162 = vmatprep.subr.bf16.mxu0 %v10471_v44  ;;  %4089 = vmatprep.mubr.bf16.mxu0 %v12404_v39  ;;  %v12599_v11 = vadd.f32 %v9306_v35, %v12281_v9 }
 0x185   :  { %4943 = vmatprep.mubr.bf16.mxu1 %v12581_v17 }
 0x186   :  { %v9307_v6 = vpop.f32.mrb[72].mxu1 }
 0x187   :  { %12 = vsyncpa [#allocation5], 0  ;;  %4163 = vmatpush1.bf16.msra.mxu0 %v10469_v28  ;;  %v10474_v39 = vld [vmem:[%s14527_s1 + $0x930] ss:$12 sps:$4 sm:$0xff]   ;;  %v12605_v42 = vcombine.low %v222_v37, %v230_v57  ;;  %v9308_v45 = vpop.f32.mrb[73].mxu1  ;;  %v12610_v54 = vcombine.high %v238_v2, %v246_v33  ;;  %v262_v3 = vld [vmem:[%s14526_s0 + $0x3e8] sm:$0xff]  ;;  %v12637_v55 = vcombine.low %v238_v2, %v246_v33 }
 0x188   :  { %4164 = vmatprep.subr.bf16.mxu0 %v10476_v13  ;;  %v10481_v23 = vld [vmem:[%s14527_s1 + $0x94c] ss:$12 sps:$4 sm:$0xff]   ;;  %v9309_v36 = vadd.f32 %v9308_v45, %v9307_v6  ;;  %v9310_v9 = vpop.f32.mrb[74].mxu1  ;;  %v10479_v43 = vld [vmem:[%s14527_s1 + $0x948] ss:$12 sps:$4 sm:$0xff]   ;;  %vm13257_vm0 = vcmp.lt.s32.totalorder %v28_v62, 192 }
 0x189   :  { %v9311_v18 = vpop.f32.mrb[75].mxu1  ;;  %v10486_v29 = vld [vmem:[%s14527_s1 + $0x964] ss:$12 sps:$4 sm:$0xff]   ;;  %v10491_v56 = vld [vmem:[%s14527_s1 + $0x97c] ss:$12 sps:$4 sm:$0xff]   ;;  %vm5468_vm1 = vcmask 523265  }
 0x18a   :  { %4090 = vmatmul.mubr.bf16.gmra.mrb[4].mxu0 %v12440_v51  ;;  %v12614_v52 = vadd.f32 %v9309_v36, %v12302_v59  ;;  %v9312_v49 = vadd.f32 %v9311_v18, %v9310_v9  ;;  %v254_v59 = vld [vmem:[%s14526_s0 + $0x3a8] sm:$0xff]  ;;  %v10489_v57 = vld [vmem:[%s14527_s1 + $0x978] ss:$12 sps:$4 sm:$0xff]   ;;  %v10496_v46 = vld [vmem:[%s14527_s1 + $0x994] ss:$12 sps:$4 sm:$0xff]   ;;  %vm5471_vm2 = vcmask 516096  }
 0x18b   :  { %4944 = vmatmul.mubr.bf16.gmra.mrb[180].mxu1 %v12605_v42  ;;  %4165 = vmatpush1.bf16.msra.mxu0 %v10474_v39  ;;  %v12642_v40 = vcombine.high %v254_v59, %v262_v3  ;;  %v151_v14 = vld [vmem:[%s14526_s0 + $0x70] sm:$0xff]  ;;  %v12669_v20 = vcombine.low %v254_v59, %v262_v3  ;;  %v10501_v44 = vld [vmem:[%s14527_s1 + $0x9ac] ss:$12 sps:$4 sm:$0xff]   ;;  %v10509_v45 = vld [vmem:[%s14527_s1 + $0x9dc] ss:$12 sps:$4 sm:$0xff]   ;;  %vm5733_vm3 = vcmask 1046528  }
 0x18c   :  { %4166 = vmatprep.subr.bf16.mxu0 %v10481_v23  ;;  %4099 = vmatprep.mubr.bf16.mxu0 %v12450_v8  ;;  %v12625_v51 = vadd.f32 %v9312_v49, %v12315_v32  ;;  %v10484_v8 = vld [vmem:[%s14527_s1 + $0x960] ss:$12 sps:$4 sm:$0xff]   ;;  %v10499_v35 = vld [vmem:[%s14527_s1 + $0x9a8] ss:$12 sps:$4 sm:$0xff]   ;;  %v10506_v2 = vld [vmem:[%s14527_s1 + $0x9c4] ss:$12 sps:$4 sm:$0xff]  }
 0x18d   :  { %4951 = vmatprep.mubr.bf16.mxu1 %v12610_v54  ;;  %v167_v33 = vld [vmem:[%s14526_s0 + $0xf0] sm:$0xff]  ;;  %v10504_v39 = vld [vmem:[%s14527_s1 + $0x9c0] ss:$12 sps:$4 sm:$0xff]   ;;  %v10507_v3 = vld [vmem:[%s14527_s1 + $0x9d8] ss:$12 sps:$4 sm:$0xff]   ;;  %vm5306_vm4 = vcmask 523264  }
 0x18e   :  { %v9313_v53 = vpop.f32.mrb[76].mxu1  ;;  %v10532_v49 = vld [vmem:[%s14527_s1 + $0xa88] ss:$12 sps:$4 sm:$0xff]   ;;  %v10536_v59 = vld [vmem:[%s14527_s1 + $0xb60] ss:$12 sps:$4 sm:$0xff]   ;;  %vm6545_vm5 = vcmask 1045504  }
 0x18f   :  { %4167 = vmatpush1.bf16.msra.mxu0 %v10479_v43  ;;  %v9314_v32 = vpop.f32.mrb[77].mxu1  ;;  %vm128_vm6 = vcmask 785408  }
 0x190   :  { %4168 = vmatprep.subr.bf16.mxu0 %v10486_v29  ;;  %v9315_v61 = vadd.f32 %v9314_v32, %v9313_v53  ;;  %v9316_v5 = vpop.f32.mrb[78].mxu1  ;;  %v10537_v53 = vld [vmem:[%s14527_s1 + $0xaa0] ss:$12 sps:$4 sm:$0xff]  }
 0x191   :  { %v9317_v25 = vpop.f32.mrb[79].mxu1 }
 0x192   :  { %4100 = vmatmul.mubr.bf16.gmra.mrb[8].mxu0 %v12486_v34  ;;  %v12646_v10 = vadd.f32 %v9315_v61, %v12336_v58  ;;  %v9318_v37 = vadd.f32 %v9317_v25, %v9316_v5  ;;  %v143_v58 = vld [vmem:[%s14526_s0 + $0x30] sm:$0xff]  ;;  %v10515_v25 = vld [vmem:[%s14527_s1 + $0xa0c] ss:$12 sps:$4 sm:$0xff]  }
 0x193   :  { %4952 = vmatmul.mubr.bf16.gmra.mrb[184].mxu1 %v12637_v55  ;;  %4169 = vmatpush1.bf16.msra.mxu0 %v10484_v8  ;;  %v12674_v30 = vcombine.high %v143_v58, %v151_v14  ;;  %v175_v8 = vld [vmem:[%s14526_s0 + $0x130] sm:$0xff] }
 0x194   :  { %4170 = vmatprep.subr.bf16.mxu0 %v10491_v56  ;;  %4109 = vmatprep.mubr.bf16.mxu0 %v12494_v1  ;;  %v12657_v34 = vadd.f32 %v9318_v37, %v12349_v50  ;;  %v10494_v1 = vld [vmem:[%s14527_s1 + $0x990] ss:$12 sps:$4 sm:$0xff]  }
 0x195   :  { %4959 = vmatprep.mubr.bf16.mxu1 %v12642_v40  ;;  %v10510_v56 = vld [vmem:[%s14527_s1 + $0x9f0] ss:$12 sps:$4 sm:$0xff]  }
 0x196   :  { %v9319_v21 = vpop.f32.mrb[80].mxu1 }
 0x197   :  { %4171 = vmatpush1.bf16.msra.mxu0 %v10489_v57  ;;  %v9320_v50 = vpop.f32.mrb[81].mxu1 }
 0x198   :  { %4172 = vmatprep.subr.bf16.mxu0 %v10496_v46  ;;  %v9321_v63 = vadd.f32 %v9320_v50, %v9319_v21  ;;  %v9322_v26 = vpop.f32.mrb[82].mxu1  ;;  %v10546_v50 = vld [vmem:[%s14527_s1 + $0xb90] ss:$12 sps:$4 sm:$0xff]  }
 0x199   :  { %v9323_v28 = vpop.f32.mrb[83].mxu1 }
 0x19a   :  { %4110 = vmatmul.mubr.bf16.gmra.mrb[12].mxu0 %v12529_v22  ;;  %v12678_v31 = vadd.f32 %v9321_v63, %v12370_v38  ;;  %v9324_v13 = vadd.f32 %v9323_v28, %v9322_v26  ;;  %v159_v38 = vld [vmem:[%s14526_s0 + $0xb0] sm:$0xff] }
 0x19b   :  { %4960 = vmatmul.mubr.bf16.gmra.mrb[188].mxu1 %v12669_v20  ;;  %4173 = vmatpush1.bf16.msra.mxu0 %v10494_v1  ;;  %v12706_v9 = vcombine.high %v159_v38, %v167_v33  ;;  %v12745_v61 = vcombine.low %v159_v38, %v167_v33  ;;  %v10547_v63 = vld [vmem:[%s14527_s1 + $0xad0] ss:$12 sps:$4 sm:$0xff]  }
 0x19c   :  { %4174 = vmatprep.subr.bf16.mxu0 %v10501_v44  ;;  %4119 = vmatprep.mubr.bf16.mxu0 %v12537_v60  ;;  %v12689_v22 = vadd.f32 %v9324_v13, %v12383_v27  ;;  %v12698_v60 = vcombine.low %v143_v58, %v151_v14  ;;  %v10542_v14 = vld [vmem:[%s14527_s1 + $0xab8] ss:$12 sps:$4 sm:$0xff]   ;;  %v10513_v44 = vld [vmem:[%s14527_s1 + $0xa08] ss:$12 sps:$4 sm:$0xff]   ;;  %v10516_v13 = vld [vmem:[%s14527_s1 + $0xa20] ss:$12 sps:$4 sm:$0xff]  }
 0x19d   :  { %5000 = vmatprep.mubr.bf16.mxu1 %v12674_v30  ;;  %v191_v26 = vld [vmem:[%s14526_s0 + $0x1b0] sm:$0xff]  ;;  %v10521_v38 = vld [vmem:[%s14527_s1 + $0xa3c] ss:$12 sps:$4 sm:$0xff]  }
 0x19e   :  { %v9325_v6 = vpop.f32.mrb[84].mxu1 }
 0x19f   :  { %4175 = vmatpush1.bf16.msra.mxu0 %v10499_v35  ;;  %v9326_v27 = vpop.f32.mrb[85].mxu1 }
 0x1a0   :  { %4176 = vmatprep.subr.bf16.mxu0 %v10506_v2  ;;  %v9327_v23 = vadd.f32 %v9326_v27, %v9325_v6  ;;  %v9328_v36 = vpop.f32.mrb[86].mxu1 }
 0x1a1   :  { %v9329_v18 = vpop.f32.mrb[87].mxu1 }
 0x1a2   :  { %4120 = vmatmul.mubr.bf16.gmra.mrb[16].mxu0 %v12573_v48  ;;  %v12713_v43 = vadd.f32 %v9327_v23, %v12413_v12  ;;  %v9330_v29 = vadd.f32 %v9329_v18, %v9328_v36  ;;  %v10512_v12 = vld [vmem:[%s14527_s1 + $0x9f4] ss:$12 sps:$4 sm:$0xff]  }
 0x1a3   :  { %5001 = vmatmul.mubr.bf16.vlgmr.msra.gmra.mrb[192].mxu1 %v12698_v60  ;;  %4177 = vmatpush1.bf16.msra.mxu0 %v10504_v39  ;;  %v10556_v18 = vld [vmem:[%s14527_s1 + $0xbc0] ss:$12 sps:$4 sm:$0xff]  }
 0x1a4   :  { %4178 = vmatprep.subr.bf16.mxu0 %v10509_v45  ;;  %4129 = vmatprep.mubr.bf16.mxu0 %v12581_v17  ;;  %v12727_v48 = vadd.f32 %v9330_v29, %v12432_v16  ;;  %v183_v17 = vld [vmem:[%s14526_s0 + $0x170] sm:$0xff]  ;;  %v10541_v16 = vld [vmem:[%s14527_s1 + $0xb78] ss:$12 sps:$4 sm:$0xff]   ;;  %v10557_v29 = vld [vmem:[%s14527_s1 + $0xb00] ss:$12 sps:$4 sm:$0xff]  }
 0x1a5   :  { %5008 = vmatprep.mubr.bf16.mxu1 %v12706_v9  ;;  %9600 = vmatpush3.bf16.msra.mxu1 %v10532_v49  ;;  %v12750_v46 = vcombine.high %v175_v8, %v183_v17  ;;  %v12789_v35 = vcombine.low %v175_v8, %v183_v17  ;;  %v10552_v45 = vld [vmem:[%s14527_s1 + $0xae8] ss:$12 sps:$4 sm:$0xff]   ;;  %v10519_v49 = vld [vmem:[%s14527_s1 + $0xa38] ss:$12 sps:$4 sm:$0xff]  }
 0x1a6   :  { %v9331_v32 = vpop.f32.mrb[88].mxu1  ;;  %9601 = vmatprep.subr.bf16.mxu1 %v10536_v59  ;;  %v207_v59 = vld [vmem:[%s14526_s0 + $0x230] sm:$0xff]  ;;  %v10527_v17 = vld [vmem:[%s14527_s1 + $0xa6c] ss:$12 sps:$4 sm:$0xff]  }
 0x1a7   :  { %4179 = vmatpush1.bf16.msra.mxu0 %v10507_v3  ;;  %v9332_v5 = vpop.f32.mrb[89].mxu1 }
 0x1a8   :  { %4180 = vmatprep.subr.bf16.mxu0 %v10512_v12  ;;  %v9333_v37 = vadd.f32 %v9332_v5, %v9331_v32  ;;  %v9334_v57 = vpop.f32.mrb[90].mxu1  ;;  %v10522_v12 = vld [vmem:[%s14527_s1 + $0xa50] ss:$12 sps:$4 sm:$0xff]  }
 0x1a9   :  { %v9335_v58 = vpop.f32.mrb[91].mxu1  ;;  %9602 = vmatpush3.bf16.msra.mxu1 %v10537_v53 }
 0x1aa   :  { %4130 = vmatmul.mubr.bf16.gmra.mrb[20].mxu0 %v12605_v42  ;;  %v12757_v21 = vadd.f32 %v9333_v37, %v12459_v4  ;;  %v9336_v1 = vadd.f32 %v9335_v58, %v9334_v57  ;;  %9603 = vmatprep.subr.bf16.mxu1 %v10541_v16  ;;  %v10518_v4 = vld [vmem:[%s14527_s1 + $0xa24] ss:$12 sps:$4 sm:$0xff]  }
 0x1ab   :  { %5009 = vmatmul.mubr.bf16.gmra.mrb[196].mxu1 %v12745_v61  ;;  %4181 = vmatpush1.bf16.msra.mxu0 %v10510_v56  ;;  %v10566_v58 = vld [vmem:[%s14527_s1 + $0xbf0] ss:$12 sps:$4 sm:$0xff]  }
 0x1ac   :  { %4182 = vmatprep.subr.bf16.mxu0 %v10515_v25  ;;  %4139 = vmatprep.mubr.bf16.mxu0 %v12610_v54  ;;  %v12771_v42 = vadd.f32 %v9336_v1, %v12478_v24  ;;  %v199_v54 = vld [vmem:[%s14526_s0 + $0x1f0] sm:$0xff]  ;;  %v10562_v25 = vld [vmem:[%s14527_s1 + $0xb18] ss:$12 sps:$4 sm:$0xff]  }
 0x1ad   :  { %5016 = vmatprep.mubr.bf16.mxu1 %v12750_v46  ;;  %9604 = vmatpush3.bf16.msra.mxu1 %v10542_v14  ;;  %v10551_v24 = vld [vmem:[%s14527_s1 + $0xba8] ss:$12 sps:$4 sm:$0xff]   ;;  %v12794_v39 = vcombine.high %v191_v26, %v199_v54  ;;  %v12833_v53 = vcombine.low %v191_v26, %v199_v54  ;;  %v10567_v1 = vld [vmem:[%s14527_s1 + $0xb30] ss:$12 sps:$4 sm:$0xff]  }
 0x1ae   :  { %v9337_v28 = vpop.f32.mrb[92].mxu1  ;;  %9605 = vmatprep.subr.bf16.mxu1 %v10546_v50  ;;  %v10525_v14 = vld [vmem:[%s14527_s1 + $0xa68] ss:$12 sps:$4 sm:$0xff]  }
 0x1af   :  { %4183 = vmatpush1.bf16.msra.mxu0 %v10513_v44  ;;  %v9338_v2 = vpop.f32.mrb[93].mxu1  ;;  %v223_v50 = vld [vmem:[%s14526_s0 + $0x2b0] sm:$0xff]  ;;  %v10535_v26 = vld [vmem:[%s14527_s1 + $0xa9c] ss:$12 sps:$4 sm:$0xff]  }
 0x1b0   :  { %4184 = vmatprep.subr.bf16.mxu0 %v10518_v4  ;;  %v9339_v33 = vadd.f32 %v9338_v2, %v9337_v28  ;;  %v9340_v6 = vpop.f32.mrb[94].mxu1 }
 0x1b1   :  { %v9341_v27 = vpop.f32.mrb[95].mxu1  ;;  %9606 = vmatpush3.bf16.msra.mxu1 %v10547_v63 }
 0x1b2   :  { %4140 = vmatmul.mubr.bf16.gmra.mrb[24].mxu0 %v12637_v55  ;;  %v12801_v23 = vadd.f32 %v9339_v33, %v12506_v0  ;;  %v9342_v36 = vadd.f32 %v9341_v27, %v9340_v6  ;;  %9607 = vmatprep.subr.bf16.mxu1 %v10551_v24  ;;  %v10524_v0 = vld [vmem:[%s14527_s1 + $0xa54] ss:$12 sps:$4 sm:$0xff]   ;;  %v10533_v33 = vld [vmem:[%s14527_s1 + $0xa98] ss:$12 sps:$4 sm:$0xff]  }
 0x1b3   :  { %5017 = vmatmul.mubr.bf16.gmra.mrb[200].mxu1 %v12789_v35  ;;  %4185 = vmatpush1.bf16.msra.mxu0 %v10516_v13  ;;  %v10540_v6 = vld [vmem:[%s14527_s1 + $0xab4] ss:$12 sps:$4 sm:$0xff]  }
 0x1b4   :  { %4186 = vmatprep.subr.bf16.mxu0 %v10521_v38  ;;  %4149 = vmatprep.mubr.bf16.mxu0 %v12642_v40  ;;  %v12815_v55 = vadd.f32 %v9342_v36, %v12517_v15  ;;  %v215_v40 = vld [vmem:[%s14526_s0 + $0x270] sm:$0xff]  ;;  %v10561_v15 = vld [vmem:[%s14527_s1 + $0xbd8] ss:$12 sps:$4 sm:$0xff]  }
 0x1b5   :  { %5024 = vmatprep.mubr.bf16.mxu1 %v12794_v39  ;;  %9608 = vmatpush3.bf16.msra.mxu1 %v10552_v45  ;;  %v12838_v56 = vcombine.high %v207_v59, %v215_v40  ;;  %v12874_v4 = vcombine.low %v207_v59, %v215_v40  ;;  %v247_v27 = vld [vmem:[%s14526_s0 + $0x370] sm:$0xff] }
 0x1b6   :  { %v9359_v3 = vpop.f32.mrb[96].mxu1  ;;  %9609 = vmatprep.subr.bf16.mxu1 %v10556_v18  ;;  %v10545_v18 = vld [vmem:[%s14527_s1 + $0xacc] ss:$12 sps:$4 sm:$0xff]  }
 0x1b7   :  { %4187 = vmatpush1.bf16.msra.mxu0 %v10519_v49  ;;  %v9360_v8 = vpop.f32.mrb[97].mxu1 }
 0x1b8   :  { %4188 = vmatprep.subr.bf16.mxu0 %v10524_v0  ;;  %v9361_v32 = vadd.f32 %v9360_v8, %v9359_v3  ;;  %v9362_v16 = vpop.f32.mrb[98].mxu1  ;;  %v263_v8 = vld [vmem:[%s14526_s0 + $0x3f0] sm:$0xff] }
 0x1b9   :  { %v9363_v5 = vpop.f32.mrb[99].mxu1  ;;  %9610 = vmatpush3.bf16.msra.mxu1 %v10557_v29 }
 0x1ba   :  { %4150 = vmatmul.mubr.bf16.gmra.mrb[28].mxu0 %v12669_v20  ;;  %v12845_v37 = vadd.f32 %v9361_v32, %v12550_v7  ;;  %v9364_v57 = vadd.f32 %v9363_v5, %v9362_v16  ;;  %9611 = vmatprep.subr.bf16.mxu1 %v10561_v15  ;;  %v10530_v7 = vld [vmem:[%s14527_s1 + $0xa84] ss:$12 sps:$4 sm:$0xff]   ;;  %v10543_v15 = vld [vmem:[%s14527_s1 + $0xac8] ss:$12 sps:$4 sm:$0xff]  }
 0x1bb   :  { %5025 = vmatmul.mubr.bf16.gmra.mrb[204].mxu1 %v12833_v53  ;;  %4189 = vmatpush1.bf16.msra.mxu0 %v10522_v12  ;;  %v10550_v12 = vld [vmem:[%s14527_s1 + $0xae4] ss:$12 sps:$4 sm:$0xff]   ;;  %v10555_v16 = vld [vmem:[%s14527_s1 + $0xafc] ss:$12 sps:$4 sm:$0xff]  }
 0x1bc   :  { %4190 = vmatprep.subr.bf16.mxu0 %v10527_v17  ;;  %4192 = vmatprep.mubr.bf16.mxu0 %v12674_v30  ;;  %v12859_v20 = vadd.f32 %v9364_v57, %v12561_v19  ;;  %v231_v30 = vld [vmem:[%s14526_s0 + $0x2f0] sm:$0xff]  ;;  %v10528_v19 = vld [vmem:[%s14527_s1 + $0xa80] ss:$12 sps:$4 sm:$0xff]  }
 0x1bd   :  { %5032 = vmatprep.mubr.bf16.mxu1 %v12838_v56  ;;  %9612 = vmatpush3.bf16.msra.mxu1 %v10562_v25  ;;  %v12879_v24 = vcombine.high %v223_v50, %v231_v30  ;;  %v12906_v36 = vcombine.low %v223_v50, %v231_v30  ;;  %v10560_v50 = vld [vmem:[%s14527_s1 + $0xb14] ss:$12 sps:$4 sm:$0xff]   ;;  %v152_v30 = vld [vmem:[%s14526_s0 + $0x78] sm:$0xff] }
 0x1be   :  { %v9365_v44 = vpop.f32.mrb[100].mxu1  ;;  %9613 = vmatprep.subr.bf16.mxu1 %v10566_v58 }
 0x1bf   :  { %4191 = vmatpush1.bf16.msra.mxu0 %v10525_v14  ;;  %v9366_v63 = vpop.f32.mrb[101].mxu1 }
 0x1c0   :  { %4273 = vmatprep.subr.bf16.mxu0 %v10530_v7  ;;  %v9367_v54 = vadd.f32 %v9366_v63, %v9365_v44  ;;  %v9368_v28 = vpop.f32.mrb[102].mxu1  ;;  %v10565_v63 = vld [vmem:[%s14527_s1 + $0xb2c] ss:$12 sps:$4 sm:$0xff]  }
 0x1c1   :  { %v9369_v13 = vpop.f32.mrb[103].mxu1  ;;  %9614 = vmatpush3.bf16.msra.mxu1 %v10567_v1  ;;  %v10553_v1 = vld [vmem:[%s14527_s1 + $0xaf8] ss:$12 sps:$4 sm:$0xff]  }
 0x1c2   :  { %4193 = vmatmul.mubr.bf16.vlgmr.msra.gmra.mrb[0].mxu0 %v12698_v60  ;;  %v12883_v2 = vadd.f32 %v9367_v54, %v12588_v41  ;;  %v9370_v38 = vadd.f32 %v9369_v13, %v9368_v28  ;;  %v239_v41 = vld [vmem:[%s14526_s0 + $0x330] sm:$0xff] }
 0x1c3   :  { %5033 = vmatmul.mubr.bf16.gmra.mrb[208].mxu1 %v12874_v4  ;;  %4274 = vmatpush1.bf16.msra.mxu0 %v10528_v19  ;;  %v12911_v29 = vcombine.high %v239_v41, %v247_v27  ;;  %v12938_v32 = vcombine.low %v239_v41, %v247_v27  ;;  %v10570_v41 = vld [vmem:[%s14527_s1 + $0xb44] ss:$12 sps:$4 sm:$0xff]   ;;  %v160_v27 = vld [vmem:[%s14526_s0 + $0xb8] sm:$0xff] }
 0x1c4   :  { %4275 = vmatprep.subr.bf16.mxu0 %v10535_v26  ;;  %4202 = vmatprep.mubr.bf16.mxu0 %v12706_v9  ;;  %v12894_v60 = vadd.f32 %v9370_v38, %v12599_v11  ;;  %v10538_v9 = vld [vmem:[%s14527_s1 + $0xab0] ss:$12 sps:$4 sm:$0xff]  }
 0x1c5   :  { %5040 = vmatprep.mubr.bf16.mxu1 %v12879_v24 }
 0x1c6   :  { %v9371_v45 = vpop.f32.mrb[104].mxu1 }
 0x1c7   :  { %4276 = vmatpush1.bf16.msra.mxu0 %v10533_v33  ;;  %v9372_v11 = vpop.f32.mrb[105].mxu1 }
 0x1c8   :  { %4277 = vmatprep.subr.bf16.mxu0 %v10540_v6  ;;  %v9373_v49 = vadd.f32 %v9372_v11, %v9371_v45  ;;  %v9374_v0 = vpop.f32.mrb[106].mxu1  ;;  %v10563_v6 = vld [vmem:[%s14527_s1 + $0xb28] ss:$12 sps:$4 sm:$0xff]   ;;  %v168_v45 = vld [vmem:[%s14526_s0 + $0xf8] sm:$0xff] }
 0x1c9   :  { %v9375_v59 = vpop.f32.mrb[107].mxu1  ;;  %v10573_v11 = vld [vmem:[%s14527_s1 + $0xb5c] ss:$12 sps:$4 sm:$0xff]  }
 0x1ca   :  { %4203 = vmatmul.mubr.bf16.gmra.mrb[4].mxu0 %v12745_v61  ;;  %v12915_v40 = vadd.f32 %v9373_v49, %v12614_v52  ;;  %v9376_v3 = vadd.f32 %v9375_v59, %v9374_v0  ;;  %v255_v52 = vld [vmem:[%s14526_s0 + $0x3b0] sm:$0xff]  ;;  %v13007_v0 = vcombine.high %v160_v27, %v168_v45 }
 0x1cb   :  { %5041 = vmatmul.mubr.bf16.gmra.mrb[212].mxu1 %v12906_v36  ;;  %4278 = vmatpush1.bf16.msra.mxu0 %v10538_v9  ;;  %v12943_v57 = vcombine.high %v255_v52, %v263_v8  ;;  %v12970_v19 = vcombine.low %v255_v52, %v263_v8  ;;  %v10568_v9 = vld [vmem:[%s14527_s1 + $0xb40] ss:$12 sps:$4 sm:$0xff]   ;;  %v176_v8 = vld [vmem:[%s14526_s0 + $0x138] sm:$0xff] }
 0x1cc   :  { %4279 = vmatprep.subr.bf16.mxu0 %v10545_v18  ;;  %4212 = vmatprep.mubr.bf16.mxu0 %v12750_v46  ;;  %v12926_v61 = vadd.f32 %v9376_v3, %v12625_v51  ;;  %v10548_v46 = vld [vmem:[%s14527_s1 + $0xae0] ss:$12 sps:$4 sm:$0xff]  }
 0x1cd   :  { %5048 = vmatprep.mubr.bf16.mxu1 %v12911_v29  ;;  %v10576_v52 = vld [vmem:[%s14527_s1 + $0xb74] ss:$12 sps:$4 sm:$0xff]  }
 0x1ce   :  { %v9377_v17 = vpop.f32.mrb[108].mxu1 }
 0x1cf   :  { %4280 = vmatpush1.bf16.msra.mxu0 %v10543_v15  ;;  %v9378_v51 = vpop.f32.mrb[109].mxu1 }
 0x1d0   :  { %4281 = vmatprep.subr.bf16.mxu0 %v10550_v12  ;;  %v9379_v5 = vadd.f32 %v9378_v51, %v9377_v17  ;;  %v9380_v25 = vpop.f32.mrb[110].mxu1  ;;  %v10571_v12 = vld [vmem:[%s14527_s1 + $0xb58] ss:$12 sps:$4 sm:$0xff]  }
 0x1d1   :  { %v9381_v58 = vpop.f32.mrb[111].mxu1  ;;  %v184_v17 = vld [vmem:[%s14526_s0 + $0x178] sm:$0xff] }
 0x1d2   :  { %4213 = vmatmul.mubr.bf16.gmra.mrb[8].mxu0 %v12789_v35  ;;  %v12947_v14 = vadd.f32 %v9379_v5, %v12646_v10  ;;  %v9382_v7 = vadd.f32 %v9381_v58, %v9380_v25  ;;  %v144_v10 = vld [vmem:[%s14526_s0 + $0x38] sm:$0xff]  ;;  %v13039_v58 = vcombine.high %v176_v8, %v184_v17 }
 0x1d3   :  { %5049 = vmatmul.mubr.bf16.gmra.mrb[216].mxu1 %v12938_v32  ;;  %4282 = vmatpush1.bf16.msra.mxu0 %v10548_v46  ;;  %v12975_v28 = vcombine.high %v144_v10, %v152_v30  ;;  %v13034_v46 = vcombine.low %v160_v27, %v168_v45  ;;  %v10579_v51 = vld [vmem:[%s14527_s1 + $0xb8c] ss:$12 sps:$4 sm:$0xff]  }
 0x1d4   :  { %4283 = vmatprep.subr.bf16.mxu0 %v10555_v16  ;;  %4222 = vmatprep.mubr.bf16.mxu0 %v12794_v39  ;;  %v12958_v35 = vadd.f32 %v9382_v7, %v12657_v34  ;;  %v10558_v39 = vld [vmem:[%s14527_s1 + $0xb10] ss:$12 sps:$4 sm:$0xff]  }
 0x1d5   :  { %5056 = vmatprep.mubr.bf16.mxu1 %v12943_v57  ;;  %v208_v27 = vld [vmem:[%s14526_s0 + $0x238] sm:$0xff] }
 0x1d6   :  { %v9383_v44 = vpop.f32.mrb[112].mxu1  ;;  %v216_v45 = vld [vmem:[%s14526_s0 + $0x278] sm:$0xff] }
 0x1d7   :  { %4284 = vmatpush1.bf16.msra.mxu0 %v10553_v1  ;;  %v9384_v34 = vpop.f32.mrb[113].mxu1 }
 0x1d8   :  { %4285 = vmatprep.subr.bf16.mxu0 %v10560_v50  ;;  %v9385_v26 = vadd.f32 %v9384_v34, %v9383_v44  ;;  %v9386_v54 = vpop.f32.mrb[114].mxu1  ;;  %v10577_v50 = vld [vmem:[%s14527_s1 + $0xb88] ss:$12 sps:$4 sm:$0xff]   ;;  %v200_v44 = vld [vmem:[%s14526_s0 + $0x1f8] sm:$0xff] }
 0x1d9   :  { %v9387_v13 = vpop.f32.mrb[115].mxu1 }
 0x1da   :  { %4223 = vmatmul.mubr.bf16.gmra.mrb[12].mxu0 %v12833_v53  ;;  %v12979_v38 = vadd.f32 %v9385_v26, %v12678_v31  ;;  %v9388_v33 = vadd.f32 %v9387_v13, %v9386_v54  ;;  %v10585_v26 = vld [vmem:[%s14527_s1 + $0xbbc] ss:$12 sps:$4 sm:$0xff]  }
 0x1db   :  { %5057 = vmatmul.mubr.bf16.gmra.mrb[220].mxu1 %v12970_v19  ;;  %4286 = vmatpush1.bf16.msra.mxu0 %v10558_v39  ;;  %v13066_v39 = vcombine.low %v176_v8, %v184_v17 }
 0x1dc   :  { %4287 = vmatprep.subr.bf16.mxu0 %v10565_v63  ;;  %4232 = vmatprep.mubr.bf16.mxu0 %v12838_v56  ;;  %v12990_v53 = vadd.f32 %v9388_v33, %v12689_v22  ;;  %v12999_v56 = vcombine.low %v144_v10, %v152_v30  ;;  %v192_v30 = vld [vmem:[%s14526_s0 + $0x1b8] sm:$0xff] }
 0x1dd   :  { %5097 = vmatprep.mubr.bf16.mxu1 %v12975_v28  ;;  %v13071_v13 = vcombine.high %v192_v30, %v200_v44 }
 0x1de   :  { %v9389_v31 = vpop.f32.mrb[116].mxu1 }
 0x1df   :  { %4288 = vmatpush1.bf16.msra.mxu0 %v10563_v6  ;;  %v9390_v22 = vpop.f32.mrb[117].mxu1 }
 0x1e0   :  { %4289 = vmatprep.subr.bf16.mxu0 %v10570_v41  ;;  %v9391_v18 = vadd.f32 %v9390_v22, %v9389_v31  ;;  %v9392_v49 = vpop.f32.mrb[118].mxu1  ;;  %v10583_v41 = vld [vmem:[%s14527_s1 + $0xbb8] ss:$12 sps:$4 sm:$0xff]  }
 0x1e1   :  { %v9393_v59 = vpop.f32.mrb[119].mxu1 }
 0x1e2   :  { %4233 = vmatmul.mubr.bf16.gmra.mrb[16].mxu0 %v12874_v4  ;;  %v13011_v3 = vadd.f32 %v9391_v18, %v12713_v43  ;;  %v9394_v15 = vadd.f32 %v9393_v59, %v9392_v49  ;;  %v10591_v18 = vld [vmem:[%s14527_s1 + $0xbec] ss:$12 sps:$4 sm:$0xff]   ;;  %v13103_v59 = vcombine.high %v208_v27, %v216_v45 }
 0x1e3   :  { %5098 = vmatmul.mubr.bf16.vlgmr.msra.gmra.mrb[224].mxu1 %v12999_v56  ;;  %4290 = vmatpush1.bf16.msra.mxu0 %v10568_v9  ;;  %v13098_v9 = vcombine.low %v192_v30, %v200_v44 }
 0x1e4   :  { %4291 = vmatprep.subr.bf16.mxu0 %v10573_v11  ;;  %4242 = vmatprep.mubr.bf16.mxu0 %v12879_v24  ;;  %v13022_v4 = vadd.f32 %v9394_v15, %v12727_v48  ;;  %v10574_v24 = vld [vmem:[%s14527_s1 + $0xb70] ss:$12 sps:$4 sm:$0xff]  }
 0x1e5   :  { %5105 = vmatprep.mubr.bf16.mxu1 %v13007_v0 }
 0x1e6   :  { %v9395_v43 = vpop.f32.mrb[120].mxu1 }
 0x1e7   :  { %4292 = vmatpush1.bf16.msra.mxu0 %v10571_v12  ;;  %v9396_v48 = vpop.f32.mrb[121].mxu1 }
 0x1e8   :  { %4293 = vmatprep.subr.bf16.mxu0 %v10576_v52  ;;  %v9397_v16 = vadd.f32 %v9396_v48, %v9395_v43  ;;  %v9398_v5 = vpop.f32.mrb[122].mxu1  ;;  %v10589_v52 = vld [vmem:[%s14527_s1 + $0xbe8] ss:$12 sps:$4 sm:$0xff]  }
 0x1e9   :  { %v9399_v25 = vpop.f32.mrb[123].mxu1 }
 0x1ea   :  { %4243 = vmatmul.mubr.bf16.gmra.mrb[20].mxu0 %v12906_v36  ;;  %v13043_v7 = vadd.f32 %v9397_v16, %v12757_v21  ;;  %v9400_v1 = vadd.f32 %v9399_v25, %v9398_v5  ;;  %v10582_v36 = vld [vmem:[%s14527_s1 + $0xba4] ss:$12 sps:$4 sm:$0xff]  }
 0x1eb   :  { %5106 = vmatmul.mubr.bf16.gmra.mrb[228].mxu1 %v13034_v46  ;;  %4294 = vmatpush1.bf16.msra.mxu0 %v10574_v24  ;;  %v13124_v24 = vcombine.low %v208_v27, %v216_v45 }
 0x1ec   :  { %4295 = vmatprep.subr.bf16.mxu0 %v10579_v51  ;;  %v13050_v10 = vadd.f32 %v9400_v1, %v12771_v42  ;;  %4252 = vmatprep.mubr.bf16.mxu0 %v12911_v29  ;;  %v10580_v42 = vld [vmem:[%s14527_s1 + $0xba0] ss:$12 sps:$4 sm:$0xff]   ;;  %v240_v1 = vld [vmem:[%s14526_s0 + $0x338] sm:$0xff] }
 0x1ed   :  { %5113 = vmatprep.mubr.bf16.mxu1 %v13039_v58 }
 0x1ee   :  { %v9401_v21 = vpop.f32.mrb[124].mxu1 }
 0x1ef   :  { %4296 = vmatpush1.bf16.msra.mxu0 %v10577_v50  ;;  %v9402_v29 = vpop.f32.mrb[125].mxu1 }
 0x1f0   :  { %4297 = vmatprep.subr.bf16.mxu0 %v10582_v36  ;;  %v9403_v34 = vadd.f32 %v9402_v29, %v9401_v21  ;;  %v9404_v63 = vpop.f32.mrb[126].mxu1 }
 0x1f1   :  { %v9405_v54 = vpop.f32.mrb[127].mxu1 }
 0x1f2   :  { %4253 = vmatmul.mubr.bf16.gmra.mrb[24].mxu0 %v12938_v32  ;;  %v13075_v33 = vadd.f32 %v9403_v34, %v12801_v23  ;;  %v9406_v6 = vadd.f32 %v9405_v54, %v9404_v63  ;;  %v10588_v32 = vld [vmem:[%s14527_s1 + $0xbd4] ss:$12 sps:$4 sm:$0xff]   ;;  %v256_v34 = vld [vmem:[%s14526_s0 + $0x3b8] sm:$0xff] }
 0x1f3   :  { %5114 = vmatmul.mubr.bf16.gmra.mrb[232].mxu1 %v13066_v39  ;;  %4298 = vmatpush1.bf16.msra.mxu0 %v10580_v42  ;;  %v264_v63 = vld [vmem:[%s14526_s0 + $0x3f8] sm:$0xff] }
 0x1f4   :  { %v13082_v31 = vadd.f32 %v9406_v6, %v12815_v55  ;;  %4299 = vmatprep.subr.bf16.mxu0 %v10585_v26  ;;  %4262 = vmatprep.mubr.bf16.mxu0 %v12943_v57  ;;  %v10586_v57 = vld [vmem:[%s14527_s1 + $0xbd0] ss:$12 sps:$4 sm:$0xff]  }
 0x1f5   :  { %5121 = vmatprep.mubr.bf16.mxu1 %v13071_v13 }
 0x1f6   :  { %v9423_v23 = vpop.f32.mrb[128].mxu1 }
 0x1f7   :  { %v9424_v55 = vpop.f32.mrb[129].mxu1  ;;  %4300 = vmatpush1.bf16.msra.mxu0 %v10583_v41  ;;  %v8458_v41 = vcombine.high %v256_v34, %v264_v63 }
 0x1f8   :  { %v9425_v22 = vadd.f32 %v9424_v55, %v9423_v23  ;;  %v9426_v11 = vpop.f32.mrb[130].mxu1  ;;  %4301 = vmatprep.subr.bf16.mxu0 %v10588_v32  ;;  %v8457_v55 = vcombine.low %v256_v34, %v264_v63  ;;  %v10598_v34 = vld [vmem:[%s14529_s3 + $0xe0] ss:$8 sps:$4 sm:$0xff]   ;;  %v10600_v63 = vld [vmem:[%s14529_s3 + $0xe4] ss:$8 sps:$4 sm:$0xff]  }
 0x1f9   :  { %v9427_v49 = vpop.f32.mrb[131].mxu1 }
 0x1fa   :  { %v13106_v15 = vadd.f32 %v9425_v22, %v12845_v37  ;;  %v9428_v12 = vadd.f32 %v9427_v49, %v9426_v11  ;;  %4263 = vmatmul.mubr.bf16.gmra.mrb[28].mxu0 %v12970_v19  ;;  %v224_v37 = vld [vmem:[%s14526_s0 + $0x2b8] sm:$0xff] }
 0x1fb   :  { %5122 = vmatmul.mubr.bf16.gmra.mrb[236].mxu1 %v13098_v9  ;;  %4302 = vmatpush1.bf16.msra.mxu0 %v10586_v57  ;;  %v232_v19 = vld [vmem:[%s14526_s0 + $0x2f8] sm:$0xff] }
 0x1fc   :  { %v13114_v43 = vadd.f32 %v9428_v12, %v12859_v20  ;;  %4303 = vmatprep.subr.bf16.mxu0 %v10591_v18  ;;  %4305 = vmatprep.mubr.bf16.mxu0 %v12975_v28  ;;  %v8426_v51 = vcombine.high %v224_v37, %v232_v19  ;;  %v8425_v21 = vcombine.low %v224_v37, %v232_v19 }
 0x1fd   :  { %5129 = vmatprep.mubr.bf16.mxu1 %v13103_v59 }
 0x1fe   :  { %v9429_v8 = vpop.f32.mrb[132].mxu1 }
 0x1ff   :  { %v9430_v17 = vpop.f32.mrb[133].mxu1  ;;  %4304 = vmatpush1.bf16.msra.mxu0 %v10589_v52 }
 0x200   :  { %v9431_v20 = vadd.f32 %v9430_v17, %v9429_v8  ;;  %v9432_v48 = vpop.f32.mrb[134].mxu1 }
 0x201   :  { %v9433_v16 = vpop.f32.mrb[135].mxu1 }
 0x202   :  { %v13127_v28 = vadd.f32 %v9431_v20, %v12883_v2  ;;  %v9434_v5 = vadd.f32 %v9433_v16, %v9432_v48  ;;  %4306 = vmatmul.mubr.bf16.vlgmr.msra.gmra.mrb[0].mxu0 %v12999_v56  ;;  %v248_v2 = vld [vmem:[%s14526_s0 + $0x378] sm:$0xff]  ;;  %s10853_s0 = smov 64  }
 0x203   :  { %5130 = vmatmul.mubr.bf16.gmra.mrb[240].mxu1 %v13124_v24  ;;  %4315 = vmatprep.mubr.bf16.mxu0 %v13007_v0  ;;  %v8442_v44 = vcombine.high %v240_v1, %v248_v2  ;;  %v8441_v54 = vcombine.low %v240_v1, %v248_v2 }
 0x204   :  { %v13133_v25 = vadd.f32 %v9434_v5, %v12894_v60  ;;  %5137 = vmatprep.mubr.bf16.mxu1 %v8426_v51 }
 0x206   :  { %v9435_v50 = vpop.f32.mrb[136].mxu1 }
 0x207   :  { %v9436_v36 = vpop.f32.mrb[137].mxu1 }
 0x208   :  { %v9437_v56 = vadd.f32 %v9436_v36, %v9435_v50  ;;  %v9438_v30 = vpop.f32.mrb[138].mxu1  ;;  %v10595_v36 = vld [vmem:[%s14529_s3 + $0xd0] ss:$8 sps:$4 sm:$0xff]  }
 0x209   :  { %v9439_v42 = vpop.f32.mrb[139].mxu1 }
 0x20a   :  { %v13142_v0 = vadd.f32 %v9437_v56, %v12915_v40  ;;  %v9440_v60 = vadd.f32 %v9439_v42, %v9438_v30  ;;  %4316 = vmatmul.mubr.bf16.gmra.mrb[4].mxu0 %v13034_v46 }
 0x20b   :  { %5138 = vmatmul.mubr.bf16.gmra.mrb[244].mxu1 %v8425_v21  ;;  %4325 = vmatprep.mubr.bf16.mxu0 %v13039_v58 }
 0x20c   :  { %v13147_v29 = vadd.f32 %v9440_v60, %v12926_v61  ;;  %5145 = vmatprep.mubr.bf16.mxu1 %v8442_v44 }
 0x20e   :  { %v9441_v40 = vpop.f32.mrb[140].mxu1 }
 0x20f   :  { %v9442_v26 = vpop.f32.mrb[141].mxu1 }
 0x210   :  { %v9443_v6 = vadd.f32 %v9442_v26, %v9441_v40  ;;  %v9444_v46 = vpop.f32.mrb[142].mxu1 }
 0x211   :  { %v9445_v32 = vpop.f32.mrb[143].mxu1 }
 0x212   :  { %v13156_v58 = vadd.f32 %v9443_v6, %v12947_v14  ;;  %v9446_v61 = vadd.f32 %v9445_v32, %v9444_v46  ;;  %4326 = vmatmul.mubr.bf16.gmra.mrb[8].mxu0 %v13066_v39 }
 0x213   :  { %5146 = vmatmul.mubr.bf16.gmra.mrb[248].mxu1 %v8441_v54  ;;  %4335 = vmatprep.mubr.bf16.mxu0 %v13071_v13 }
 0x214   :  { %v13161_v23 = vadd.f32 %v9446_v61, %v12958_v35  ;;  %5153 = vmatprep.mubr.bf16.mxu1 %v8458_v41 }
 0x216   :  { %v9447_v27 = vpop.f32.mrb[144].mxu1 }
 0x217   :  { %v9448_v45 = vpop.f32.mrb[145].mxu1 }
 0x218   :  { %v9449_v57 = vadd.f32 %v9448_v45, %v9447_v27  ;;  %v9450_v22 = vpop.f32.mrb[146].mxu1 }
 0x219   :  { %v9451_v11 = vpop.f32.mrb[147].mxu1 }
 0x21a   :  { %v13164_v18 = vadd.f32 %v9449_v57, %v12979_v38  ;;  %v9452_v14 = vadd.f32 %v9451_v11, %v9450_v22  ;;  %4336 = vmatmul.mubr.bf16.gmra.mrb[12].mxu0 %v13098_v9  ;;  %v10606_v57 = vld [vmem:[%s14529_s3 + $0x104] ss:$8 sps:$4 sm:$0xff]  }
 0x21b   :  { %5154 = vmatmul.mubr.bf16.gmra.mrb[252].mxu1 %v8457_v55  ;;  %4345 = vmatprep.mubr.bf16.mxu0 %v13103_v59 }
 0x21c   :  { %v13169_v39 = vadd.f32 %v9452_v14, %v12990_v53 }
 0x21e   :  { %v9453_v35 = vpop.f32.mrb[148].mxu1 }
 0x21f   :  { %v9454_v13 = vpop.f32.mrb[149].mxu1 }
 0x220   :  { %v9455_v49 = vadd.f32 %v9454_v13, %v9453_v35  ;;  %v9456_v12 = vpop.f32.mrb[150].mxu1 }
 0x221   :  { %v9457_v52 = vpop.f32.mrb[151].mxu1 }
 0x222   :  { %v13172_v37 = vadd.f32 %v9455_v49, %v13011_v3  ;;  %v9458_v19 = vadd.f32 %v9457_v52, %v9456_v12  ;;  %4346 = vmatmul.mubr.bf16.gmra.mrb[16].mxu0 %v13124_v24  ;;  %v10594_v24 = vld [vmem:[%s14529_s3 + $0xc4] ss:$8 sps:$4 sm:$0xff]   ;;  %v10607_v12 = vld [vmem:[%s14529_s3 + $0x110] ss:$8 sps:$4 sm:$0xff]   ;;  %v10609_v52 = vld [vmem:[%s14529_s3 + $0x114] ss:$8 sps:$4 sm:$0xff]  }
 0x223   :  { %4355 = vmatprep.mubr.bf16.mxu0 %v8426_v51  ;;  %6047 = vmatprep.subr.bf16.mxu1 %v10594_v24  ;;  %v10613_v24 = vld [vmem:[%s14529_s3 + $0x130] ss:$8 sps:$4 sm:$0xff]  }
 0x224   :  { %v13176_v38 = vadd.f32 %v9458_v19, %v13022_v4  ;;  %v10592_v4 = vld [vmem:[%s14529_s3 + $0xc0] ss:$8 sps:$4 sm:$0xff]  }
 0x225   :  { %6048 = vmatpush1.bf16.msra.mxu1 %v10592_v4 }
 0x226   :  { %v9459_v9 = vpop.f32.mrb[152].mxu1 }
 0x227   :  { %v9460_v59 = vpop.f32.mrb[153].mxu1 }
 0x228   :  { %v9461_v8 = vadd.f32 %v9460_v59, %v9459_v9  ;;  %v9462_v53 = vpop.f32.mrb[154].mxu1  ;;  %v10612_v9 = vld [vmem:[%s14529_s3 + $0x124] ss:$8 sps:$4 sm:$0xff]  }
 0x229   :  { %v9463_v17 = vpop.f32.mrb[155].mxu1 }
 0x22a   :  { %v13179_v20 = vadd.f32 %v9461_v8, %v13043_v7  ;;  %v9464_v48 = vadd.f32 %v9463_v17, %v9462_v53  ;;  %4356 = vmatmul.mubr.bf16.gmra.mrb[20].mxu0 %v8425_v21  ;;  %v10597_v21 = vld [vmem:[%s14529_s3 + $0xd4] ss:$8 sps:$4 sm:$0xff]  }
 0x22b   :  { %4365 = vmatprep.mubr.bf16.mxu0 %v8442_v44  ;;  %6049 = vmatprep.subr.bf16.mxu1 %v10597_v21  ;;  %v10618_v21 = vld [vmem:[%s14529_s3 + $0x144] ss:$8 sps:$4 sm:$0xff]  }
 0x22c   :  { %v13182_v3 = vadd.f32 %v9464_v48, %v13050_v10  ;;  %6050 = vmatpush1.bf16.msra.mxu1 %v10595_v36 }
 0x22d   :  { %6051 = vmatprep.subr.bf16.mxu1 %v10600_v63  ;;  %v10619_v63 = vld [vmem:[%s14529_s3 + $0x150] ss:$8 sps:$4 sm:$0xff]  }
 0x22e   :  { %v9465_v16 = vpop.f32.mrb[156].mxu1 }
 0x22f   :  { %v9466_v51 = vpop.f32.mrb[157].mxu1 }
 0x230   :  { %v9467_v5 = vadd.f32 %v9466_v51, %v9465_v16  ;;  %v9468_v1 = vpop.f32.mrb[158].mxu1  ;;  %6052 = vmatpush1.bf16.msra.mxu1 %v10598_v34 }
 0x231   :  { %v9469_v7 = vpop.f32.mrb[159].mxu1 }
 0x232   :  { %v13191_v2 = vadd.f32 %v9467_v5, %v13075_v33  ;;  %v9470_v10 = vadd.f32 %v9469_v7, %v9468_v1  ;;  %4366 = vmatmul.mubr.bf16.gmra.mrb[24].mxu0 %v8441_v54  ;;  %v10603_v54 = vld [vmem:[%s14529_s3 + $0xf4] ss:$8 sps:$4 sm:$0xff]   ;;  %v10852_v5 = vmov 0.0  }
 0x233   :  { %4375 = vmatprep.mubr.bf16.mxu0 %v8458_v41  ;;  %6053 = vmatprep.subr.bf16.mxu1 %v10603_v54  ;;  %32 = vst.msk [vmem:[#allocation2] ss:$8 sm:$0x3] %vm13257_vm0, %v10852_v5  ;;  %80 = vst.msk [vmem:[#allocation2 + $0x11] ss:$8 sm:$0x3] %vm13257_vm0, %v10852_v5 }
 0x234   :  { %v13194_v50 = vadd.f32 %v9470_v10, %v13082_v31  ;;  %35 = vst.msk [vmem:[#allocation2 + $0x20] ss:$8 sm:$0x3] %vm13257_vm0, %v10852_v5  ;;  %38 = vst.msk [vmem:[#allocation2 + $0x40] ss:$8 sm:$0x3] %vm13257_vm0, %v10852_v5 }
 0x235   :  { %41 = vst.msk [vmem:[#allocation2 + $0x60] ss:$8 sm:$0x3] %vm13257_vm0, %v10852_v5  ;;  %44 = vst.msk [vmem:[#allocation2 + $0x80] ss:$8 sm:$0x3] %vm13257_vm0, %v10852_v5 }
 0x236   :  { %v9487_v56 = vpop.f32.mrb[160].mxu1  ;;  %47 = vst.msk [vmem:[#allocation2 + $0xa0] ss:$8 sm:$0x3] %vm13257_vm0, %v10852_v5  ;;  %127 = vst [vmem:[#allocation3] sm:$0xff] %v10852_v5 }
 0x237   :  { %v9488_v30 = vpop.f32.mrb[161].mxu1  ;;  %50 = vst.msk [vmem:[#allocation2 + $0xc0] ss:$8 sm:$0x3] %vm13257_vm0, %v10852_v5 }
 0x238   :  { %v9489_v33 = vadd.f32 %v9488_v30, %v9487_v56  ;;  %v9490_v44 = vpop.f32.mrb[162].mxu1  ;;  %53 = vst.msk [vmem:[#allocation2 + $0xe0] ss:$8 sm:$0x3] %vm13257_vm0, %v10852_v5  ;;  %v10616_v30 = vld [vmem:[%s14529_s3 + $0x140] ss:$8 sps:$4 sm:$0xff]  }
 0x239   :  { %v9491_v42 = vpop.f32.mrb[163].mxu1  ;;  %56 = vst.msk [vmem:[#allocation2 + $0x100] ss:$8 sm:$0x3] %vm13257_vm0, %v10852_v5 }
 0x23a   :  { %v13203_v60 = vadd.f32 %v9489_v33, %v13106_v15  ;;  %v9492_v31 = vadd.f32 %v9491_v42, %v9490_v44  ;;  %4376 = vmatmul.mubr.bf16.gmra.mrb[28].mxu0 %v8457_v55  ;;  %v10601_v15 = vld [vmem:[%s14529_s3 + $0xf0] ss:$8 sps:$4 sm:$0xff]   ;;  %v10604_v55 = vld [vmem:[%s14529_s3 + $0x100] ss:$8 sps:$4 sm:$0xff]  }
 0x23b   :  { %6054 = vmatpush1.bf16.msra.mxu1 %v10601_v15  ;;  %59 = vst.msk [vmem:[#allocation2 + $0x120] ss:$8 sm:$0x3] %vm13257_vm0, %v10852_v5  ;;  %62 = vst.msk [vmem:[#allocation2 + $0x140] ss:$8 sm:$0x3] %vm13257_vm0, %v10852_v5 }
 0x23c   :  { %v13212_v40 = vadd.f32 %v9492_v31, %v13114_v43  ;;  %6055 = vmatprep.subr.bf16.mxu1 %v10606_v57  ;;  %65 = vst.msk [vmem:[#allocation2 + $0x160] ss:$8 sm:$0x3] %vm13257_vm0, %v10852_v5  ;;  %68 = vst.msk [vmem:[#allocation2 + $0x180] ss:$8 sm:$0x3] %vm13257_vm0, %v10852_v5 }
 0x23d   :  { %71 = vst.msk [vmem:[#allocation2 + $0x1a0] ss:$8 sm:$0x3] %vm13257_vm0, %v10852_v5  ;;  %74 = vst.msk [vmem:[#allocation2 + $0x1c0] ss:$8 sm:$0x3] %vm13257_vm0, %v10852_v5 }
 0x23e   :  { %v9493_v26 = vpop.f32.mrb[164].mxu1  ;;  %77 = vst.msk [vmem:[#allocation2 + $0x1e0] ss:$8 sm:$0x3] %vm13257_vm0, %v10852_v5  ;;  %v10625_v57 = vld [vmem:[%s14529_s3 + $0x170] ss:$8 sps:$4 sm:$0xff]  }
 0x23f   :  { %v9494_v6 = vpop.f32.mrb[165].mxu1  ;;  %6056 = vmatpush1.bf16.msra.mxu1 %v10604_v55  ;;  %83 = vst.msk [vmem:[#allocation2 + $0x31] ss:$8 sm:$0x3] %vm13257_vm0, %v10852_v5 }
 0x240   :  { %v9495_v46 = vadd.f32 %v9494_v6, %v9493_v26  ;;  %v9496_v41 = vpop.f32.mrb[166].mxu1  ;;  %6057 = vmatprep.subr.bf16.mxu1 %v10609_v52  ;;  %86 = vst.msk [vmem:[#allocation2 + $0x51] ss:$8 sm:$0x3] %vm13257_vm0, %v10852_v5  ;;  %v10624_v6 = vld [vmem:[%s14529_s3 + $0x164] ss:$8 sps:$4 sm:$0xff]  }
 0x241   :  { %v9497_v32 = vpop.f32.mrb[167].mxu1  ;;  %89 = vst.msk [vmem:[#allocation2 + $0x71] ss:$8 sm:$0x3] %vm13257_vm0, %v10852_v5 }
 0x242   :  { %v13221_v43 = vadd.f32 %v9495_v46, %v13127_v28  ;;  %v9498_v61 = vadd.f32 %v9497_v32, %v9496_v41  ;;  %92 = vst.msk [vmem:[#allocation2 + $0x91] ss:$8 sm:$0x3] %vm13257_vm0, %v10852_v5  ;;  %95 = vst.msk [vmem:[#allocation2 + $0xb1] ss:$8 sm:$0x3] %vm13257_vm0, %v10852_v5 }
 0x243   :  { %6058 = vmatpush1.bf16.msra.mxu1 %v10607_v12  ;;  %98 = vst.msk [vmem:[#allocation2 + $0xd1] ss:$8 sm:$0x3] %vm13257_vm0, %v10852_v5  ;;  %101 = vst.msk [vmem:[#allocation2 + $0xf1] ss:$8 sm:$0x3] %vm13257_vm0, %v10852_v5 }
 0x244   :  { %v13224_v27 = vadd.f32 %v9498_v61, %v13133_v25  ;;  %6059 = vmatprep.subr.bf16.mxu1 %v10612_v9  ;;  %104 = vst.msk [vmem:[#allocation2 + $0x111] ss:$8 sm:$0x3] %vm13257_vm0, %v10852_v5  ;;  %107 = vst.msk [vmem:[#allocation2 + $0x131] ss:$8 sm:$0x3] %vm13257_vm0, %v10852_v5 }
 0x245   :  { %110 = vst.msk [vmem:[#allocation2 + $0x151] ss:$8 sm:$0x3] %vm13257_vm0, %v10852_v5  ;;  %113 = vst.msk [vmem:[#allocation2 + $0x171] ss:$8 sm:$0x3] %vm13257_vm0, %v10852_v5 }
 0x246   :  { %v9499_v45 = vpop.f32.mrb[168].mxu1  ;;  %116 = vst.msk [vmem:[#allocation2 + $0x191] ss:$8 sm:$0x3] %vm13257_vm0, %v10852_v5 }
 0x247   :  { %v9500_v22 = vpop.f32.mrb[169].mxu1  ;;  %119 = vst.msk [vmem:[#allocation2 + $0x1b1] ss:$8 sm:$0x3] %vm13257_vm0, %v10852_v5 }
 0x248   :  { %v9501_v11 = vadd.f32 %v9500_v22, %v9499_v45  ;;  %v9502_v14 = vpop.f32.mrb[170].mxu1  ;;  %122 = vst.msk [vmem:[#allocation2 + $0x1d1] ss:$8 sm:$0x3] %vm13257_vm0, %v10852_v5  ;;  %v10627_v45 = vld [vmem:[%s14529_s3 + $0x174] ss:$8 sps:$4 sm:$0xff]  }
 0x249   :  { %v9503_v35 = vpop.f32.mrb[171].mxu1  ;;  %125 = vst.msk [vmem:[#allocation2 + $0x1f1] ss:$8 sm:$0x3] %vm13257_vm0, %v10852_v5 }
 0x24a   :  { %v13233_v28 = vadd.f32 %v9501_v11, %v13142_v0  ;;  %v9504_v25 = vadd.f32 %v9503_v35, %v9502_v14 }
 0x24c   :  { %v13236_v13 = vadd.f32 %v9504_v25, %v13147_v29  ;;  %v10610_v29 = vld [vmem:[%s14529_s3 + $0x120] ss:$8 sps:$4 sm:$0xff]  }
 0x24d   :  { %6060 = vmatpush1.bf16.msra.mxu1 %v10610_v29 }
 0x24e   :  { %v9505_v49 = vpop.f32.mrb[172].mxu1 }
 0x24f   :  { %v9506_v19 = vpop.f32.mrb[173].mxu1 }
 0x250   :  { %v9507_v0 = vadd.f32 %v9506_v19, %v9505_v49  ;;  %v9508_v59 = vpop.f32.mrb[174].mxu1 }
 0x251   :  { %v9509_v8 = vpop.f32.mrb[175].mxu1 }
 0x252   :  { %v13251_v53 = vadd.f32 %v9507_v0, %v13156_v58  ;;  %v9510_v17 = vadd.f32 %v9509_v8, %v9508_v59  ;;  %v10615_v58 = vld [vmem:[%s14529_s3 + $0x134] ss:$8 sps:$4 sm:$0xff]  }
 0x253   :  { %6061 = vmatprep.subr.bf16.mxu1 %v10615_v58 }
 0x254   :  { %v13254_v48 = vadd.f32 %v9510_v17, %v13161_v23  ;;  %6062 = vmatpush1.bf16.msra.mxu1 %v10613_v24 }
 0x255   :  { %6063 = vmatprep.subr.bf16.mxu1 %v10618_v21 }
 0x256   :  { %v9511_v4 = vpop.f32.mrb[176].mxu1 }
 0x257   :  { %v9512_v51 = vpop.f32.mrb[177].mxu1 }
 0x258   :  { %v9513_v62 = vadd.f32 %v9512_v51, %v9511_v4  ;;  %v9514_v23 = vpop.f32.mrb[178].mxu1  ;;  %6064 = vmatpush1.bf16.msra.mxu1 %v10616_v30 }
 0x259   :  { %v9515_v1 = vpop.f32.mrb[179].mxu1 }
 0x25a   :  { %v13332_v7 = vadd.f32 %v9513_v62, %v13164_v18  ;;  %v9516_v10 = vadd.f32 %v9515_v1, %v9514_v23 }
 0x25c   :  { %v13335_v36 = vadd.f32 %v9516_v10, %v13169_v39  ;;  %v10621_v39 = vld [vmem:[%s14529_s3 + $0x154] ss:$8 sps:$4 sm:$0xff]  }
 0x25d   :  { %6065 = vmatprep.subr.bf16.mxu1 %v10621_v39 }
 0x25e   :  { %v9517_v56 = vpop.f32.mrb[180].mxu1  ;;  %6066 = vmatpush1.bf16.msra.mxu1 %v10619_v63 }
 0x25f   :  { %v9518_v33 = vpop.f32.mrb[181].mxu1  ;;  %6067 = vmatprep.subr.bf16.mxu1 %v10624_v6 }
 0x260   :  { %v9519_v44 = vadd.f32 %v9518_v33, %v9517_v56  ;;  %v9520_v42 = vpop.f32.mrb[182].mxu1 }
 0x261   :  { %v9521_v18 = vpop.f32.mrb[183].mxu1 }
 0x262   :  { %v13347_v31 = vadd.f32 %v9519_v44, %v13172_v37  ;;  %v9522_v34 = vadd.f32 %v9521_v18, %v9520_v42  ;;  %v10622_v37 = vld [vmem:[%s14529_s3 + $0x160] ss:$8 sps:$4 sm:$0xff]  }
 0x263   :  { %6068 = vmatpush1.bf16.msra.mxu1 %v10622_v37 }
 0x264   :  { %v13353_v26 = vadd.f32 %v9522_v34, %v13176_v38  ;;  %6069 = vmatprep.subr.bf16.mxu1 %v10627_v45 }
 0x266   :  { %v9523_v15 = vpop.f32.mrb[184].mxu1 }
 0x267   :  { %v9524_v54 = vpop.f32.mrb[185].mxu1  ;;  %6070 = vmatpush1.bf16.msra.mxu1 %v10625_v57 }
 0x268   :  { %v9525_v46 = vadd.f32 %v9524_v54, %v9523_v15  ;;  %v9526_v41 = vpop.f32.mrb[186].mxu1 }
 0x269   :  { %v9527_v32 = vpop.f32.mrb[187].mxu1 }
 0x26a   :  { %v13362_v61 = vadd.f32 %v9525_v46, %v13179_v20  ;;  %v9528_v38 = vadd.f32 %v9527_v32, %v9526_v41 }
 0x26c   :  { %v13368_v55 = vadd.f32 %v9528_v38, %v13182_v3  ;;  %v10630_v3 = vld [vmem:[%s14529_s3 + $0x4] ss:$8 sps:$4 sm:$0xff]  }
 0x26d   :  { %6304 = vmatprep.subr.bf16.mxu1 %v10630_v3 }
 0x26e   :  { %v9529_v22 = vpop.f32.mrb[188].mxu1 }
 0x26f   :  { %v9530_v11 = vpop.f32.mrb[189].mxu1 }
 0x270   :  { %v9531_v14 = vadd.f32 %v9530_v11, %v9529_v22  ;;  %v9532_v20 = vpop.f32.mrb[190].mxu1 }
 0x271   :  { %v9533_v35 = vpop.f32.mrb[191].mxu1 }
 0x272   :  { %v13374_v25 = vadd.f32 %v9531_v14, %v13191_v2  ;;  %v9534_v49 = vadd.f32 %v9533_v35, %v9532_v20 }
 0x274   :  { %v13377_v12 = vadd.f32 %v9534_v49, %v13194_v50 }
 0x276   :  { %v9551_v52 = vpop.f32.mrb[192].mxu1 }
 0x277   :  { %v9552_v19 = vpop.f32.mrb[193].mxu1 }
 0x278   :  { %v9553_v9 = vadd.f32 %v9552_v19, %v9551_v52  ;;  %v9554_v0 = vpop.f32.mrb[194].mxu1 }
 0x279   :  { %v9555_v59 = vpop.f32.mrb[195].mxu1 }
 0x27a   :  { %v13383_v8 = vadd.f32 %v9553_v9, %v13203_v60  ;;  %v9556_v29 = vadd.f32 %v9555_v59, %v9554_v0 }
 0x27c   :  { %v13386_v2 = vadd.f32 %v9556_v29, %v13212_v40 }
 0x27e   :  { %v9557_v17 = vpop.f32.mrb[196].mxu1 }
 0x27f   :  { %v9558_v50 = vpop.f32.mrb[197].mxu1 }
 0x280   :  { %v9559_v16 = vadd.f32 %v9558_v50, %v9557_v17  ;;  %v9560_v4 = vpop.f32.mrb[198].mxu1 }
 0x281   :  { %v9561_v24 = vpop.f32.mrb[199].mxu1 }
 0x282   :  { %v13389_v58 = vadd.f32 %v9559_v16, %v13221_v43  ;;  %v9562_v51 = vadd.f32 %v9561_v24, %v9560_v4 }
 0x284   :  { %v13392_v5 = vadd.f32 %v9562_v51, %v13224_v27 }
 0x286   :  { %v9563_v62 = vpop.f32.mrb[200].mxu1 }
 0x287   :  { %v9564_v23 = vpop.f32.mrb[201].mxu1 }
 0x288   :  { %v9565_v60 = vadd.f32 %v9564_v23, %v9563_v62  ;;  %v9566_v1 = vpop.f32.mrb[202].mxu1 }
 0x289   :  { %v9567_v10 = vpop.f32.mrb[203].mxu1 }
 0x28a   :  { %v13395_v40 = vadd.f32 %v9565_v60, %v13233_v28  ;;  %v9568_v21 = vadd.f32 %v9567_v10, %v9566_v1 }
 0x28c   :  { %v13398_v56 = vadd.f32 %v9568_v21, %v13236_v13 }
 0x28e   :  { %v9569_v30 = vpop.f32.mrb[204].mxu1 }
 0x28f   :  { %v9570_v33 = vpop.f32.mrb[205].mxu1 }
 0x290   :  { %v9571_v43 = vadd.f32 %v9570_v33, %v9569_v30  ;;  %v9572_v44 = vpop.f32.mrb[206].mxu1 }
 0x291   :  { %v9573_v42 = vpop.f32.mrb[207].mxu1 }
 0x292   :  { %v13401_v27 = vadd.f32 %v9571_v43, %v13251_v53  ;;  %v9574_v18 = vadd.f32 %v9573_v42, %v9572_v44 }
 0x294   :  { %v13404_v39 = vadd.f32 %v9574_v18, %v13254_v48 }
 0x296   :  { %v9575_v34 = vpop.f32.mrb[208].mxu1 }
 0x297   :  { %v9576_v63 = vpop.f32.mrb[209].mxu1 }
 0x298   :  { %v9577_v28 = vadd.f32 %v9576_v63, %v9575_v34  ;;  %v9578_v15 = vpop.f32.mrb[210].mxu1 }
 0x299   :  { %v9579_v54 = vpop.f32.mrb[211].mxu1 }
 0x29a   :  { %v13407_v13 = vadd.f32 %v9577_v28, %v13332_v7  ;;  %v9580_v6 = vadd.f32 %v9579_v54, %v9578_v15 }
 0x29c   :  { %v13410_v46 = vadd.f32 %v9580_v6, %v13335_v36  ;;  %v13445_v6 = vsub.s32 1, %v12128_v47 }
 0x29e   :  { %v9581_v41 = vpop.f32.mrb[212].mxu1  ;;  %14547 = vst [vmem:[#allocation8_spill] sm:$0xff] %v13445_v6 }
 0x29f   :  { %v9582_v37 = vpop.f32.mrb[213].mxu1 }
 0x2a0   :  { %v9583_v53 = vadd.f32 %v9582_v37, %v9581_v41  ;;  %v9584_v32 = vpop.f32.mrb[214].mxu1 }
 0x2a1   :  { %v9585_v38 = vpop.f32.mrb[215].mxu1 }
 0x2a2   :  { %v13413_v48 = vadd.f32 %v9583_v53, %v13347_v31  ;;  %v9586_v45 = vadd.f32 %v9585_v38, %v9584_v32 }
 0x2a4   :  { %v13416_v57 = vadd.f32 %v9586_v45, %v13353_v26 }
 0x2a6   :  { %v9587_v22 = vpop.f32.mrb[216].mxu1 }
 0x2a7   :  { %v9588_v11 = vpop.f32.mrb[217].mxu1 }
 0x2a8   :  { %v9589_v7 = vadd.f32 %v9588_v11, %v9587_v22  ;;  %v9590_v14 = vpop.f32.mrb[218].mxu1 }
 0x2a9   :  { %v9591_v20 = vpop.f32.mrb[219].mxu1 }
 0x2aa   :  { %v13419_v36 = vadd.f32 %v9589_v7, %v13362_v61  ;;  %v9592_v35 = vadd.f32 %v9591_v20, %v9590_v14 }
 0x2ac   :  { %v13422_v49 = vadd.f32 %v9592_v35, %v13368_v55 }
 0x2ae   :  { %v9593_v3 = vpop.f32.mrb[220].mxu1 }
 0x2af   :  { %v9594_v52 = vpop.f32.mrb[221].mxu1 }
 0x2b0   :  { %v9595_v31 = vadd.f32 %v9594_v52, %v9593_v3  ;;  %v9596_v19 = vpop.f32.mrb[222].mxu1 }
 0x2b1   :  { %v9597_v9 = vpop.f32.mrb[223].mxu1 }
 0x2b2   :  { %v13425_v26 = vadd.f32 %v9595_v31, %v13374_v25  ;;  %v9598_v0 = vadd.f32 %v9597_v9, %v9596_v19 }
 0x2b4   :  { %v13428_v59 = vadd.f32 %v9598_v0, %v13377_v12 }
 0x2b6   :  { %v9615_v29 = vpop.f32.mrb[224].mxu1 }
 0x2b7   :  { %v9616_v17 = vpop.f32.mrb[225].mxu1 }
 0x2b8   :  { %v9617_v61 = vadd.f32 %v9616_v17, %v9615_v29  ;;  %v9618_v50 = vpop.f32.mrb[226].mxu1 }
 0x2b9   :  { %v9619_v16 = vpop.f32.mrb[227].mxu1 }
 0x2ba   :  { %v9620_v4 = vadd.f32 %v9619_v16, %v9618_v50  ;;  %v5100_v55 = vadd.f32 %v9617_v61, %v13383_v8 }
 0x2bc   :  { %v5164_v24 = vmax.f32 %v5100_v55, 0.0  ;;  %v5103_v51 = vadd.f32 %v9620_v4, %v13386_v2 }
 0x2be   :  { %v9621_v62 = vpop.f32.mrb[228].mxu1  ;;  %5244 = vrot.lane.b32.xlu0 %v5164_v24, %s10853_s0  ;;  %v5167_v25 = vmax.f32 %v5103_v51, 0.0 }
 0x2bf   :  { %v9622_v23 = vpop.f32.mrb[229].mxu1 }
 0x2c0   :  { %v9623_v60 = vadd.f32 %v9622_v23, %v9621_v62  ;;  %v9624_v12 = vpop.f32.mrb[230].mxu1  ;;  %5248 = vrot.lane.b32.xlu1 %v5167_v25, %s10853_s0 }
 0x2c1   :  { %v9625_v1 = vpop.f32.mrb[231].mxu1 }
 0x2c2   :  { %v5108_v10 = vadd.f32 %v9623_v60, %v13389_v58  ;;  %v9626_v21 = vadd.f32 %v9625_v1, %v9624_v12 }
 0x2c4   :  { %v5170_v30 = vmax.f32 %v5108_v10, 0.0  ;;  %v5111_v8 = vadd.f32 %v9626_v21, %v13392_v5  ;;  %v13442_v5 = vsub.s32 0, %v12128_v47 }
 0x2c6   :  { %v9627_v33 = vpop.f32.mrb[232].mxu1  ;;  %5252 = vrot.lane.b32.xlu1 %v5170_v30, %s10853_s0  ;;  %v5173_v43 = vmax.f32 %v5111_v8, 0.0  ;;  %14546 = vst [vmem:[#allocation7_spill] sm:$0xff] %v13442_v5 }
 0x2c7   :  { %v9628_v2 = vpop.f32.mrb[233].mxu1 }
 0x2c8   :  { %v9629_v44 = vadd.f32 %v9628_v2, %v9627_v33  ;;  %v9630_v42 = vpop.f32.mrb[234].mxu1 }
 0x2c9   :  { %v9631_v18 = vpop.f32.mrb[235].mxu1 }
 0x2ca   :  { %v5116_v34 = vadd.f32 %v9629_v44, %v13395_v40  ;;  %v9632_v63 = vadd.f32 %v9631_v18, %v9630_v42  ;;  %5256 = vrot.lane.b32.xlu1 %v5173_v43, %s10853_s0 }
 0x2cc   :  { %v5176_v28 = vmax.f32 %v5116_v34, 0.0  ;;  %v5119_v58 = vadd.f32 %v9632_v63, %v13398_v56  ;;  %v10826_v56 = vld [vmem:[%s14528_s2] sm:$0x7] }
 0x2cd   :  { %v13453_v45 = vrot.slane %v10826_v56, %v13442_v5  ;;  %v13456_v22 = vrot.slane %v10826_v56, %v13445_v6 }
 0x2ce   :  { %v9633_v15 = vpop.f32.mrb[236].mxu1  ;;  %5260 = vrot.lane.b32.xlu1 %v5176_v28, %s10853_s0  ;;  %v5179_v41 = vmax.f32 %v5119_v58, 0.0 }
 0x2cf   :  { %v9634_v54 = vpop.f32.mrb[237].mxu1 }
 0x2d0   :  { %v9635_v37 = vadd.f32 %v9634_v54, %v9633_v15  ;;  %v9636_v53 = vpop.f32.mrb[238].mxu1 }
 0x2d1   :  { %v9637_v40 = vpop.f32.mrb[239].mxu1 }
 0x2d2   :  { %v5124_v32 = vadd.f32 %v9635_v37, %v13401_v27  ;;  %v9638_v38 = vadd.f32 %v9637_v40, %v9636_v53  ;;  %5264 = vrot.lane.b32.xlu1 %v5179_v41, %s10853_s0 }
 0x2d4   :  { %v5182_v47 = vmax.f32 %v5124_v32, 0.0  ;;  %v5127_v11 = vadd.f32 %v9638_v38, %v13404_v39 }
 0x2d5   :  { %v4307_v7 = vpop.f32.mrb[0].mxu0 }
 0x2d6   :  { %v9691_v14 = vadd.f32 %v4307_v7, %v13453_v45  ;;  %v9639_v27 = vpop.f32.mrb[240].mxu1  ;;  %5268 = vrot.lane.b32.xlu1 %v5182_v47, %s10853_s0  ;;  %v4309_v20 = vpop.f32.mrb[1].mxu0  ;;  %v5185_v31 = vmax.f32 %v5127_v11, 0.0 }
 0x2d7   :  { %v9692_v35 = vadd.f32 %v4309_v20, %v13456_v22  ;;  %v9640_v3 = vpop.f32.mrb[241].mxu1  ;;  %v4311_v52 = vpop.f32.mrb[2].mxu0 }
 0x2d8   :  { %v5162_v19 = vmax.f32 %v9691_v14, 0.0  ;;  %v9641_v9 = vadd.f32 %v9640_v3, %v9639_v27  ;;  %v9693_v0 = vadd.f32 %v4311_v52, %v13453_v45  ;;  %v9642_v29 = vpop.f32.mrb[242].mxu1  ;;  %v4313_v17 = vpop.f32.mrb[3].mxu0 }
 0x2d9   :  { %v5163_v61 = vmax.f32 %v9692_v35, 0.0  ;;  %v9694_v39 = vadd.f32 %v4313_v17, %v13456_v22  ;;  %v9643_v50 = vpop.f32.mrb[243].mxu1 }
 0x2da   :  { %v5403_v16 = vrot.slane %v5162_v19, 7  ;;  %v5132_v4 = vadd.f32 %v9641_v9, %v13407_v13  ;;  %v5165_v55 = vmax.f32 %v9693_v0, 0.0  ;;  %v9644_v24 = vadd.f32 %v9643_v50, %v9642_v29  ;;  %5272 = vrot.lane.b32.xlu1 %v5185_v31, %s10853_s0 }
 0x2db   :  { %v5404_v51 = vrot.slane %v5163_v61, 7  ;;  %v5166_v62 = vmax.f32 %v9694_v39, 0.0  ;;  %5242 = vrot.lane.b32.xlu0 %v5163_v61, %s10853_s0 }
 0x2dc   :  { %5467 = vst [vmem:[#allocation2] sm:$0xfe] %v5403_v16  ;;  %5470 = vst [vmem:[#allocation2 + $0x10] sm:$0x1] %v5403_v16  ;;  %v5405_v25 = vrot.slane %v5165_v55, 7  ;;  %v5135_v23 = vadd.f32 %v9644_v24, %v13410_v46  ;;  %v5188_v8 = vmax.f32 %v5132_v4, 0.0 }
 0x2dd   :  { %5469 = vst.msk [vmem:[#allocation2 + $0x8] sm:$0xfe] %vm5468_vm1, %v5404_v51  ;;  %v5406_v60 = vrot.slane %v5166_v62, 7  ;;  %v4317_v12 = vpop.f32.mrb[4].mxu0 }
 0x2de   :  { %5472 = vst.msk [vmem:[#allocation2 + $0x18] sm:$0x1] %vm5471_vm2, %v5404_v51  ;;  %5473 = vst [vmem:[#allocation2 + $0x20] sm:$0xfe] %v5405_v25  ;;  %v9695_v13 = vadd.f32 %v4317_v12, %v13453_v45  ;;  %v9645_v1 = vpop.f32.mrb[244].mxu1  ;;  %5246 = vrot.lane.b32.xlu1 %v5166_v62, %s10853_s0  ;;  %v4319_v10 = vpop.f32.mrb[5].mxu0 }
 0x2df   :  { %5475 = vst [vmem:[#allocation2 + $0x30] sm:$0x1] %v5405_v25  ;;  %5474 = vst.msk [vmem:[#allocation2 + $0x28] sm:$0xfe] %vm5468_vm1, %v5406_v60  ;;  %v9696_v46 = vadd.f32 %v4319_v10, %v13456_v22  ;;  %v9646_v21 = vpop.f32.mrb[245].mxu1  ;;  %v4321_v30 = vpop.f32.mrb[6].mxu0 }
 0x2e0   :  { %5476 = vst.msk [vmem:[#allocation2 + $0x38] sm:$0x1] %vm5471_vm2, %v5406_v60  ;;  %v5168_v33 = vmax.f32 %v9695_v13, 0.0  ;;  %v9647_v2 = vadd.f32 %v9646_v21, %v9645_v1  ;;  %v9697_v43 = vadd.f32 %v4321_v30, %v13453_v45  ;;  %v9648_v44 = vpop.f32.mrb[246].mxu1  ;;  %v4323_v42 = vpop.f32.mrb[7].mxu0  ;;  %v5191_v40 = vmax.f32 %v5135_v23, 0.0 }
 0x2e1   :  { %v5169_v18 = vmax.f32 %v9696_v46, 0.0  ;;  %v9649_v34 = vpop.f32.mrb[247].mxu1  ;;  %v9698_v53 = vadd.f32 %v4323_v42, %v13456_v22 }
 0x2e2   :  { %v5407_v63 = vrot.slane %v5168_v33, 7  ;;  %v5140_v28 = vadd.f32 %v9647_v2, %v13413_v48  ;;  %v5171_v58 = vmax.f32 %v9697_v43, 0.0  ;;  %v9650_v15 = vadd.f32 %v9649_v34, %v9648_v44  ;;  %5276 = vrot.lane.b32.xlu1 %v5188_v8, %s10853_s0 }
 0x2e3   :  { %v5605_v54 = vld [vmem:[#allocation2] sm:$0xfe]  ;;  %v5607_v41 = vld [vmem:[#allocation2 + $0x10] sm:$0x1]  ;;  %v5408_v37 = vrot.slane %v5169_v18, 7  ;;  %5250 = vrot.lane.b32.xlu0 %v5169_v18, %s10853_s0  ;;  %v5172_v27 = vmax.f32 %v9698_v53, 0.0 }
 0x2e4   :  { %5477 = vst [vmem:[#allocation2 + $0x40] sm:$0xfe] %v5407_v63  ;;  %5479 = vst [vmem:[#allocation2 + $0x50] sm:$0x1] %v5407_v63  ;;  %v13481_v32 = vadd.f32 %v9650_v15, %v13416_v57  ;;  %v5734_v38 = vrot.slane %v5605_v54, 1  ;;  %v5735_v56 = vrot.slane %v5607_v41, 1 }
 0x2e5   :  { %v5609_v48 = vld [vmem:[#allocation2 + $0x20] sm:$0xfe]  ;;  %5478 = vst.msk [vmem:[#allocation2 + $0x48] sm:$0xfe] %vm5468_vm1, %v5408_v37  ;;  %v5409_v7 = vrot.slane %v5171_v58, 7  ;;  %v4327_v20 = vpop.f32.mrb[8].mxu0 }
 0x2e6   :  { %5480 = vst.msk [vmem:[#allocation2 + $0x58] sm:$0x1] %vm5471_vm2, %v5408_v37  ;;  %v5611_v47 = vld [vmem:[#allocation2 + $0x30] sm:$0x1]  ;;  %v5740_v11 = vrot.slane %v5609_v48, 1  ;;  %5280 = vrot.lane.b32.xlu1 %v5191_v40, %s10853_s0  ;;  %v5194_v35 = vmax.f32 %v5140_v28, 0.0  ;;  %v9699_v3 = vadd.f32 %v4327_v20, %v13453_v45  ;;  %v13489_v9 = vsel %vm5733_vm3, %v5734_v38, %v5735_v56 }
 0x2e7   :  { %v5741_v14 = vrot.slane %v5611_v47, 1  ;;  %5481 = vst [vmem:[#allocation2 + $0x60] sm:$0xfe] %v5409_v7  ;;  %5483 = vst [vmem:[#allocation2 + $0x70] sm:$0x1] %v5409_v7  ;;  %v5197_v57 = vmax.f32 %v13481_v32, 0.0  ;;  %5254 = vrot.lane.b32.xlu0 %v5172_v27, %s10853_s0 }
 0x2e8   :  { %v9651_v52 = vpop.f32.mrb[248].mxu1  ;;  %v4329_v31 = vpop.f32.mrb[9].mxu0  ;;  %v5606_v19 = vld [vmem:[#allocation2 + $0x8] sm:$0xfe]  ;;  %v5410_v0 = vrot.slane %v5172_v27, 7  ;;  %v5174_v4 = vmax.f32 %v9699_v3, 0.0 }
 0x2e9   :  { %v9700_v29 = vadd.f32 %v4329_v31, %v13456_v22  ;;  %v9652_v17 = vpop.f32.mrb[249].mxu1  ;;  %v4331_v61 = vpop.f32.mrb[10].mxu0  ;;  %v5608_v39 = vld [vmem:[#allocation2 + $0x18] sm:$0x1]  ;;  %v5737_v50 = vrot.slane %v5606_v19, 1  ;;  %v13494_v16 = vsel %vm5733_vm3, %v5740_v11, %v5741_v14 }
 0x2ea   :  { %v9653_v55 = vadd.f32 %v9652_v17, %v9651_v52  ;;  %v9701_v24 = vadd.f32 %v4331_v61, %v13453_v45  ;;  %v9654_v51 = vpop.f32.mrb[250].mxu1  ;;  %v4333_v62 = vpop.f32.mrb[11].mxu0  ;;  %5284 = vrot.lane.b32.xlu1 %v5194_v35, %s10853_s0  ;;  %v5610_v25 = vld [vmem:[#allocation2 + $0x28] sm:$0xfe]  ;;  %5482 = vst.msk [vmem:[#allocation2 + $0x68] sm:$0xfe] %vm5468_vm1, %v5410_v0 }
 0x2eb   :  { %5484 = vst.msk [vmem:[#allocation2 + $0x78] sm:$0x1] %vm5471_vm2, %v5410_v0  ;;  %v5175_v23 = vmax.f32 %v9700_v29, 0.0  ;;  %v9702_v60 = vadd.f32 %v4333_v62, %v13456_v22  ;;  %v9655_v12 = vpop.f32.mrb[251].mxu1  ;;  %v5612_v13 = vld [vmem:[#allocation2 + $0x38] sm:$0x1] }
 0x2ec   :  { %v5738_v1 = vrot.slane %v5608_v39, 1  ;;  %v5743_v10 = vrot.slane %v5610_v25, 1  ;;  %v5411_v46 = vrot.slane %v5174_v4, 7  ;;  %v5148_v21 = vadd.f32 %v9653_v55, %v13419_v36  ;;  %v10628_v58 = vld [vmem:[%s14529_s3] ss:$8 sps:$4 sm:$0xff]  }
 0x2ed   :  { %v5177_v30 = vmax.f32 %v9701_v24, 0.0  ;;  %v9656_v8 = vadd.f32 %v9655_v12, %v9654_v51  ;;  %v5412_v33 = vrot.slane %v5175_v23, 7  ;;  %v5178_v2 = vmax.f32 %v9702_v60, 0.0  ;;  %5258 = vrot.lane.b32.xlu0 %v5175_v23, %s10853_s0  ;;  %v4337_v42 = vpop.f32.mrb[12].mxu0  ;;  %v5614_v54 = vld [vmem:[#allocation2 + $0x48] sm:$0xfe] }
 0x2ee   :  { %v5739_v43 = vsel %vm5733_vm3, %v5737_v50, %v5738_v1  ;;  %v5744_v44 = vrot.slane %v5612_v13, 1  ;;  %5485 = vst [vmem:[#allocation2 + $0x80] sm:$0xfe] %v5411_v46  ;;  %5487 = vst [vmem:[#allocation2 + $0x90] sm:$0x1] %v5411_v46  ;;  %v5200_v18 = vmax.f32 %v5148_v21, 0.0  ;;  %v9703_v28 = vadd.f32 %v4337_v42, %v13453_v45  ;;  %5288 = vrot.lane.b32.xlu1 %v5197_v57, %s10853_s0 }
 0x2ef   :  { %v5413_v34 = vrot.slane %v5177_v30, 7  ;;  %v13505_v63 = vadd.f32 %v9656_v8, %v13422_v49  ;;  %v9657_v36 = vpop.f32.mrb[252].mxu1  ;;  %v4339_v15 = vpop.f32.mrb[13].mxu0  ;;  %5486 = vst.msk [vmem:[#allocation2 + $0x88] sm:$0xfe] %vm5468_vm1, %v5412_v33  ;;  %v5414_v41 = vrot.slane %v5178_v2, 7  ;;  %v5862_v49 = vpack.c.bf16 %v13494_v16, %v13489_v9 }
 0x2f0   :  { %5488 = vst.msk [vmem:[#allocation2 + $0x98] sm:$0x1] %vm5471_vm2, %v5412_v33  ;;  %v5745_v37 = vsel %vm5733_vm3, %v5743_v10, %v5744_v44  ;;  %v9704_v53 = vadd.f32 %v4339_v15, %v13456_v22  ;;  %v9658_v40 = vpop.f32.mrb[253].mxu1  ;;  %v4341_v32 = vpop.f32.mrb[14].mxu0  ;;  %v10633_v38 = vld [vmem:[%s14529_s3 + $0x14] ss:$8 sps:$4 sm:$0xff]  }
 0x2f1   :  { %v5616_v56 = vld [vmem:[#allocation2 + $0x58] sm:$0x1]  ;;  %5489 = vst [vmem:[#allocation2 + $0xa0] sm:$0xfe] %v5413_v34  ;;  %5491 = vst [vmem:[#allocation2 + $0xb0] sm:$0x1] %v5413_v34  ;;  %v5863_v47 = vpack.c.bf16 %v5745_v37, %v5739_v43  ;;  %v9659_v7 = vadd.f32 %v9658_v40, %v9657_v36  ;;  %v9705_v57 = vadd.f32 %v4341_v32, %v13453_v45  ;;  %5262 = vrot.lane.b32.xlu0 %v5178_v2, %s10853_s0 }
 0x2f2   :  { %v5203_v48 = vmax.f32 %v13505_v63, 0.0  ;;  %v5180_v11 = vmax.f32 %v9703_v28, 0.0  ;;  %v9660_v14 = vpop.f32.mrb[254].mxu1  ;;  %v4343_v27 = vpop.f32.mrb[15].mxu0  ;;  %v13522_v20 = vld [vmem:[#allocation2 + $0x40] sm:$0xfe]  ;;  %5292 = vrot.lane.b32.xlu1 %v5200_v18, %s10853_s0 }
 0x2f3   :  { %5490 = vst.msk [vmem:[#allocation2 + $0xa8] sm:$0xfe] %vm5468_vm1, %v5414_v41  ;;  %v5181_v35 = vmax.f32 %v9704_v53, 0.0  ;;  %v13529_v3 = vadd.f32 %v4343_v27, %v13456_v22  ;;  %v9661_v52 = vpop.f32.mrb[255].mxu1  ;;  %v5749_v31 = vrot.slane %v5614_v54, 1  ;;  %8891 = vmatprep.mubr.msk.bf16.mxu1 %vm5306_vm4, %v5863_v47  ;;  %v13533_v0 = vadd.f32 %v9659_v7, %v13425_v26 }
 0x2f4   :  { %5492 = vst.msk [vmem:[#allocation2 + $0xb8] sm:$0x1] %vm5471_vm2, %v5414_v41  ;;  %v5615_v19 = vld [vmem:[#allocation2 + $0x50] sm:$0x1]  ;;  %v5415_v9 = vrot.slane %v5180_v11, 7  ;;  %v9662_v29 = vadd.f32 %v9661_v52, %v9660_v14  ;;  %v5750_v50 = vrot.slane %v5616_v56, 1  ;;  %6080 = vmatmul.mubr.bf16.vlgmr.msra.gmra.mrb[0].mxu1 %v5862_v49 }
 0x2f5   :  { %v10631_v17 = vld [vmem:[%s14529_s3 + $0x10] ss:$8 sps:$4 sm:$0xff]   ;;  %v5618_v61 = vld [vmem:[#allocation2 + $0x68] sm:$0xfe]  ;;  %v5416_v16 = vrot.slane %v5181_v35, 7  ;;  %v5183_v4 = vmax.f32 %v9705_v57, 0.0  ;;  %6305 = vmatpush1.bf16.msra.mxu1 %v10628_v58  ;;  %5266 = vrot.lane.b32.xlu0 %v5181_v35, %s10853_s0 }
 0x2f6   :  { %v5620_v39 = vld [vmem:[#allocation2 + $0x78] sm:$0x1]  ;;  %v5184_v55 = vmax.f32 %v13529_v3, 0.0  ;;  %v5755_v24 = vrot.slane %v5618_v61, 1  ;;  %v5617_v51 = vld [vmem:[#allocation2 + $0x60] sm:$0xfe]  ;;  %v13542_v62 = vadd.f32 %v9662_v29, %v13428_v59  ;;  %v5751_v25 = vsel %vm5733_vm3, %v5749_v31, %v5750_v50  ;;  %6306 = vmatprep.subr.bf16.mxu1 %v10633_v38  ;;  %5296 = vrot.lane.b32.xlu1 %v5203_v48, %s10853_s0 }
 0x2f7   :  { %5493 = vst [vmem:[#allocation2 + $0xc0] sm:$0xfe] %v5415_v9  ;;  %5495 = vst [vmem:[#allocation2 + $0xd0] sm:$0x1] %v5415_v9  ;;  %v5206_v26 = vmax.f32 %v13533_v0, 0.0  ;;  %v5756_v23 = vrot.slane %v5620_v39, 1 }
 0x2f8   :  { %v5619_v60 = vld [vmem:[#allocation2 + $0x70] sm:$0x1]  ;;  %v10636_v12 = vld [vmem:[%s14529_s3 + $0x24] ss:$8 sps:$4 sm:$0xff]   ;;  %5494 = vst.msk [vmem:[#allocation2 + $0xc8] sm:$0xfe] %vm5468_vm1, %v5416_v16 }
 0x2f9   :  { %5496 = vst.msk [vmem:[#allocation2 + $0xd8] sm:$0x1] %vm5471_vm2, %v5416_v16  ;;  %v5417_v13 = vrot.slane %v5183_v4, 7  ;;  %v5418_v1 = vrot.slane %v5184_v55, 7  ;;  %v4347_v10 = vpop.f32.mrb[16].mxu0  ;;  %v5746_v59 = vrot.slane %v13522_v20, 1  ;;  %v5757_v30 = vsel %vm5733_vm3, %v5755_v24, %v5756_v23  ;;  %6307 = vmatpush1.bf16.msra.mxu1 %v10631_v17  ;;  %5270 = vrot.lane.b32.xlu0 %v5184_v55, %s10853_s0 }
 0x2fa   :  { %v5747_v46 = vrot.slane %v5615_v19, 1  ;;  %v5209_v21 = vmax.f32 %v13542_v62, 0.0  ;;  %v9707_v8 = vadd.f32 %v4347_v10, %v13453_v45  ;;  %v5752_v33 = vrot.slane %v5617_v51, 1  ;;  %v4349_v2 = vpop.f32.mrb[17].mxu0  ;;  %v5622_v43 = vld [vmem:[#allocation2 + $0x88] sm:$0xfe]  ;;  %6308 = vmatprep.subr.bf16.mxu1 %v10636_v12  ;;  %5300 = vrot.lane.b32.xlu1 %v5206_v26, %s10853_s0 }
 0x2fb   :  { %5497 = vst [vmem:[#allocation2 + $0xe0] sm:$0xfe] %v5417_v13  ;;  %5499 = vst [vmem:[#allocation2 + $0xf0] sm:$0x1] %v5417_v13  ;;  %v5865_v44 = vpack.c.bf16 %v5757_v30, %v5751_v25  ;;  %v5753_v42 = vrot.slane %v5619_v60, 1  ;;  %v9708_v18 = vadd.f32 %v4349_v2, %v13456_v22  ;;  %v4351_v34 = vpop.f32.mrb[18].mxu0 }
 0x2fc   :  { %5498 = vst.msk [vmem:[#allocation2 + $0xe8] sm:$0xfe] %vm5468_vm1, %v5418_v1  ;;  %v10634_v63 = vld [vmem:[%s14529_s3 + $0x20] ss:$8 sps:$4 sm:$0xff]   ;;  %v5624_v28 = vld [vmem:[#allocation2 + $0x98] sm:$0x1]  ;;  %v5748_v15 = vsel %vm5733_vm3, %v5746_v59, %v5747_v46  ;;  %v9709_v54 = vadd.f32 %v4351_v34, %v13453_v45 }
 0x2fd   :  { %5500 = vst.msk [vmem:[#allocation2 + $0xf8] sm:$0x1] %vm5471_vm2, %v5418_v1  ;;  %v5621_v36 = vld [vmem:[#allocation2 + $0x80] sm:$0xfe]  ;;  %v5186_v58 = vmax.f32 %v9707_v8, 0.0  ;;  %v4353_v41 = vpop.f32.mrb[19].mxu0  ;;  %8892 = vmatprep.mubr.msk.bf16.mxu1 %vm5306_vm4, %v5865_v44  ;;  %v5754_v40 = vsel %vm5733_vm3, %v5752_v33, %v5753_v42  ;;  %6309 = vmatpush1.bf16.msra.mxu1 %v10634_v63 }
 0x2fe   :  { %v5626_v37 = vld [vmem:[#allocation2 + $0xa8] sm:$0xfe]  ;;  %v5628_v49 = vld [vmem:[#allocation2 + $0xb8] sm:$0x1]  ;;  %v10639_v53 = vld [vmem:[%s14529_s3 + $0x34] ss:$8 sps:$4 sm:$0xff]   ;;  %v13571_v38 = vadd.f32 %v4353_v41, %v13456_v22  ;;  %v5864_v7 = vpack.c.bf16 %v5754_v40, %v5748_v15  ;;  %5304 = vrot.lane.b32.xlu1 %v5209_v21, %s10853_s0 }
 0x2ff   :  { %v5187_v32 = vmax.f32 %v9708_v18, 0.0  ;;  %v5761_v56 = vrot.slane %v5622_v43, 1  ;;  %v5623_v48 = vld [vmem:[#allocation2 + $0x90] sm:$0x1]  ;;  %v5625_v47 = vld [vmem:[#allocation2 + $0xa0] sm:$0xfe]  ;;  %6310 = vmatprep.subr.bf16.mxu1 %v10639_v53 }
 0x300   :  { %v5419_v11 = vrot.slane %v5186_v58, 7  ;;  %v5189_v14 = vmax.f32 %v9709_v54, 0.0  ;;  %v5762_v27 = vrot.slane %v5624_v28, 1  ;;  %v5627_v20 = vld [vmem:[#allocation2 + $0xb0] sm:$0x1]  ;;  %v5190_v57 = vmax.f32 %v13571_v38, 0.0  ;;  %6090 = vmatmul.mubr.bf16.gmra.mrb[4].mxu1 %v5864_v7 }
 0x301   :  { %v5420_v35 = vrot.slane %v5187_v32, 7  ;;  %v5767_v3 = vrot.slane %v5626_v37, 1  ;;  %v5768_v52 = vrot.slane %v5628_v49, 1  ;;  %v10637_v31 = vld [vmem:[%s14529_s3 + $0x30] ss:$8 sps:$4 sm:$0xff]   ;;  %v5758_v0 = vrot.slane %v5621_v36, 1  ;;  %5274 = vrot.lane.b32.xlu0 %v5187_v32, %s10853_s0 }
 0x302   :  { %5501 = vst [vmem:[#allocation2 + $0x100] sm:$0xfe] %v5419_v11  ;;  %5503 = vst [vmem:[#allocation2 + $0x110] sm:$0x1] %v5419_v11  ;;  %v5421_v19 = vrot.slane %v5189_v14, 7  ;;  %v5763_v9 = vsel %vm5733_vm3, %v5761_v56, %v5762_v27  ;;  %v5759_v29 = vrot.slane %v5623_v48, 1  ;;  %6311 = vmatpush1.bf16.msra.mxu1 %v10637_v31 }
 0x303   :  { %v10642_v17 = vld [vmem:[%s14529_s3 + $0x44] ss:$8 sps:$4 sm:$0xff]   ;;  %5502 = vst.msk [vmem:[#allocation2 + $0x108] sm:$0xfe] %vm5468_vm1, %v5420_v35  ;;  %v5422_v50 = vrot.slane %v5190_v57, 7  ;;  %v5769_v16 = vsel %vm5733_vm3, %v5767_v3, %v5768_v52  ;;  %v4357_v4 = vpop.f32.mrb[20].mxu0 }
 0x304   :  { %v5630_v61 = vld [vmem:[#allocation2 + $0xc8] sm:$0xfe]  ;;  %v13582_v39 = vld [vmem:[#allocation2 + $0xc0] sm:$0xfe]  ;;  %5504 = vst.msk [vmem:[#allocation2 + $0x118] sm:$0x1] %vm5471_vm2, %v5420_v35  ;;  %v5867_v26 = vpack.c.bf16 %v5769_v16, %v5763_v9  ;;  %v9711_v25 = vadd.f32 %v4357_v4, %v13453_v45  ;;  %v5760_v23 = vsel %vm5733_vm3, %v5758_v0, %v5759_v29  ;;  %6312 = vmatprep.subr.bf16.mxu1 %v10642_v17 }
 0x305   :  { %v5764_v55 = vrot.slane %v5625_v47, 1  ;;  %v5765_v24 = vrot.slane %v5627_v20, 1  ;;  %v5632_v51 = vld [vmem:[#allocation2 + $0xd8] sm:$0x1]  ;;  %5505 = vst [vmem:[#allocation2 + $0x120] sm:$0xfe] %v5421_v19  ;;  %5278 = vrot.lane.b32.xlu0 %v5190_v57, %s10853_s0 }
 0x306   :  { %5507 = vst [vmem:[#allocation2 + $0x130] sm:$0x1] %v5421_v19  ;;  %v4359_v60 = vpop.f32.mrb[21].mxu0  ;;  %v5634_v12 = vld [vmem:[#allocation2 + $0xe8] sm:$0xfe]  ;;  %v5773_v1 = vrot.slane %v5630_v61, 1  ;;  %8893 = vmatprep.mubr.msk.bf16.mxu1 %vm5306_vm4, %v5867_v26 }
 0x307   :  { %v5636_v13 = vld [vmem:[#allocation2 + $0xf8] sm:$0x1]  ;;  %5506 = vst.msk [vmem:[#allocation2 + $0x128] sm:$0xfe] %vm5468_vm1, %v5422_v50  ;;  %v5766_v10 = vsel %vm5733_vm3, %v5764_v55, %v5765_v24  ;;  %v9712_v59 = vadd.f32 %v4359_v60, %v13456_v22  ;;  %v4361_v46 = vpop.f32.mrb[22].mxu0  ;;  %v5774_v30 = vrot.slane %v5632_v51, 1 }
 0x308   :  { %5508 = vst.msk [vmem:[#allocation2 + $0x138] sm:$0x1] %vm5471_vm2, %v5422_v50  ;;  %v5779_v8 = vrot.slane %v5634_v12, 1  ;;  %v5631_v62 = vld [vmem:[#allocation2 + $0xd0] sm:$0x1]  ;;  %v5192_v21 = vmax.f32 %v9711_v25, 0.0  ;;  %v5866_v33 = vpack.c.bf16 %v5766_v10, %v5760_v23  ;;  %v9713_v2 = vadd.f32 %v4361_v46, %v13453_v45 }
 0x309   :  { %v4363_v43 = vpop.f32.mrb[23].mxu0  ;;  %v5780_v44 = vrot.slane %v5636_v13, 1  ;;  %v5633_v42 = vld [vmem:[#allocation2 + $0xe0] sm:$0xfe]  ;;  %v5193_v18 = vmax.f32 %v9712_v59, 0.0  ;;  %v5775_v63 = vsel %vm5733_vm3, %v5773_v1, %v5774_v30  ;;  %v5770_v36 = vrot.slane %v13582_v39, 1 }
 0x30a   :  { %v9714_v34 = vadd.f32 %v4363_v43, %v13456_v22  ;;  %v5635_v28 = vld [vmem:[#allocation2 + $0xf0] sm:$0x1]  ;;  %v5423_v58 = vrot.slane %v5192_v21, 7  ;;  %v5195_v15 = vmax.f32 %v9713_v2, 0.0  ;;  %v10640_v54 = vld [vmem:[%s14529_s3 + $0x40] ss:$8 sps:$4 sm:$0xff]   ;;  %6100 = vmatmul.mubr.bf16.gmra.mrb[8].mxu1 %v5866_v33 }
 0x30b   :  { %v5781_v41 = vsel %vm5733_vm3, %v5779_v8, %v5780_v44  ;;  %v5771_v37 = vrot.slane %v5631_v62, 1  ;;  %v5424_v49 = vrot.slane %v5193_v18, 7  ;;  %v5776_v32 = vrot.slane %v5633_v42, 1  ;;  %v10645_v38 = vld [vmem:[%s14529_s3 + $0x54] ss:$8 sps:$4 sm:$0xff]   ;;  %5282 = vrot.lane.b32.xlu0 %v5193_v18, %s10853_s0  ;;  %v4367_v27 = vpop.f32.mrb[24].mxu0  ;;  %6313 = vmatpush1.bf16.msra.mxu1 %v10640_v54 }
 0x30c   :  { %v5196_v53 = vmax.f32 %v9714_v34, 0.0  ;;  %v5869_v40 = vpack.c.bf16 %v5781_v41, %v5775_v63  ;;  %5509 = vst [vmem:[#allocation2 + $0x140] sm:$0xfe] %v5423_v58  ;;  %5511 = vst [vmem:[#allocation2 + $0x150] sm:$0x1] %v5423_v58  ;;  %v5425_v56 = vrot.slane %v5195_v15, 7  ;;  %v9715_v3 = vadd.f32 %v4367_v27, %v13453_v45  ;;  %6314 = vmatprep.subr.bf16.mxu1 %v10645_v38 }
 0x30d   :  { %v5777_v48 = vrot.slane %v5635_v28, 1  ;;  %v10643_v47 = vld [vmem:[%s14529_s3 + $0x50] ss:$8 sps:$4 sm:$0xff]   ;;  %v5638_v11 = vld [vmem:[#allocation2 + $0x108] sm:$0xfe]  ;;  %v4369_v31 = vpop.f32.mrb[25].mxu0  ;;  %v5772_v0 = vsel %vm5733_vm3, %v5770_v36, %v5771_v37 }
 0x30e   :  { %v5640_v7 = vld [vmem:[#allocation2 + $0x118] sm:$0x1]  ;;  %5510 = vst.msk [vmem:[#allocation2 + $0x148] sm:$0xfe] %vm5468_vm1, %v5424_v49  ;;  %v5426_v14 = vrot.slane %v5196_v53, 7  ;;  %8894 = vmatprep.mubr.msk.bf16.mxu1 %vm5306_vm4, %v5869_v40  ;;  %v5785_v20 = vrot.slane %v5638_v11, 1  ;;  %v9716_v29 = vadd.f32 %v4369_v31, %v13456_v22 }
 0x30f   :  { %5512 = vst.msk [vmem:[#allocation2 + $0x158] sm:$0x1] %vm5471_vm2, %v5424_v49  ;;  %v5786_v35 = vrot.slane %v5640_v7, 1  ;;  %v13617_v57 = vld [vmem:[#allocation2 + $0x100] sm:$0xfe]  ;;  %v5778_v52 = vsel %vm5733_vm3, %v5776_v32, %v5777_v48  ;;  %v4371_v17 = vpop.f32.mrb[26].mxu0  ;;  %5286 = vrot.lane.b32.xlu0 %v5196_v53, %s10853_s0  ;;  %6315 = vmatpush1.bf16.msra.mxu1 %v10643_v47 }
 0x310   :  { %5513 = vst [vmem:[#allocation2 + $0x160] sm:$0xfe] %v5425_v56  ;;  %5515 = vst [vmem:[#allocation2 + $0x170] sm:$0x1] %v5425_v56  ;;  %v5642_v19 = vld [vmem:[#allocation2 + $0x128] sm:$0xfe]  ;;  %v9717_v4 = vadd.f32 %v4371_v17, %v13453_v45  ;;  %v5868_v25 = vpack.c.bf16 %v5778_v52, %v5772_v0 }
 0x311   :  { %v5644_v9 = vld [vmem:[#allocation2 + $0x138] sm:$0x1]  ;;  %5514 = vst.msk [vmem:[#allocation2 + $0x168] sm:$0xfe] %vm5468_vm1, %v5426_v14  ;;  %v5791_v61 = vrot.slane %v5642_v19, 1  ;;  %v5198_v16 = vmax.f32 %v9715_v3, 0.0  ;;  %v5787_v12 = vsel %vm5733_vm3, %v5785_v20, %v5786_v35 }
 0x312   :  { %5516 = vst.msk [vmem:[#allocation2 + $0x178] sm:$0x1] %vm5471_vm2, %v5426_v14  ;;  %v5641_v39 = vld [vmem:[#allocation2 + $0x120] sm:$0xfe]  ;;  %v4373_v55 = vpop.f32.mrb[27].mxu0  ;;  %v5792_v24 = vrot.slane %v5644_v9, 1  ;;  %6110 = vmatmul.mubr.bf16.gmra.mrb[12].mxu1 %v5868_v25 }
 0x313   :  { %v10648_v50 = vld [vmem:[%s14529_s3 + $0x64] ss:$8 sps:$4 sm:$0xff]   ;;  %v5643_v51 = vld [vmem:[#allocation2 + $0x130] sm:$0x1]  ;;  %v5782_v26 = vrot.slane %v13617_v57, 1  ;;  %v5199_v23 = vmax.f32 %v9716_v29, 0.0  ;;  %v9718_v60 = vadd.f32 %v4373_v55, %v13456_v22 }
 0x314   :  { %v5639_v13 = vld [vmem:[#allocation2 + $0x110] sm:$0x1]  ;;  %v5427_v1 = vrot.slane %v5198_v16, 7  ;;  %v5201_v10 = vmax.f32 %v9717_v4, 0.0  ;;  %v5793_v59 = vsel %vm5733_vm3, %v5791_v61, %v5792_v24  ;;  %v5788_v46 = vrot.slane %v5641_v39, 1  ;;  %6316 = vmatprep.subr.bf16.mxu1 %v10648_v50  ;;  %v4377_v63 = vpop.f32.mrb[28].mxu0 }
 0x315   :  { %v10646_v30 = vld [vmem:[%s14529_s3 + $0x60] ss:$8 sps:$4 sm:$0xff]   ;;  %v5428_v8 = vrot.slane %v5199_v23, 7  ;;  %v5202_v62 = vmax.f32 %v9718_v60, 0.0  ;;  %v5871_v21 = vpack.c.bf16 %v5793_v59, %v5787_v12  ;;  %v5789_v33 = vrot.slane %v5643_v51, 1  ;;  %5290 = vrot.lane.b32.xlu0 %v5199_v23, %s10853_s0  ;;  %v4379_v54 = vpop.f32.mrb[29].mxu0 }
 0x316   :  { %v10651_v2 = vld [vmem:[%s14529_s3 + $0x74] ss:$8 sps:$4 sm:$0xff]   ;;  %5517 = vst [vmem:[#allocation2 + $0x180] sm:$0xfe] %v5427_v1  ;;  %5519 = vst [vmem:[#allocation2 + $0x190] sm:$0x1] %v5427_v1  ;;  %v9719_v15 = vadd.f32 %v4377_v63, %v13453_v45  ;;  %6317 = vmatpush1.bf16.msra.mxu1 %v10646_v30  ;;  %v9720_v53 = vadd.f32 %v4379_v54, %v13456_v22 }
 0x317   :  { %v5429_v43 = vrot.slane %v5201_v10, 7  ;;  %v5783_v44 = vrot.slane %v5639_v13, 1  ;;  %v5646_v42 = vld [vmem:[#allocation2 + $0x148] sm:$0xfe]  ;;  %v5648_v18 = vld [vmem:[#allocation2 + $0x158] sm:$0x1]  ;;  %8895 = vmatprep.mubr.msk.bf16.mxu1 %vm5306_vm4, %v5871_v21  ;;  %v5790_v49 = vsel %vm5733_vm3, %v5788_v46, %v5789_v33  ;;  %6318 = vmatprep.subr.bf16.mxu1 %v10651_v2 }
 0x318   :  { %5518 = vst.msk [vmem:[#allocation2 + $0x188] sm:$0xfe] %vm5468_vm1, %v5428_v8  ;;  %v5430_v34 = vrot.slane %v5202_v62, 7  ;;  %v10649_v28 = vld [vmem:[%s14529_s3 + $0x70] ss:$8 sps:$4 sm:$0xff]   ;;  %v5797_v36 = vrot.slane %v5646_v42, 1 }
 0x319   :  { %5520 = vst.msk [vmem:[#allocation2 + $0x198] sm:$0x1] %vm5471_vm2, %v5428_v8  ;;  %v5798_v58 = vrot.slane %v5648_v18, 1  ;;  %5521 = vst [vmem:[#allocation2 + $0x1a0] sm:$0xfe] %v5429_v43  ;;  %v4381_v40 = vpop.f32.mrb[30].mxu0  ;;  %v5784_v47 = vsel %vm5733_vm3, %v5782_v26, %v5783_v44  ;;  %5294 = vrot.lane.b32.xlu0 %v5202_v62, %s10853_s0 }
 0x31a   :  { %5523 = vst [vmem:[#allocation2 + $0x1b0] sm:$0x1] %v5429_v43  ;;  %v5650_v41 = vld [vmem:[#allocation2 + $0x168] sm:$0xfe]  ;;  %v5652_v37 = vld [vmem:[#allocation2 + $0x178] sm:$0x1]  ;;  %v9721_v11 = vadd.f32 %v4381_v40, %v13453_v45  ;;  %v5870_v19 = vpack.c.bf16 %v5790_v49, %v5784_v47  ;;  %6319 = vmatpush1.bf16.msra.mxu1 %v10649_v28 }
 0x31b   :  { %5522 = vst.msk [vmem:[#allocation2 + $0x1a8] sm:$0xfe] %vm5468_vm1, %v5430_v34  ;;  %v5803_v32 = vrot.slane %v5650_v41, 1  ;;  %v5804_v38 = vrot.slane %v5652_v37, 1  ;;  %v10654_v56 = vld [vmem:[%s14529_s3 + $0x84] ss:$8 sps:$4 sm:$0xff]   ;;  %v5799_v57 = vsel %vm5733_vm3, %v5797_v36, %v5798_v58 }
 0x31c   :  { %5524 = vst.msk [vmem:[#allocation2 + $0x1b8] sm:$0x1] %vm5471_vm2, %v5430_v34  ;;  %v5204_v48 = vmax.f32 %v9719_v15, 0.0  ;;  %v4383_v7 = vpop.f32.mrb[31].mxu0  ;;  %v5649_v14 = vld [vmem:[#allocation2 + $0x160] sm:$0xfe]  ;;  %6320 = vmatprep.subr.bf16.mxu1 %v10654_v56  ;;  %6120 = vmatmul.mubr.bf16.gmra.mrb[16].mxu1 %v5870_v19 }
 0x31d   :  { %v5651_v27 = vld [vmem:[#allocation2 + $0x170] sm:$0x1]  ;;  %v5205_v20 = vmax.f32 %v9720_v53, 0.0  ;;  %v9722_v35 = vadd.f32 %v4383_v7, %v13456_v22  ;;  %v5805_v3 = vsel %vm5733_vm3, %v5803_v32, %v5804_v38  ;;  %v5645_v52 = vld [vmem:[#allocation2 + $0x140] sm:$0xfe]  ;;  %v5207_v9 = vmax.f32 %v9721_v11, 0.0 }
 0x31e   :  { %v5431_v31 = vrot.slane %v5204_v48, 7  ;;  %v5873_v0 = vpack.c.bf16 %v5805_v3, %v5799_v57  ;;  %v5647_v29 = vld [vmem:[#allocation2 + $0x150] sm:$0x1]  ;;  %v10652_v45 = vld [vmem:[%s14529_s3 + $0x80] ss:$8 sps:$4 sm:$0xff]   ;;  %v5800_v39 = vrot.slane %v5649_v14, 1 }
 0x31f   :  { %v5432_v17 = vrot.slane %v5205_v20, 7  ;;  %v5208_v61 = vmax.f32 %v9722_v35, 0.0  ;;  %v5801_v50 = vrot.slane %v5651_v27, 1  ;;  %v10657_v22 = vld [vmem:[%s14529_s3 + $0x94] ss:$8 sps:$4 sm:$0xff]   ;;  %v5433_v16 = vrot.slane %v5207_v9, 7  ;;  %5298 = vrot.lane.b32.xlu0 %v5205_v20, %s10853_s0  ;;  %6321 = vmatpush1.bf16.msra.mxu1 %v10652_v45 }
 0x320   :  { %5525 = vst [vmem:[#allocation2 + $0x1c0] sm:$0xfe] %v5431_v31  ;;  %5527 = vst [vmem:[#allocation2 + $0x1d0] sm:$0x1] %v5431_v31  ;;  %v5794_v4 = vrot.slane %v5645_v52, 1  ;;  %8896 = vmatprep.mubr.msk.bf16.mxu1 %vm5306_vm4, %v5873_v0  ;;  %v5795_v26 = vrot.slane %v5647_v29, 1  ;;  %6322 = vmatprep.subr.bf16.mxu1 %v10657_v22 }
 0x321   :  { %v5654_v55 = vld [vmem:[#allocation2 + $0x188] sm:$0xfe]  ;;  %v5656_v24 = vld [vmem:[#allocation2 + $0x198] sm:$0x1]  ;;  %5526 = vst.msk [vmem:[#allocation2 + $0x1c8] sm:$0xfe] %vm5468_vm1, %v5432_v17  ;;  %v5802_v1 = vsel %vm5733_vm3, %v5800_v39, %v5801_v50 }
 0x322   :  { %5528 = vst.msk [vmem:[#allocation2 + $0x1d8] sm:$0x1] %vm5471_vm2, %v5432_v17  ;;  %v5434_v51 = vrot.slane %v5208_v61, 7  ;;  %v5809_v25 = vrot.slane %v5654_v55, 1  ;;  %v5810_v23 = vrot.slane %v5656_v24, 1  ;;  %v5796_v62 = vsel %vm5733_vm3, %v5794_v4, %v5795_v26  ;;  %v5536_v29 = vld [vmem:[#allocation2 + $0x28] sm:$0xff] }
 0x323   :  { %5529 = vst [vmem:[#allocation2 + $0x1e0] sm:$0xfe] %v5433_v16  ;;  %5531 = vst [vmem:[#allocation2 + $0x1f0] sm:$0x1] %v5433_v16  ;;  %v5658_v60 = vld [vmem:[#allocation2 + $0x1a8] sm:$0xfe]  ;;  %5302 = vrot.lane.b32.xlu0 %v5208_v61, %s10853_s0  ;;  %v5872_v2 = vpack.c.bf16 %v5802_v1, %v5796_v62 }
 0x324   :  { %v5660_v12 = vld [vmem:[#allocation2 + $0x1b8] sm:$0x1]  ;;  %5530 = vst.msk [vmem:[#allocation2 + $0x1e8] sm:$0xfe] %vm5468_vm1, %v5434_v51  ;;  %v5815_v10 = vrot.slane %v5658_v60, 1  ;;  %v5811_v21 = vsel %vm5733_vm3, %v5809_v25, %v5810_v23  ;;  %v5534_v61 = vld [vmem:[#allocation2 + $0x8] sm:$0xff] }
 0x325   :  { %v10655_v13 = vld [vmem:[%s14529_s3 + $0x90] ss:$8 sps:$4 sm:$0xff]   ;;  %5532 = vst.msk [vmem:[#allocation2 + $0x1f8] sm:$0x1] %vm5471_vm2, %v5434_v51  ;;  %v5816_v59 = vrot.slane %v5660_v12, 1  ;;  %6130 = vmatmul.mubr.bf16.gmra.mrb[20].mxu1 %v5872_v2  ;;  %v5566_v39 = vpack.c.bf16 %v5536_v29, %v5534_v61  ;;  %v5535_v50 = vld [vmem:[#allocation2 + $0x20] sm:$0xff] }
 0x326   :  { %v10660_v46 = vld [vmem:[%s14529_s3 + $0xa4] ss:$8 sps:$4 sm:$0xff]   ;;  %v5659_v8 = vld [vmem:[#allocation2 + $0x1b0] sm:$0x1]  ;;  %6323 = vmatpush1.bf16.msra.mxu1 %v10655_v13  ;;  %v10658_v18 = vld [vmem:[%s14529_s3 + $0xa0] ss:$8 sps:$4 sm:$0xff]  }
 0x327   :  { %v5657_v30 = vld [vmem:[#allocation2 + $0x1a0] sm:$0xfe]  ;;  %v5817_v33 = vsel %vm5733_vm3, %v5815_v10, %v5816_v59  ;;  %v5655_v42 = vld [vmem:[#allocation2 + $0x190] sm:$0x1]  ;;  %v5813_v63 = vrot.slane %v5659_v8, 1  ;;  %6324 = vmatprep.subr.bf16.mxu1 %v10660_v46  ;;  %v5540_v22 = vld [vmem:[#allocation2 + $0x68] sm:$0xff] }
 0x328   :  { %v5875_v43 = vpack.c.bf16 %v5817_v33, %v5811_v21  ;;  %v5653_v44 = vld [vmem:[#allocation2 + $0x180] sm:$0xfe]  ;;  %v5812_v34 = vrot.slane %v5657_v30, 1  ;;  %v10663_v28 = vld [vmem:[%s14529_s3 + $0xb4] ss:$8 sps:$4 sm:$0xff]   ;;  %v5807_v54 = vrot.slane %v5655_v42, 1 }
 0x329   :  { %v5662_v36 = vld [vmem:[#allocation2 + $0x1c8] sm:$0xfe]  ;;  %v5664_v58 = vld [vmem:[#allocation2 + $0x1d8] sm:$0x1]  ;;  %v5806_v15 = vrot.slane %v5653_v44, 1  ;;  %v5533_v4 = vld [vmem:[#allocation2] sm:$0xff] }
 0x32a   :  { %8897 = vmatprep.mubr.msk.bf16.mxu1 %vm5306_vm4, %v5875_v43  ;;  %v5821_v41 = vrot.slane %v5662_v36, 1  ;;  %v5822_v37 = vrot.slane %v5664_v58, 1  ;;  %6325 = vmatpush1.bf16.msra.mxu1 %v10658_v18  ;;  %v10661_v40 = vld [vmem:[%s14529_s3 + $0xb0] ss:$8 sps:$4 sm:$0xff]   ;;  %v5814_v32 = vsel %vm5733_vm3, %v5812_v34, %v5813_v63  ;;  %v10666_v48 = vld [vmem:[%s14529_s3 + $0x184] ss:$8 sps:$4 sm:$0xff]   ;;  %v5565_v24 = vpack.c.bf16 %v5535_v50, %v5533_v4 }
 0x32b   :  { %v5666_v49 = vld [vmem:[#allocation2 + $0x1e8] sm:$0xfe]  ;;  %6326 = vmatprep.subr.bf16.mxu1 %v10663_v28  ;;  %v5665_v47 = vld [vmem:[#allocation2 + $0x1e0] sm:$0xfe]  ;;  %v5667_v11 = vld [vmem:[#allocation2 + $0x1f0] sm:$0x1]  ;;  %v5808_v7 = vsel %vm5733_vm3, %v5806_v15, %v5807_v54 }
 0x32c   :  { %v5668_v53 = vld [vmem:[#allocation2 + $0x1f8] sm:$0x1]  ;;  %v5827_v38 = vrot.slane %v5666_v49, 1  ;;  %v5823_v14 = vsel %vm5733_vm3, %v5821_v41, %v5822_v37  ;;  %v5874_v20 = vpack.c.bf16 %v5814_v32, %v5808_v7  ;;  %v5661_v57 = vld [vmem:[#allocation2 + $0x1c0] sm:$0xfe]  ;;  %v5824_v52 = vrot.slane %v5665_v47, 1 }
 0x32d   :  { %v5828_v56 = vrot.slane %v5668_v53, 1  ;;  %v5663_v3 = vld [vmem:[#allocation2 + $0x1d0] sm:$0x1]  ;;  %v5825_v31 = vrot.slane %v5667_v11, 1  ;;  %v5818_v19 = vrot.slane %v5661_v57, 1  ;;  %v5538_v51 = vld [vmem:[#allocation2 + $0x48] sm:$0xff] }
 0x32e   :  { %6327 = vmatpush1.bf16.msra.mxu1 %v10661_v40  ;;  %v5819_v9 = vrot.slane %v5663_v3, 1  ;;  %v10664_v55 = vld [vmem:[%s14529_s3 + $0x180] ss:$8 sps:$4 sm:$0xff]   ;;  %v10669_v25 = vld [vmem:[%s14529_s3 + $0x194] ss:$8 sps:$4 sm:$0xff]   ;;  %v5568_v23 = vpack.c.bf16 %v5540_v22, %v5538_v51 }
 0x32f   :  { %v5829_v27 = vsel %vm5733_vm3, %v5827_v38, %v5828_v56  ;;  %6859 = vmatprep.subr.bf16.mxu1 %v10666_v48  ;;  %6140 = vmatmul.mubr.bf16.gmra.mrb[24].mxu1 %v5874_v20  ;;  %v5826_v0 = vsel %vm5733_vm3, %v5824_v52, %v5825_v31  ;;  %v10667_v60 = vld [vmem:[%s14529_s3 + $0x190] ss:$8 sps:$4 sm:$0xff]   ;;  %v10672_v12 = vld [vmem:[%s14529_s3 + $0x1a4] ss:$8 sps:$4 sm:$0xff]   ;;  %v10670_v46 = vld [vmem:[%s14529_s3 + $0x1a0] ss:$8 sps:$4 sm:$0xff]  }
 0x330   :  { %v5877_v35 = vpack.c.bf16 %v5829_v27, %v5823_v14  ;;  %v5820_v45 = vsel %vm5733_vm3, %v5818_v19, %v5819_v9  ;;  %v13705_v16 = vpop.permute.xlu0 %5244  ;;  %v5539_v13 = vld [vmem:[#allocation2 + $0x60] sm:$0xff]  ;;  %v5544_v1 = vld [vmem:[#allocation2 + $0xa8] sm:$0xff]  ;;  %v10675_v30 = vld [vmem:[%s14529_s3 + $0x1b4] ss:$8 sps:$4 sm:$0xff]  }
 0x331   :  { %v5876_v17 = vpack.c.bf16 %v5826_v0, %v5820_v45  ;;  %5356 = vst.msk [vmem:[#allocation4 + $0x18] sm:$0xff] %vm5306_vm4, %v13705_v16  ;;  %v5537_v59 = vld [vmem:[#allocation2 + $0x40] sm:$0xff]  ;;  %v5542_v62 = vld [vmem:[#allocation2 + $0x88] sm:$0xff]  ;;  %v10705_v43 = vld [vmem:[%s14531_s5 + $0xf4] ss:$8 sps:$4 sm:$0xff]  }
 0x332   :  { %8898 = vmatprep.mubr.msk.bf16.mxu1 %vm5306_vm4, %v5877_v35  ;;  %v13712_v26 = vpop.permute.xlu1 %5248  ;;  %v5567_v8 = vpack.c.bf16 %v5539_v13, %v5537_v59  ;;  %v10700_v21 = vld [vmem:[%s14531_s5 + $0xe0] ss:$8 sps:$4 sm:$0xff]   ;;  %v10702_v33 = vld [vmem:[%s14531_s5 + $0xe4] ss:$8 sps:$4 sm:$0xff]   ;;  %v5570_v2 = vpack.c.bf16 %v5544_v1, %v5542_v62  ;;  %v10673_v42 = vld [vmem:[%s14529_s3 + $0x1b0] ss:$8 sps:$4 sm:$0xff]  }
 0x333   :  { %5358 = vst.msk [vmem:[#allocation4 + $0x38] sm:$0xff] %vm5306_vm4, %v13712_v26  ;;  %7430 = vmatprep.subr.bf16.mxu0 %v10702_v33  ;;  %v10678_v18 = vld [vmem:[%s14529_s3 + $0x1c4] ss:$8 sps:$4 sm:$0xff]   ;;  %v10703_v34 = vld [vmem:[%s14531_s5 + $0xf0] ss:$8 sps:$4 sm:$0xff]  }
 0x334   :  { %7431 = vmatpush1.bf16.msra.mxu0 %v10700_v21  ;;  %v5543_v63 = vld [vmem:[#allocation2 + $0xa0] sm:$0xff]  ;;  %v5548_v36 = vld [vmem:[#allocation2 + $0xe8] sm:$0xff]  ;;  %v10681_v49 = vld [vmem:[%s14529_s3 + $0x1d4] ss:$8 sps:$4 sm:$0xff]  }
 0x335   :  { %7432 = vmatprep.subr.bf16.mxu0 %v10705_v43  ;;  %v10708_v28 = vld [vmem:[%s14531_s5 + $0x104] ss:$8 sps:$4 sm:$0xff]   ;;  %v10676_v54 = vld [vmem:[%s14529_s3 + $0x1c0] ss:$8 sps:$4 sm:$0xff]   ;;  %v10711_v32 = vld [vmem:[%s14531_s5 + $0x114] ss:$8 sps:$4 sm:$0xff]  }
 0x336   :  { %v5541_v15 = vld [vmem:[#allocation2 + $0x80] sm:$0xff]  ;;  %v5546_v37 = vld [vmem:[#allocation2 + $0xc8] sm:$0xff]  ;;  %v10679_v56 = vld [vmem:[%s14529_s3 + $0x1d0] ss:$8 sps:$4 sm:$0xff]  }
 0x337   :  { %6150 = vmatmul.mubr.bf16.gmra.mrb[28].mxu1 %v5876_v17  ;;  %v5569_v41 = vpack.c.bf16 %v5543_v63, %v5541_v15  ;;  %v10706_v53 = vld [vmem:[%s14531_s5 + $0x100] ss:$8 sps:$4 sm:$0xff]   ;;  %v5572_v40 = vpack.c.bf16 %v5548_v36, %v5546_v37  ;;  %v10684_v48 = vld [vmem:[%s14529_s3 + $0x1e4] ss:$8 sps:$4 sm:$0xff]   ;;  %v10709_v47 = vld [vmem:[%s14531_s5 + $0x110] ss:$8 sps:$4 sm:$0xff]  }
 0x338   :  { %8923 = vmatprep.mubr.msk.bf16.mxu1 %vm5306_vm4, %v5566_v39  ;;  %v13726_v10 = vpop.permute.xlu1 %5252  ;;  %7433 = vmatpush1.bf16.msra.mxu0 %v10703_v34  ;;  %v5547_v11 = vld [vmem:[#allocation2 + $0xe0] sm:$0xff]  ;;  %v5552_v14 = vld [vmem:[#allocation2 + $0x128] sm:$0xff]  ;;  %v10687_v52 = vld [vmem:[%s14529_s3 + $0x1f4] ss:$8 sps:$4 sm:$0xff]  }
 0x339   :  { %5360 = vst.msk [vmem:[#allocation4 + $0x58] sm:$0xff] %vm5306_vm4, %v13726_v10  ;;  %7434 = vmatprep.subr.bf16.mxu0 %v10708_v28  ;;  %v10714_v7 = vld [vmem:[%s14531_s5 + $0x124] ss:$8 sps:$4 sm:$0xff]   ;;  %v10682_v35 = vld [vmem:[%s14529_s3 + $0x1e0] ss:$8 sps:$4 sm:$0xff]  }
 0x33a   :  { %v5545_v20 = vld [vmem:[#allocation2 + $0xc0] sm:$0xff]  ;;  %v5550_v3 = vld [vmem:[#allocation2 + $0x108] sm:$0xff]  ;;  %v10717_v9 = vld [vmem:[%s14531_s5 + $0x134] ss:$8 sps:$4 sm:$0xff]  }
 0x33b   :  { %v5571_v57 = vpack.c.bf16 %v5547_v11, %v5545_v20  ;;  %v10712_v31 = vld [vmem:[%s14531_s5 + $0x120] ss:$8 sps:$4 sm:$0xff]   ;;  %v5574_v19 = vpack.c.bf16 %v5552_v14, %v5550_v3  ;;  %v10685_v45 = vld [vmem:[%s14529_s3 + $0x1f0] ss:$8 sps:$4 sm:$0xff]   ;;  %v10690_v61 = vld [vmem:[%s14529_s3 + $0x204] ss:$8 sps:$4 sm:$0xff]  }
 0x33c   :  { %v13745_v44 = vpop.permute.xlu1 %5256  ;;  %7435 = vmatpush1.bf16.msra.mxu0 %v10706_v53  ;;  %v10715_v39 = vld [vmem:[%s14531_s5 + $0x130] ss:$8 sps:$4 sm:$0xff]   ;;  %v5551_v50 = vld [vmem:[#allocation2 + $0x120] sm:$0xff]  ;;  %v5556_v4 = vld [vmem:[#allocation2 + $0x168] sm:$0xff] }
 0x33d   :  { %5362 = vst.msk [vmem:[#allocation4 + $0x78] sm:$0xff] %vm5306_vm4, %v13745_v44  ;;  %7436 = vmatprep.subr.bf16.mxu0 %v10711_v32  ;;  %v10720_v22 = vld [vmem:[%s14531_s5 + $0x144] ss:$8 sps:$4 sm:$0xff]   ;;  %v10688_v51 = vld [vmem:[%s14529_s3 + $0x200] ss:$8 sps:$4 sm:$0xff]  }
 0x33e   :  { %v10721_v62 = vld [vmem:[%s14531_s5 + $0x150] ss:$8 sps:$4 sm:$0xff]   ;;  %v5555_v21 = vld [vmem:[#allocation2 + $0x160] sm:$0xff]  ;;  %v5558_v34 = vld [vmem:[#allocation2 + $0x188] sm:$0xff] }
 0x33f   :  { %6337 = vmatmul.mubr.bf16.vlgmr.msra.gmra.mrb[0].mxu1 %v5565_v24  ;;  %v10726_v33 = vld [vmem:[%s14531_s5 + $0x164] ss:$8 sps:$4 sm:$0xff]   ;;  %v10699_v63 = vld [vmem:[%s14529_s3 + $0x234] ss:$8 sps:$4 sm:$0xff]   ;;  %v10724_v28 = vld [vmem:[%s14531_s5 + $0x160] ss:$8 sps:$4 sm:$0xff]  }
 0x340   :  { %8924 = vmatprep.mubr.msk.bf16.mxu1 %vm5306_vm4, %v5568_v23  ;;  %6860 = vmatpush1.bf16.msra.mxu1 %v10664_v55  ;;  %v13762_v58 = vpop.permute.xlu1 %5260  ;;  %v5554_v23 = vld [vmem:[#allocation2 + $0x148] sm:$0xff]  ;;  %v10727_v53 = vld [vmem:[%s14531_s5 + $0x170] ss:$8 sps:$4 sm:$0xff]  }
 0x341   :  { %6861 = vmatprep.subr.bf16.mxu1 %v10669_v25  ;;  %5364 = vst.msk [vmem:[#allocation4 + $0x98] sm:$0xff] %vm5306_vm4, %v13762_v58  ;;  %7437 = vmatpush1.bf16.msra.mxu0 %v10709_v47  ;;  %v5576_v13 = vpack.c.bf16 %v5556_v4, %v5554_v23  ;;  %v5557_v47 = vld [vmem:[#allocation2 + $0x180] sm:$0xff]  ;;  %v6422_v11 = vld [vmem:[#allocation2 + $0x28] sm:$0xfc] }
 0x342   :  { %7438 = vmatprep.subr.bf16.mxu0 %v10714_v7  ;;  %v6424_v7 = vld [vmem:[#allocation2 + $0x38] sm:$0x3]  ;;  %v5562_v20 = vld [vmem:[#allocation2 + $0x1c8] sm:$0xff] }
 0x343   :  { %v6418_v3 = vld [vmem:[#allocation2 + $0x8] sm:$0xfc] }
 0x344   :  { %6862 = vmatpush1.bf16.msra.mxu1 %v10667_v60  ;;  %v13778_v38 = vpop.permute.xlu1 %5264  ;;  %v10693_v60 = vld [vmem:[%s14529_s3 + $0x214] ss:$8 sps:$4 sm:$0xff]  }
 0x345   :  { %6863 = vmatprep.subr.bf16.mxu1 %v10672_v12  ;;  %5366 = vst.msk [vmem:[#allocation4 + $0xb8] sm:$0xff] %vm5306_vm4, %v13778_v38  ;;  %7439 = vmatpush1.bf16.msra.mxu0 %v10712_v31  ;;  %v10718_v12 = vld [vmem:[%s14531_s5 + $0x140] ss:$8 sps:$4 sm:$0xff]  }
 0x346   :  { %7440 = vmatprep.subr.bf16.mxu0 %v10717_v9  ;;  %v6556_v9 = vrot.slane %v6424_v7, 2  ;;  %v6434_v7 = vld [vmem:[#allocation2 + $0x88] sm:$0xfc] }
 0x347   :  { %6347 = vmatmul.mubr.bf16.gmra.mrb[4].mxu1 %v5567_v8  ;;  %v10696_v8 = vld [vmem:[%s14529_s3 + $0x224] ss:$8 sps:$4 sm:$0xff]  }
 0x348   :  { %8925 = vmatprep.mubr.msk.bf16.mxu1 %vm5306_vm4, %v5570_v2  ;;  %6864 = vmatpush1.bf16.msra.mxu1 %v10670_v46  ;;  %v13795_v27 = vpop.permute.xlu1 %5268  ;;  %v10691_v46 = vld [vmem:[%s14529_s3 + $0x210] ss:$8 sps:$4 sm:$0xff]   ;;  %v5560_v2 = vld [vmem:[#allocation2 + $0x1a8] sm:$0xff] }
 0x349   :  { %6865 = vmatprep.subr.bf16.mxu1 %v10675_v30  ;;  %5368 = vst.msk [vmem:[#allocation4 + $0xd8] sm:$0xff] %vm5306_vm4, %v13795_v27  ;;  %7441 = vmatpush1.bf16.msra.mxu0 %v10715_v39  ;;  %v5578_v36 = vpack.c.bf16 %v5560_v2, %v5558_v34  ;;  %v6421_v39 = vld [vmem:[#allocation2 + $0x20] sm:$0xfc] }
 0x34a   :  { %7442 = vmatprep.subr.bf16.mxu0 %v10720_v22 }
 0x34c   :  { %6866 = vmatpush1.bf16.msra.mxu1 %v10673_v42  ;;  %v13811_v0 = vpop.permute.xlu1 %5272  ;;  %v10694_v42 = vld [vmem:[%s14529_s3 + $0x220] ss:$8 sps:$4 sm:$0xff]  }
 0x34d   :  { %6867 = vmatprep.subr.bf16.mxu1 %v10678_v18  ;;  %5370 = vst.msk [vmem:[#allocation4 + $0xf8] sm:$0xff] %vm5306_vm4, %v13811_v0  ;;  %v5243_v29 = vpop.permute.xlu0 %5242  ;;  %7443 = vmatpush1.bf16.msra.mxu0 %v10718_v12  ;;  %v6552_v12 = vrot.slane %v6421_v39, 2  ;;  %v6439_v39 = vld [vmem:[#allocation2 + $0xb0] sm:$0x3] }
 0x34e   :  { %v5307_v17 = vsel %vm5306_vm4, %v5243_v29, %v13705_v16  ;;  %v5549_v16 = vld [vmem:[#allocation2 + $0x100] sm:$0xff]  ;;  %v6549_v29 = vrot.slane %v6418_v3, 2 }
 0x34f   :  { %6357 = vmatmul.mubr.bf16.gmra.mrb[8].mxu1 %v5569_v41  ;;  %5355 = vst [vmem:[#allocation4 + $0x10] sm:$0xff] %v5307_v17  ;;  %v5573_v25 = vpack.c.bf16 %v5551_v50, %v5549_v16  ;;  %v6423_v50 = vld [vmem:[#allocation2 + $0x30] sm:$0x3]  ;;  %v6430_v16 = vld [vmem:[#allocation2 + $0x68] sm:$0xfc] }
 0x350   :  { %8926 = vmatprep.mubr.msk.bf16.mxu1 %vm5306_vm4, %v5572_v40  ;;  %6868 = vmatpush1.bf16.msra.mxu1 %v10676_v54  ;;  %v5247_v55 = vpop.permute.xlu1 %5246  ;;  %v10729_v54 = vld [vmem:[%s14531_s5 + $0x174] ss:$8 sps:$4 sm:$0xff]   ;;  %v5559_v40 = vld [vmem:[#allocation2 + $0x1a0] sm:$0xff] }
 0x351   :  { %6869 = vmatprep.subr.bf16.mxu1 %v10681_v49  ;;  %v5308_v24 = vsel %vm5306_vm4, %v5247_v55, %v13712_v26  ;;  %v10723_v26 = vld [vmem:[%s14531_s5 + $0x154] ss:$8 sps:$4 sm:$0xff]   ;;  %v10697_v49 = vld [vmem:[%s14529_s3 + $0x230] ss:$8 sps:$4 sm:$0xff]   ;;  %v5577_v14 = vpack.c.bf16 %v5559_v40, %v5557_v47  ;;  %v5561_v55 = vld [vmem:[#allocation2 + $0x1c0] sm:$0xff] }
 0x352   :  { %5357 = vst [vmem:[#allocation4 + $0x30] sm:$0xff] %v5308_v24  ;;  %7444 = vmatprep.subr.bf16.mxu0 %v10723_v26  ;;  %v6432_v24 = vld [vmem:[#allocation2 + $0x78] sm:$0x3]  ;;  %v6425_v40 = vld [vmem:[#allocation2 + $0x40] sm:$0xfc] }
 0x353   :  { %7445 = vmatpush1.bf16.msra.mxu0 %v10721_v62  ;;  %v6567_v62 = vrot.slane %v6430_v16, 2  ;;  %v6558_v3 = vrot.slane %v6425_v40, 2  ;;  %v6433_v16 = vld [vmem:[#allocation2 + $0x80] sm:$0xfc]  ;;  %v6450_v40 = vld [vmem:[#allocation2 + $0x108] sm:$0xfc] }
 0x354   :  { %6870 = vmatpush1.bf16.msra.mxu1 %v10679_v56  ;;  %v13844_v1 = vpop.permute.xlu1 %5276  ;;  %7446 = vmatprep.subr.bf16.mxu0 %v10726_v33  ;;  %v5564_v56 = vld [vmem:[#allocation2 + $0x1e8] sm:$0xff] }
 0x355   :  { %6871 = vmatprep.subr.bf16.mxu1 %v10684_v48  ;;  %5372 = vst.msk [vmem:[#allocation4 + $0x118] sm:$0xff] %vm5306_vm4, %v13844_v1  ;;  %v5251_v59 = vpop.permute.xlu0 %5250 }
 0x356   :  { %v5309_v30 = vsel %vm5306_vm4, %v5251_v59, %v13726_v10  ;;  %v5553_v10 = vld [vmem:[#allocation2 + $0x140] sm:$0xff]  ;;  %v6426_v59 = vld [vmem:[#allocation2 + $0x48] sm:$0xfc] }
 0x357   :  { %6367 = vmatmul.mubr.bf16.gmra.mrb[12].mxu1 %v5571_v57  ;;  %5359 = vst [vmem:[#allocation4 + $0x50] sm:$0xff] %v5309_v30  ;;  %v5575_v18 = vpack.c.bf16 %v5555_v21, %v5553_v10  ;;  %7447 = vmatpush1.bf16.msra.mxu0 %v10724_v28  ;;  %v6568_v21 = vrot.slane %v6432_v24, 2  ;;  %v6561_v10 = vrot.slane %v6426_v59, 2  ;;  %v6435_v24 = vld [vmem:[#allocation2 + $0x90] sm:$0x3]  ;;  %v6570_v59 = vrot.slane %v6433_v16, 2 }
 0x358   :  { %8927 = vmatprep.mubr.msk.bf16.mxu1 %vm5306_vm4, %v5574_v19  ;;  %6872 = vmatpush1.bf16.msra.mxu1 %v10682_v35  ;;  %v13863_v43 = vpop.permute.xlu1 %5280  ;;  %v5580_v35 = vpack.c.bf16 %v5564_v56, %v5562_v20  ;;  %v6555_v19 = vrot.slane %v6422_v11, 2 }
 0x359   :  { %6873 = vmatprep.subr.bf16.mxu1 %v10687_v52  ;;  %5374 = vst.msk [vmem:[#allocation4 + $0x138] sm:$0xff] %vm5306_vm4, %v13863_v43  ;;  %v5255_v15 = vpop.permute.xlu0 %5254  ;;  %7448 = vmatprep.subr.bf16.mxu0 %v10729_v54  ;;  %v6420_v52 = vld [vmem:[#allocation2 + $0x18] sm:$0x3] }
 0x35a   :  { %v5310_v41 = vsel %vm5306_vm4, %v5255_v15, %v13745_v44  ;;  %v6557_v22 = vsel %vm6545_vm5, %v6555_v19, %v6556_v9  ;;  %v6431_v15 = vld [vmem:[#allocation2 + $0x70] sm:$0x3] }
 0x35b   :  { %5361 = vst [vmem:[#allocation4 + $0x70] sm:$0xff] %v5310_v41  ;;  %7449 = vmatpush1.bf16.msra.mxu0 %v10727_v53  ;;  %v6438_v41 = vld [vmem:[#allocation2 + $0xa8] sm:$0xfc]  ;;  %v6565_v11 = vrot.slane %v6431_v15, 2  ;;  %v6441_v15 = vld [vmem:[#allocation2 + $0xc0] sm:$0xfc] }
 0x35c   :  { %6874 = vmatpush1.bf16.msra.mxu1 %v10685_v45  ;;  %v13881_v37 = vpop.permute.xlu1 %5284  ;;  %v6550_v45 = vrot.slane %v6420_v52, 2 }
 0x35d   :  { %6875 = vmatprep.subr.bf16.mxu1 %v10690_v61  ;;  %5376 = vst.msk [vmem:[#allocation4 + $0x158] sm:$0xff] %vm5306_vm4, %v13881_v37  ;;  %v5563_v61 = vld [vmem:[#allocation2 + $0x1e0] sm:$0xff] }
 0x35e   :  { %v5579_v23 = vpack.c.bf16 %v5563_v61, %v5561_v55  ;;  %v6437_v61 = vld [vmem:[#allocation2 + $0xa0] sm:$0xfc] }
 0x35f   :  { %6377 = vmatmul.mubr.bf16.gmra.mrb[16].mxu1 %v5573_v25  ;;  %v5259_v44 = vpop.permute.xlu0 %5258  ;;  %v6419_v25 = vld [vmem:[#allocation2 + $0x10] sm:$0x3] }
 0x360   :  { %8928 = vmatprep.mubr.msk.bf16.mxu1 %vm5306_vm4, %v5576_v13  ;;  %6876 = vmatpush1.bf16.msra.mxu1 %v10688_v51  ;;  %v5311_v32 = vsel %vm5306_vm4, %v5259_v44, %v13762_v58  ;;  %v13894_v48 = vpop.permute.xlu1 %5288  ;;  %v6417_v51 = vld [vmem:[#allocation2] sm:$0xfc]  ;;  %v6553_v13 = vrot.slane %v6423_v50, 2  ;;  %v6547_v2 = vrot.slane %v6419_v25, 2  ;;  %v6446_v50 = vld [vmem:[#allocation2 + $0xe8] sm:$0xfc] }
 0x361   :  { %6877 = vmatprep.subr.bf16.mxu1 %v10693_v60  ;;  %5363 = vst [vmem:[#allocation4 + $0x90] sm:$0xff] %v5311_v32  ;;  %5378 = vst.msk [vmem:[#allocation4 + $0x178] sm:$0xff] %vm5306_vm4, %v13894_v48  ;;  %v6551_v60 = vsel %vm6545_vm5, %v6549_v29, %v6550_v45  ;;  %v6546_v33 = vrot.slane %v6417_v51, 2  ;;  %v6427_v32 = vld [vmem:[#allocation2 + $0x50] sm:$0x3] }
 0x362   :  { %v6675_v26 = vpack.c.bf16 %v6557_v22, %v6551_v60  ;;  %v6559_v52 = vrot.slane %v6427_v32, 2  ;;  %v6577_v60 = vrot.slane %v6439_v39, 2 }
 0x363   :  { %v5263_v57 = vpop.permute.xlu0 %5262  ;;  %v6548_v54 = vsel %vm6545_vm5, %v6546_v33, %v6547_v2 }
 0x364   :  { %6878 = vmatpush1.bf16.msra.mxu1 %v10691_v46  ;;  %v5312_v58 = vsel %vm5306_vm4, %v5263_v57, %v13778_v38  ;;  %v13900_v31 = vpop.permute.xlu1 %5292  ;;  %v6428_v46 = vld [vmem:[#allocation2 + $0x58] sm:$0x3] }
 0x365   :  { %6879 = vmatprep.subr.bf16.mxu1 %v10696_v8  ;;  %5365 = vst [vmem:[#allocation4 + $0xb0] sm:$0xff] %v5312_v58  ;;  %5380 = vst.msk [vmem:[#allocation4 + $0x198] sm:$0xff] %vm5306_vm4, %v13900_v31  ;;  %v6573_v58 = vrot.slane %v6434_v7, 2  ;;  %v6597_v7 = vrot.slane %v6450_v40, 2  ;;  %v6478_v40 = vld [vmem:[#allocation2 + $0x1e8] sm:$0xfc] }
 0x367   :  { %6387 = vmatmul.mubr.bf16.gmra.mrb[20].mxu1 %v5575_v18  ;;  %v5267_v17 = vpop.permute.xlu0 %5266  ;;  %v6554_v18 = vsel %vm6545_vm5, %v6552_v12, %v6553_v13  ;;  %v6442_v12 = vld [vmem:[#allocation2 + $0xc8] sm:$0xfc] }
 0x368   :  { %8929 = vmatprep.mubr.msk.bf16.mxu1 %vm5306_vm4, %v5578_v36  ;;  %6880 = vmatpush1.bf16.msra.mxu1 %v10694_v42  ;;  %v5313_v38 = vsel %vm5306_vm4, %v5267_v17, %v13795_v27  ;;  %v13908_v4 = vpop.permute.xlu1 %5296  ;;  %v6562_v42 = vrot.slane %v6428_v46, 2  ;;  %v6429_v36 = vld [vmem:[#allocation2 + $0x60] sm:$0xfc]  ;;  %v6674_v53 = vpack.c.bf16 %v6554_v18, %v6548_v54  ;;  %v6571_v46 = vrot.slane %v6435_v24, 2  ;;  %v6447_v18 = vld [vmem:[#allocation2 + $0xf0] sm:$0x3] }
 0x369   :  { %6881 = vmatprep.subr.bf16.mxu1 %v10699_v63  ;;  %5367 = vst [vmem:[#allocation4 + $0xd0] sm:$0xff] %v5313_v38  ;;  %5382 = vst.msk [vmem:[#allocation4 + $0x1b8] sm:$0xff] %vm5306_vm4, %v13908_v4  ;;  %v6569_v63 = vsel %vm6545_vm5, %v6567_v62, %v6568_v21  ;;  %v6564_v47 = vrot.slane %v6429_v36, 2  ;;  %v6448_v38 = vld [vmem:[#allocation2 + $0xf8] sm:$0x3] }
 0x36a   :  { %v6563_v44 = vsel %vm6545_vm5, %v6561_v10, %v6562_v42  ;;  %v6445_v42 = vld [vmem:[#allocation2 + $0xe0] sm:$0xfc]  ;;  %v6443_v54 = vld [vmem:[#allocation2 + $0xd0] sm:$0x3] }
 0x36b   :  { %v5271_v27 = vpop.permute.xlu0 %5270  ;;  %v6566_v29 = vsel %vm6545_vm5, %v6564_v47, %v6565_v11  ;;  %v6582_v47 = vrot.slane %v6441_v15, 2  ;;  %v6583_v11 = vrot.slane %v6443_v54, 2 }
 0x36c   :  { %6882 = vmatpush1.bf16.msra.mxu1 %v10697_v49  ;;  %v5314_v30 = vsel %vm5306_vm4, %v5271_v27, %v13811_v0  ;;  %v13915_v8 = vpop.permute.xlu1 %5300  ;;  %v6440_v49 = vld [vmem:[#allocation2 + $0xb8] sm:$0x3]  ;;  %v6592_v27 = vrot.slane %v6448_v38, 2 }
 0x36d   :  { %5369 = vst [vmem:[#allocation4 + $0xf0] sm:$0xff] %v5314_v30  ;;  %5384 = vst.msk [vmem:[#allocation4 + $0x1d8] sm:$0xff] %vm5306_vm4, %v13915_v8  ;;  %v6580_v57 = vrot.slane %v6440_v49, 2  ;;  %v6585_v30 = vrot.slane %v6442_v12, 2 }
 0x36f   :  { %6397 = vmatmul.mubr.bf16.gmra.mrb[24].mxu1 %v5577_v14  ;;  %v6436_v14 = vld [vmem:[#allocation2 + $0x98] sm:$0x3] }
 0x370   :  { %8930 = vmatprep.mubr.msk.bf16.mxu1 %vm5306_vm4, %v5580_v35  ;;  %v13924_v28 = vpop.permute.xlu1 %5304  ;;  %v6579_v35 = vrot.slane %v6438_v41, 2  ;;  %v6574_v19 = vrot.slane %v6436_v14, 2 }
 0x371   :  { %5386 = vst.msk [vmem:[#allocation4 + $0x1f8] sm:$0xff] %vm5306_vm4, %v13924_v28 }
 0x372   :  { %v6581_v17 = vsel %vm6545_vm5, %v6579_v35, %v6580_v57  ;;  %v6575_v55 = vsel %vm6545_vm5, %v6573_v58, %v6574_v19  ;;  %v6455_v58 = vld [vmem:[#allocation2 + $0x130] sm:$0x3]  ;;  %v6462_v19 = vld [vmem:[#allocation2 + $0x168] sm:$0xfc] }
 0x373   :  { %v5275_v34 = vpop.permute.xlu0 %5274  ;;  %v6679_v51 = vpack.c.bf16 %v6581_v17, %v6575_v55  ;;  %v6449_v17 = vld [vmem:[#allocation2 + $0x100] sm:$0xfc]  ;;  %v6601_v38 = vrot.slane %v6455_v58, 2  ;;  %v6615_v16 = vrot.slane %v6462_v19, 2 }
 0x374   :  { %v5315_v0 = vsel %vm5306_vm4, %v5275_v34, %v13844_v1  ;;  %v6677_v1 = vpack.c.bf16 %v6569_v63, %v6563_v44  ;;  %v6454_v34 = vld [vmem:[#allocation2 + $0x128] sm:$0xfc]  ;;  %v6589_v44 = vrot.slane %v6447_v18, 2  ;;  %v6468_v18 = vld [vmem:[#allocation2 + $0x198] sm:$0x3] }
 0x375   :  { %5371 = vst [vmem:[#allocation4 + $0x110] sm:$0xff] %v5315_v0  ;;  %v6456_v0 = vld [vmem:[#allocation2 + $0x138] sm:$0x3]  ;;  %v6622_v15 = vrot.slane %v6468_v18, 2 }
 0x376   :  { %v14053_v18 = vld [vmem:[%s14531_s5 + $0x1f0] ss:$8 sps:$4 sm:$0xff]  }
 0x377   :  { %6407 = vmatmul.mubr.bf16.gmra.mrb[28].mxu1 %v5579_v23  ;;  %v5279_v56 = vpop.permute.xlu0 %5278  ;;  %v6576_v23 = vrot.slane %v6437_v61, 2  ;;  %v6451_v61 = vld [vmem:[#allocation2 + $0x110] sm:$0x3] }
 0x378   :  { %8979 = vmatprep.mubr.msk.bf16.mxu1 %vm5306_vm4, %v6675_v26  ;;  %v5316_v20 = vsel %vm5306_vm4, %v5279_v56, %v13863_v43  ;;  %v6560_v43 = vsel %vm6545_vm5, %v6558_v3, %v6559_v52  ;;  %v6591_v26 = vrot.slane %v6446_v50, 2  ;;  %v6604_v56 = vrot.slane %v6456_v0, 2  ;;  %v6453_v52 = vld [vmem:[#allocation2 + $0x120] sm:$0xfc] }
 0x379   :  { %5373 = vst [vmem:[#allocation4 + $0x130] sm:$0xff] %v5316_v20  ;;  %v6676_v22 = vpack.c.bf16 %v6566_v29, %v6560_v43  ;;  %v6578_v33 = vsel %vm6545_vm5, %v6576_v23, %v6577_v60  ;;  %v6600_v50 = vrot.slane %v6453_v52, 2 }
 0x37a   :  { %v6593_v10 = vsel %vm6545_vm5, %v6591_v26, %v6592_v27  ;;  %v6463_v26 = vld [vmem:[#allocation2 + $0x170] sm:$0x3] }
 0x37b   :  { %v6602_v12 = vsel %vm6545_vm5, %v6600_v50, %v6601_v38  ;;  %v6473_v50 = vld [vmem:[#allocation2 + $0x1c0] sm:$0xfc]  ;;  %v6475_v38 = vld [vmem:[#allocation2 + $0x1d0] sm:$0x3] }
 0x37d   :  { %v5283_v9 = vpop.permute.xlu0 %5282 }
 0x37e   :  { %v5317_v45 = vsel %vm5306_vm4, %v5283_v9, %v13881_v37  ;;  %v6444_v37 = vld [vmem:[#allocation2 + $0xd8] sm:$0x3] }
 0x37f   :  { %6892 = vmatmul.mubr.bf16.vlgmr.msra.gmra.mrb[0].mxu1 %v6674_v53  ;;  %5375 = vst [vmem:[#allocation4 + $0x150] sm:$0xff] %v5317_v45  ;;  %v6586_v62 = vrot.slane %v6444_v37, 2  ;;  %v6588_v53 = vrot.slane %v6445_v42, 2  ;;  %v6464_v9 = vld [vmem:[#allocation2 + $0x178] sm:$0x3] }
 0x380   :  { %8980 = vmatprep.mubr.msk.bf16.mxu1 %vm5306_vm4, %v6677_v1  ;;  %v6603_v1 = vrot.slane %v6454_v34, 2  ;;  %v6616_v24 = vrot.slane %v6464_v9, 2  ;;  %v6466_v42 = vld [vmem:[#allocation2 + $0x188] sm:$0xfc] }
 0x381   :  { %v5287_v25 = vpop.permute.xlu0 %5286  ;;  %v6587_v36 = vsel %vm6545_vm5, %v6585_v30, %v6586_v62  ;;  %v6590_v35 = vsel %vm6545_vm5, %v6588_v53, %v6589_v44  ;;  %v6457_v62 = vld [vmem:[#allocation2 + $0x140] sm:$0xfc]  ;;  %v6471_v53 = vld [vmem:[#allocation2 + $0x1b0] sm:$0x3] }
 0x382   :  { %v5318_v13 = vsel %vm5306_vm4, %v5287_v25, %v13894_v48  ;;  %v6572_v48 = vsel %vm6545_vm5, %v6570_v59, %v6571_v46  ;;  %v6681_v41 = vpack.c.bf16 %v6593_v10, %v6587_v36  ;;  %v6605_v3 = vsel %vm6545_vm5, %v6603_v1, %v6604_v56  ;;  %v6470_v59 = vld [vmem:[#allocation2 + $0x1a8] sm:$0xfc]  ;;  %v6472_v46 = vld [vmem:[#allocation2 + $0x1b8] sm:$0x3]  ;;  %v6465_v56 = vld [vmem:[#allocation2 + $0x180] sm:$0xfc] }
 0x383   :  { %5377 = vst [vmem:[#allocation4 + $0x170] sm:$0xff] %v5318_v13  ;;  %v6678_v63 = vpack.c.bf16 %v6578_v33, %v6572_v48  ;;  %v6595_v25 = vrot.slane %v6451_v61, 2  ;;  %v6617_v37 = vsel %vm6545_vm5, %v6615_v16, %v6616_v24  ;;  %v6461_v13 = vld [vmem:[#allocation2 + $0x160] sm:$0xfc]  ;;  %v6613_v10 = vrot.slane %v6463_v26, 2 }
 0x384   :  { %v6627_v48 = vrot.slane %v6470_v59, 2  ;;  %v6628_v34 = vrot.slane %v6472_v46, 2  ;;  %v6606_v0 = vrot.slane %v6457_v62, 2  ;;  %v6621_v36 = vrot.slane %v6466_v42, 2  ;;  %v10733_v26 = vld [vmem:[%s14531_s5 + $0x190] ss:$8 sps:$4 sm:$0xff]  }
 0x385   :  { %v6618_v52 = vrot.slane %v6465_v56, 2  ;;  %v6630_v16 = vrot.slane %v6473_v50, 2  ;;  %v6631_v24 = vrot.slane %v6475_v38, 2  ;;  %v10738_v59 = vld [vmem:[%s14531_s5 + $0x1a4] ss:$8 sps:$4 sm:$0xff]  }
 0x386   :  { %v6623_v1 = vsel %vm6545_vm5, %v6621_v36, %v6622_v15  ;;  %v10741_v46 = vld [vmem:[%s14531_s5 + $0x1b4] ss:$8 sps:$4 sm:$0xff]   ;;  %v14019_v62 = vld [vmem:[%s14531_s5 + $0x1c4] ss:$8 sps:$4 sm:$0xff]   ;;  %v14082_v36 = vld [vmem:[%s14531_s5 + $0x210] ss:$8 sps:$4 sm:$0xff]  }
 0x387   :  { %6902 = vmatmul.mubr.bf16.gmra.mrb[4].mxu1 %v6676_v22  ;;  %v5291_v21 = vpop.permute.xlu0 %5290  ;;  %v6458_v22 = vld [vmem:[#allocation2 + $0x148] sm:$0xfc]  ;;  %9663 = vmatprep.subr.bf16.mxu1 %v14019_v62  ;;  %v14148_v56 = vld [vmem:[%s14531_s5 + $0x274] ss:$8 sps:$4 sm:$0xff]  }
 0x388   :  { %8981 = vmatprep.mubr.msk.bf16.mxu1 %vm5306_vm4, %v6679_v51  ;;  %v5319_v2 = vsel %vm5306_vm4, %v5291_v21, %v13900_v31  ;;  %v6452_v31 = vld [vmem:[#allocation2 + $0x118] sm:$0x3]  ;;  %v6594_v51 = vrot.slane %v6449_v17, 2  ;;  %v6609_v23 = vrot.slane %v6458_v22, 2  ;;  %v6459_v21 = vld [vmem:[#allocation2 + $0x150] sm:$0x3] }
 0x389   :  { %5379 = vst [vmem:[#allocation4 + $0x190] sm:$0xff] %v5319_v2  ;;  %v6598_v14 = vrot.slane %v6452_v31, 2  ;;  %v6612_v2 = vrot.slane %v6461_v13, 2  ;;  %v6480_v31 = vld [vmem:[#allocation2 + $0x1f8] sm:$0x3] }
 0x38a   :  { %v6596_v27 = vsel %vm6545_vm5, %v6594_v51, %v6595_v25  ;;  %v6479_v17 = vld [vmem:[#allocation2 + $0x1f0] sm:$0x3]  ;;  %v6632_v25 = vsel %vm6545_vm5, %v6630_v16, %v6631_v24  ;;  %v10735_v13 = vld [vmem:[%s14531_s5 + $0x194] ss:$8 sps:$4 sm:$0xff]   ;;  %v14046_v42 = vld [vmem:[%s14531_s5 + $0x1e4] ss:$8 sps:$4 sm:$0xff]  }
 0x38b   :  { %v5295_v49 = vpop.permute.xlu0 %5294  ;;  %v6599_v45 = vsel %vm6545_vm5, %v6597_v7, %v6598_v14  ;;  %v6614_v54 = vsel %vm6545_vm5, %v6612_v2, %v6613_v10  ;;  %v6625_v14 = vrot.slane %v6471_v53, 2  ;;  %v14034_v2 = vld [vmem:[%s14531_s5 + $0x1d4] ss:$8 sps:$4 sm:$0xff]   ;;  %v14041_v10 = vld [vmem:[%s14531_s5 + $0x1e0] ss:$8 sps:$4 sm:$0xff]  }
 0x38c   :  { %v5320_v32 = vsel %vm5306_vm4, %v5295_v49, %v13908_v4  ;;  %v6584_v4 = vsel %vm6545_vm5, %v6582_v47, %v6583_v11  ;;  %v6683_v39 = vpack.c.bf16 %v6605_v3, %v6599_v45  ;;  %v6469_v49 = vld [vmem:[#allocation2 + $0x1a0] sm:$0xfc]  ;;  %v6467_v47 = vld [vmem:[#allocation2 + $0x190] sm:$0x3]  ;;  %v6640_v3 = vrot.slane %v6480_v31, 2 }
 0x38d   :  { %5381 = vst [vmem:[#allocation4 + $0x1b0] sm:$0xff] %v5320_v32  ;;  %v6680_v29 = vpack.c.bf16 %v6590_v35, %v6584_v4  ;;  %v6624_v7 = vrot.slane %v6469_v49, 2  ;;  %v6476_v35 = vld [vmem:[#allocation2 + $0x1d8] sm:$0x3]  ;;  %v6619_v58 = vrot.slane %v6467_v47, 2 }
 0x38e   :  { %v6634_v19 = vrot.slane %v6476_v35, 2  ;;  %v6477_v45 = vld [vmem:[#allocation2 + $0x1e0] sm:$0xfc]  ;;  %v14106_v49 = vld [vmem:[%s14531_s5 + $0x230] ss:$8 sps:$4 sm:$0xff]  }
 0x38f   :  { %6912 = vmatmul.mubr.bf16.gmra.mrb[8].mxu1 %v6678_v63  ;;  %v6607_v63 = vrot.slane %v6459_v21, 2  ;;  %v6626_v9 = vsel %vm6545_vm5, %v6624_v7, %v6625_v14  ;;  %v6620_v61 = vsel %vm6545_vm5, %v6618_v52, %v6619_v58  ;;  %v10747_v21 = vld [vmem:[%s14531_s5 + $0x4] ss:$8 sps:$4 sm:$0xff]   ;;  %v14089_v15 = vld [vmem:[%s14531_s5 + $0x220] ss:$8 sps:$4 sm:$0xff]  }
 0x390   :  { %8982 = vmatprep.mubr.msk.bf16.mxu1 %vm5306_vm4, %v6681_v41  ;;  %v6629_v41 = vsel %vm6545_vm5, %v6627_v48, %v6628_v34  ;;  %v14058_v48 = vld [vmem:[%s14531_s5 + $0x1f4] ss:$8 sps:$4 sm:$0xff]   ;;  %v14065_v34 = vld [vmem:[%s14531_s5 + $0x200] ss:$8 sps:$4 sm:$0xff]   ;;  %v14130_v31 = vld [vmem:[%s14531_s5 + $0x250] ss:$8 sps:$4 sm:$0xff]  }
 0x391   :  { %v5299_v20 = vpop.permute.xlu0 %5298  ;;  %v6608_v44 = vsel %vm6545_vm5, %v6606_v0, %v6607_v63  ;;  %v6687_v11 = vpack.c.bf16 %v6629_v41, %v6623_v1  ;;  %v14070_v0 = vld [vmem:[%s14531_s5 + $0x204] ss:$8 sps:$4 sm:$0xff]   ;;  %v14075_v63 = vld [vmem:[%s14531_s5 + $0x214] ss:$8 sps:$4 sm:$0xff]   ;;  %v14113_v53 = vld [vmem:[%s14531_s5 + $0x240] ss:$8 sps:$4 sm:$0xff]  }
 0x392   :  { %v5321_v57 = vsel %vm5306_vm4, %v5299_v20, %v13915_v8  ;;  %v6460_v8 = vld [vmem:[#allocation2 + $0x158] sm:$0x3]  ;;  %v6684_v32 = vpack.c.bf16 %v6614_v54, %v6608_v44  ;;  %v6474_v20 = vld [vmem:[#allocation2 + $0x1c8] sm:$0xfc]  ;;  %v14100_v41 = vld [vmem:[%s14531_s5 + $0x234] ss:$8 sps:$4 sm:$0xff]  }
 0x393   :  { %5383 = vst [vmem:[#allocation4 + $0x1d0] sm:$0xff] %v5321_v57  ;;  %v6610_v60 = vrot.slane %v6460_v8, 2  ;;  %v6639_v57 = vrot.slane %v6478_v40, 2  ;;  %v6633_v4 = vrot.slane %v6474_v20, 2  ;;  %v6636_v8 = vrot.slane %v6477_v45, 2 }
 0x394   :  { %v14094_v54 = vld [vmem:[%s14531_s5 + $0x224] ss:$8 sps:$4 sm:$0xff]   ;;  %v14124_v40 = vld [vmem:[%s14531_s5 + $0x254] ss:$8 sps:$4 sm:$0xff]   ;;  %v14154_v47 = vld [vmem:[%s14531_s5 + $0x270] ss:$8 sps:$4 sm:$0xff]  }
 0x395   :  { %v5303_v43 = vpop.permute.xlu0 %5302  ;;  %v6611_v30 = vsel %vm6545_vm5, %v6609_v23, %v6610_v60  ;;  %v13977_v60 = vld [vmem:[#allocation3] sm:$0xff]  ;;  %v14172_v14 = vld [vmem:[%s14531_s5 + $0x294] ss:$8 sps:$4 sm:$0xff]   ;;  %v14178_v20 = vld [vmem:[%s14531_s5 + $0x290] ss:$8 sps:$4 sm:$0xff]  }
 0x396   :  { %v5322_v55 = vsel %vm5306_vm4, %v5303_v43, %v13924_v28  ;;  %v6682_v28 = vpack.c.bf16 %v6602_v12, %v6596_v27  ;;  %v6685_v33 = vpack.c.bf16 %v6617_v37, %v6611_v30  ;;  %v6635_v43 = vsel %vm6545_vm5, %v6633_v4, %v6634_v19  ;;  %129 = vst.msk [vmem:[#allocation3 + $0x8] sm:$0xff] %vm128_vm6, %v13977_v60  ;;  %v10730_v12 = vld [vmem:[%s14531_s5 + $0x180] ss:$8 sps:$4 sm:$0xff]   ;;  %v10732_v37 = vld [vmem:[%s14531_s5 + $0x184] ss:$8 sps:$4 sm:$0xff]  }
 0x397   :  { %6922 = vmatmul.mubr.bf16.gmra.mrb[12].mxu1 %v6680_v29  ;;  %5385 = vst [vmem:[#allocation4 + $0x1f0] sm:$0xff] %v5322_v55  ;;  %v6641_v29 = vsel %vm6545_vm5, %v6639_v57, %v6640_v3  ;;  %v6637_v55 = vrot.slane %v6479_v17, 2  ;;  %131 = vst.msk [vmem:[#allocation3 + $0xa8] sm:$0xff] %vm128_vm6, %v13977_v60  ;;  %7450 = vmatprep.subr.bf16.mxu0 %v10732_v37  ;;  %v10736_v27 = vld [vmem:[%s14531_s5 + $0x1a0] ss:$8 sps:$4 sm:$0xff]  }
 0x398   :  { %8983 = vmatprep.mubr.msk.bf16.mxu1 %vm5306_vm4, %v6683_v39  ;;  %v6686_v39 = vpack.c.bf16 %v6626_v9, %v6620_v61  ;;  %v6689_v22 = vpack.c.bf16 %v6641_v29, %v6635_v43  ;;  %134 = vst.msk [vmem:[#allocation3 + $0x98] sm:$0xff] %vm128_vm6, %v13977_v60  ;;  %136 = vst.msk [vmem:[#allocation3 + $0x138] sm:$0xff] %vm128_vm6, %v13977_v60  ;;  %7451 = vmatpush1.bf16.msra.mxu0 %v10730_v12  ;;  %v14014_v30 = vld [vmem:[%s14531_s5 + $0x1c0] ss:$8 sps:$4 sm:$0xff]   ;;  %v14118_v44 = vld [vmem:[%s14531_s5 + $0x244] ss:$8 sps:$4 sm:$0xff]  }
 0x399   :  { %v6638_v51 = vsel %vm6545_vm5, %v6636_v8, %v6637_v55  ;;  %7452 = vmatprep.subr.bf16.mxu0 %v10735_v13  ;;  %9677 = vmatpush1.bf16.msra.mxu1 %v14014_v30  ;;  %v14142_v1 = vld [vmem:[%s14531_s5 + $0x264] ss:$8 sps:$4 sm:$0xff]   ;;  %v14166_v7 = vld [vmem:[%s14531_s5 + $0x280] ss:$8 sps:$4 sm:$0xff]   ;;  %14549 = vst [vmem:[#allocation10_spill] sm:$0xff] %v14172_v14  ;;  %14550 = vst [vmem:[#allocation11_spill] sm:$0xff] %v14178_v20 }
 0x39a   :  { %v6688_v23 = vpack.c.bf16 %v6638_v51, %v6632_v25  ;;  %9664 = vmatprep.subr.bf16.mxu1 %v14034_v2  ;;  %14548 = vst [vmem:[#allocation9_spill] sm:$0xff] %v14166_v7  ;;  %v7004_v35 = vld [vmem:[%s14530_s4] sm:$0x3] }
 0x39b   :  { %v14186_v57 = vrot.slane %v7004_v35, %v13442_v5  ;;  %v14189_v3 = vrot.slane %v7004_v35, %v13445_v6 }
 0x39c   :  { %7453 = vmatpush1.bf16.msra.mxu0 %v10733_v26 }
 0x39d   :  { %7454 = vmatprep.subr.bf16.mxu0 %v10738_v59 }
 0x39f   :  { %6932 = vmatmul.mubr.bf16.gmra.mrb[16].mxu1 %v6682_v28  ;;  %v10739_v28 = vld [vmem:[%s14531_s5 + $0x1b0] ss:$8 sps:$4 sm:$0xff]  }
 0x3a0   :  { %8984 = vmatprep.mubr.msk.bf16.mxu1 %vm5306_vm4, %v6685_v33  ;;  %7455 = vmatpush1.bf16.msra.mxu0 %v10736_v27  ;;  %v14029_v33 = vld [vmem:[%s14531_s5 + $0x1d0] ss:$8 sps:$4 sm:$0xff]  }
 0x3a1   :  { %7456 = vmatprep.subr.bf16.mxu0 %v10741_v46  ;;  %9678 = vmatpush1.bf16.msra.mxu1 %v14029_v33 }
 0x3a2   :  { %9665 = vmatprep.subr.bf16.mxu1 %v14046_v42 }
 0x3a4   :  { %7457 = vmatpush1.bf16.msra.mxu0 %v10739_v28 }
 0x3a5   :  { %7707 = vmatprep.subr.bf16.mxu0 %v10747_v21  ;;  %9679 = vmatpush1.bf16.msra.mxu1 %v14041_v10 }
 0x3a6   :  { %9666 = vmatprep.subr.bf16.mxu1 %v14058_v48 }
 0x3a7   :  { %6942 = vmatmul.mubr.bf16.gmra.mrb[20].mxu1 %v6684_v32  ;;  %v14137_v32 = vld [vmem:[%s14531_s5 + $0x260] ss:$8 sps:$4 sm:$0xff]  }
 0x3a8   :  { %8985 = vmatprep.mubr.msk.bf16.mxu1 %vm5306_vm4, %v6687_v11  ;;  %v14160_v11 = vld [vmem:[%s14531_s5 + $0x284] ss:$8 sps:$4 sm:$0xff]  }
 0x3a9   :  { %9680 = vmatpush1.bf16.msra.mxu1 %v14053_v18 }
 0x3aa   :  { %9667 = vmatprep.subr.bf16.mxu1 %v14070_v0 }
 0x3ad   :  { %9681 = vmatpush1.bf16.msra.mxu1 %v14065_v34 }
 0x3ae   :  { %9668 = vmatprep.subr.bf16.mxu1 %v14075_v63 }
 0x3af   :  { %6952 = vmatmul.mubr.bf16.gmra.mrb[24].mxu1 %v6686_v39 }
 0x3b0   :  { %8986 = vmatprep.mubr.msk.bf16.mxu1 %vm5306_vm4, %v6689_v22 }
 0x3b1   :  { %9682 = vmatpush1.bf16.msra.mxu1 %v14082_v36 }
 0x3b2   :  { %9669 = vmatprep.subr.bf16.mxu1 %v14094_v54 }
 0x3b5   :  { %9683 = vmatpush1.bf16.msra.mxu1 %v14089_v15 }
 0x3b6   :  { %9670 = vmatprep.subr.bf16.mxu1 %v14100_v41 }
 0x3b7   :  { %6962 = vmatmul.mubr.bf16.gmra.mrb[28].mxu1 %v6688_v23 }
 0x3b9   :  { %9684 = vmatpush1.bf16.msra.mxu1 %v14106_v49 }
 0x3ba   :  { %9671 = vmatprep.subr.bf16.mxu1 %v14118_v44 }
 0x3bd   :  { %9685 = vmatpush1.bf16.msra.mxu1 %v14113_v53 }
 0x3be   :  { %9672 = vmatprep.subr.bf16.mxu1 %v14124_v40 }
 0x3c1   :  { %9686 = vmatpush1.bf16.msra.mxu1 %v14130_v31 }
 0x3c2   :  { %9673 = vmatprep.subr.bf16.mxu1 %v14142_v1 }
 0x3c5   :  { %9687 = vmatpush1.bf16.msra.mxu1 %v14137_v32 }
 0x3c6   :  { %9674 = vmatprep.subr.bf16.mxu1 %v14148_v56 }
 0x3c9   :  { %9688 = vmatpush1.bf16.msra.mxu1 %v14154_v47 }
 0x3ca   :  { %9675 = vmatprep.subr.bf16.mxu1 %v14160_v11 }
 0x3cd   :  { %9689 = vmatpush1.bf16.msra.mxu1 %v14166_v7 }
 0x3ce   :  { %9676 = vmatprep.subr.bf16.mxu1 %v14172_v14 }
 0x3d1   :  { %9690 = vmatpush1.bf16.msra.mxu1 %v14178_v20 }
 0x452   :  { %v6893_v52 = vpop.f32.mrb[0].mxu1 }
 0x453   :  { %v14192_v58 = vadd.f32 %v14186_v57, %v6893_v52  ;;  %v6895_v4 = vpop.f32.mrb[1].mxu1  ;;  %v10745_v52 = vld [vmem:[%s14531_s5] ss:$8 sps:$4 sm:$0xff]  }
 0x454   :  { %v7017_v19 = vadd.f32 %v14189_v3, %v6895_v4  ;;  %v6897_v9 = vpop.f32.mrb[2].mxu1 }
 0x455   :  { %v14536_v29 = vmax.f32 %v14192_v58, 0.0  ;;  %v7018_v45 = vadd.f32 %v14186_v57, %v6897_v9  ;;  %v6899_v17 = vpop.f32.mrb[3].mxu1  ;;  %v10753_v9 = vld [vmem:[%s14531_s5 + $0x14] ss:$8 sps:$4 sm:$0xff]  }
 0x456   :  { %v7049_v61 = vmax.f32 %v7017_v19, 0.0  ;;  %v7019_v39 = vadd.f32 %v14189_v3, %v6899_v17 }
 0x457   :  { %v7050_v43 = vmax.f32 %v7018_v45, 0.0 }
 0x458   :  { %7082 = vst.msk [vmem:[#allocation3 + $0x18] sm:$0xff] %vm128_vm6, %v7049_v61  ;;  %v7051_v50 = vmax.f32 %v7019_v39, 0.0 }
 0x459   :  { %v7221_v38 = vpack.c.bf16 %v7050_v43, %v14536_v29 }
 0x45a   :  { %7084 = vst.msk [vmem:[#allocation3 + $0x28] sm:$0xff] %vm128_vm6, %v7051_v50  ;;  %v6903_v22 = vpop.f32.mrb[4].mxu1 }
 0x45b   :  { %v7020_v8 = vadd.f32 %v14186_v57, %v6903_v22  ;;  %v6905_v55 = vpop.f32.mrb[5].mxu1 }
 0x45c   :  { %v7021_v16 = vadd.f32 %v14189_v3, %v6905_v55  ;;  %v6907_v24 = vpop.f32.mrb[6].mxu1 }
 0x45d   :  { %v7052_v51 = vmax.f32 %v7020_v8, 0.0  ;;  %v7022_v25 = vadd.f32 %v14186_v57, %v6907_v24  ;;  %v6909_v23 = vpop.f32.mrb[7].mxu1  ;;  %v10751_v8 = vld [vmem:[%s14531_s5 + $0x10] ss:$8 sps:$4 sm:$0xff]  }
 0x45e   :  { %v7053_v12 = vmax.f32 %v7021_v16, 0.0  ;;  %v7023_v37 = vadd.f32 %v14189_v3, %v6909_v23  ;;  %v10759_v16 = vld [vmem:[%s14531_s5 + $0x24] ss:$8 sps:$4 sm:$0xff]  }
 0x45f   :  { %v7054_v13 = vmax.f32 %v7022_v25, 0.0  ;;  %v14206_v26 = vpack.c.bf16 %v7052_v51, %v7050_v43  ;;  %v14209_v59 = vld [vmem:[#allocation3 + $0x18] sm:$0xff] }
 0x460   :  { %7086 = vst.msk [vmem:[#allocation3 + $0x38] sm:$0xff] %vm128_vm6, %v7053_v12  ;;  %v7055_v27 = vmax.f32 %v7023_v37, 0.0 }
 0x461   :  { %v14211_v46 = vld [vmem:[#allocation3 + $0x28] sm:$0xff]  ;;  %v7223_v28 = vpack.c.bf16 %v7054_v13, %v7052_v51 }
 0x462   :  { %7088 = vst.msk [vmem:[#allocation3 + $0x48] sm:$0xff] %vm128_vm6, %v7055_v27  ;;  %v6913_v21 = vpop.f32.mrb[8].mxu1  ;;  %v7222_v35 = vpack.c.bf16 %v14211_v46, %v14209_v59 }
 0x463   :  { %v7024_v4 = vadd.f32 %v14186_v57, %v6913_v21  ;;  %v6915_v19 = vpop.f32.mrb[9].mxu1 }
 0x464   :  { %v7025_v45 = vadd.f32 %v14189_v3, %v6915_v19  ;;  %v6917_v17 = vpop.f32.mrb[10].mxu1  ;;  %9043 = vmatprep.mubr.msk.bf16.mxu0 %vm128_vm6, %v7222_v35  ;;  %v10765_v35 = vld [vmem:[%s14531_s5 + $0x34] ss:$8 sps:$4 sm:$0xff]  }
 0x465   :  { %v7056_v61 = vmax.f32 %v7024_v4, 0.0  ;;  %v7026_v39 = vadd.f32 %v14186_v57, %v6917_v17  ;;  %v6919_v43 = vpop.f32.mrb[11].mxu1  ;;  %7463 = vmatmul.mubr.bf16.vlgmr.msra.gmra.mrb[32].mxu0 %v7221_v38 }
 0x466   :  { %v7057_v50 = vmax.f32 %v7025_v45, 0.0  ;;  %v7027_v22 = vadd.f32 %v14189_v3, %v6919_v43  ;;  %7708 = vmatpush1.bf16.msra.mxu0 %v10745_v52 }
 0x467   :  { %v7058_v55 = vmax.f32 %v7026_v39, 0.0  ;;  %7709 = vmatprep.subr.bf16.mxu0 %v10753_v9  ;;  %v14233_v24 = vpack.c.bf16 %v7056_v61, %v7054_v13  ;;  %v14236_v38 = vld [vmem:[#allocation3 + $0x38] sm:$0xff]  ;;  %v10757_v13 = vld [vmem:[%s14531_s5 + $0x20] ss:$8 sps:$4 sm:$0xff]  }
 0x468   :  { %7090 = vst.msk [vmem:[#allocation3 + $0x58] sm:$0xff] %vm128_vm6, %v7057_v50  ;;  %v7059_v51 = vmax.f32 %v7027_v22, 0.0  ;;  %v10763_v39 = vld [vmem:[%s14531_s5 + $0x30] ss:$8 sps:$4 sm:$0xff]   ;;  %v10774_v50 = vld [vmem:[%s14531_s5 + $0x44] ss:$8 sps:$4 sm:$0xff]  }
 0x469   :  { %v14238_v25 = vld [vmem:[#allocation3 + $0x48] sm:$0xff]  ;;  %v7225_v23 = vpack.c.bf16 %v7058_v55, %v7056_v61 }
 0x46a   :  { %7092 = vst.msk [vmem:[#allocation3 + $0x68] sm:$0xff] %vm128_vm6, %v7059_v51  ;;  %v6923_v12 = vpop.f32.mrb[12].mxu1  ;;  %7710 = vmatpush1.bf16.msra.mxu0 %v10751_v8  ;;  %v7224_v37 = vpack.c.bf16 %v14238_v25, %v14236_v38 }
 0x46b   :  { %v7028_v27 = vadd.f32 %v14186_v57, %v6923_v12  ;;  %v6925_v21 = vpop.f32.mrb[13].mxu1  ;;  %7711 = vmatprep.subr.bf16.mxu0 %v10759_v16 }
 0x46c   :  { %v7029_v52 = vadd.f32 %v14189_v3, %v6925_v21  ;;  %v6927_v4 = vpop.f32.mrb[14].mxu1  ;;  %9044 = vmatprep.mubr.msk.bf16.mxu0 %vm128_vm6, %v7224_v37  ;;  %v10780_v21 = vld [vmem:[%s14531_s5 + $0x54] ss:$8 sps:$4 sm:$0xff]  }
 0x46d   :  { %v7060_v19 = vmax.f32 %v7028_v27, 0.0  ;;  %v14253_v9 = vadd.f32 %v14186_v57, %v6927_v4  ;;  %v6929_v45 = vpop.f32.mrb[15].mxu1  ;;  %7473 = vmatmul.mubr.bf16.gmra.mrb[36].mxu0 %v7223_v28 }
 0x46e   :  { %v7061_v17 = vmax.f32 %v7029_v52, 0.0  ;;  %v7031_v61 = vadd.f32 %v14189_v3, %v6929_v45  ;;  %7712 = vmatpush1.bf16.msra.mxu0 %v10757_v13 }
 0x46f   :  { %14551 = vst [vmem:[#allocation12_spill] sm:$0xff] %v14253_v9  ;;  %v14534_v43 = vmax.f32 %v14253_v9, 0.0  ;;  %7713 = vmatprep.subr.bf16.mxu0 %v10765_v35  ;;  %v14263_v22 = vpack.c.bf16 %v7060_v19, %v7058_v55  ;;  %v14266_v8 = vld [vmem:[#allocation3 + $0x58] sm:$0xff]  ;;  %v10772_v55 = vld [vmem:[%s14531_s5 + $0x40] ss:$8 sps:$4 sm:$0xff]  }
 0x470   :  { %7094 = vst.msk [vmem:[#allocation3 + $0x78] sm:$0xff] %vm128_vm6, %v7061_v17  ;;  %v7063_v28 = vmax.f32 %v7031_v61, 0.0 }
 0x471   :  { %v14268_v16 = vld [vmem:[#allocation3 + $0x68] sm:$0xff]  ;;  %v7227_v51 = vpack.c.bf16 %v14534_v43, %v7060_v19 }
 0x472   :  { %7096 = vst.msk [vmem:[#allocation3 + $0x88] sm:$0xff] %vm128_vm6, %v7063_v28  ;;  %v6933_v12 = vpop.f32.mrb[16].mxu1  ;;  %v7226_v37 = vpack.c.bf16 %v14268_v16, %v14266_v8  ;;  %7714 = vmatpush1.bf16.msra.mxu0 %v10763_v39  ;;  %v10778_v39 = vld [vmem:[%s14531_s5 + $0x50] ss:$8 sps:$4 sm:$0xff]   ;;  %v10786_v28 = vld [vmem:[%s14531_s5 + $0x64] ss:$8 sps:$4 sm:$0xff]  }
 0x473   :  { %v14279_v13 = vadd.f32 %v14186_v57, %v6933_v12  ;;  %v6935_v27 = vpop.f32.mrb[17].mxu1  ;;  %7715 = vmatprep.subr.bf16.mxu0 %v10774_v50 }
 0x474   :  { %v7033_v35 = vadd.f32 %v14189_v3, %v6935_v27  ;;  %v6937_v52 = vpop.f32.mrb[18].mxu1  ;;  %9045 = vmatprep.mubr.msk.bf16.mxu0 %vm128_vm6, %v7226_v37 }
 0x475   :  { %v14535_v4 = vmax.f32 %v14279_v13, 0.0  ;;  %v7034_v19 = vadd.f32 %v14186_v57, %v6937_v52  ;;  %v6939_v45 = vpop.f32.mrb[19].mxu1  ;;  %7483 = vmatmul.mubr.bf16.gmra.mrb[40].mxu0 %v7225_v23 }
 0x476   :  { %v7065_v17 = vmax.f32 %v7033_v35, 0.0  ;;  %v7035_v61 = vadd.f32 %v14189_v3, %v6939_v45  ;;  %7716 = vmatpush1.bf16.msra.mxu0 %v10772_v55  ;;  %v10784_v35 = vld [vmem:[%s14531_s5 + $0x60] ss:$8 sps:$4 sm:$0xff]   ;;  %v10792_v45 = vld [vmem:[%s14531_s5 + $0x74] ss:$8 sps:$4 sm:$0xff]  }
 0x477   :  { %v7066_v50 = vmax.f32 %v7034_v19, 0.0  ;;  %7717 = vmatprep.subr.bf16.mxu0 %v10780_v21  ;;  %v14296_v37 = vld [vmem:[#allocation3 + $0x78] sm:$0xff] }
 0x478   :  { %7098 = vst.msk [vmem:[#allocation3 + $0xb8] sm:$0xff] %vm128_vm6, %v7065_v17  ;;  %v7067_v12 = vmax.f32 %v7035_v61, 0.0 }
 0x479   :  { %v14298_v23 = vld [vmem:[#allocation3 + $0x88] sm:$0xff]  ;;  %v7229_v55 = vpack.c.bf16 %v7066_v50, %v14535_v4 }
 0x47a   :  { %14552 = vst [vmem:[#allocation13_spill] sm:$0xff] %v14298_v23  ;;  %7100 = vst.msk [vmem:[#allocation3 + $0xc8] sm:$0xff] %vm128_vm6, %v7067_v12  ;;  %v6943_v27 = vpop.f32.mrb[20].mxu1  ;;  %v7228_v21 = vpack.c.bf16 %v14298_v23, %v14296_v37  ;;  %7718 = vmatpush1.bf16.msra.mxu0 %v10778_v39 }
 0x47b   :  { %v7036_v52 = vadd.f32 %v14186_v57, %v6943_v27  ;;  %v6945_v19 = vpop.f32.mrb[21].mxu1  ;;  %7719 = vmatprep.subr.bf16.mxu0 %v10786_v28  ;;  %v10790_v28 = vld [vmem:[%s14531_s5 + $0x70] ss:$8 sps:$4 sm:$0xff]  }
 0x47c   :  { %v7037_v17 = vadd.f32 %v14189_v3, %v6945_v19  ;;  %v6947_v61 = vpop.f32.mrb[22].mxu1  ;;  %9046 = vmatprep.mubr.msk.bf16.mxu0 %vm128_vm6, %v7228_v21  ;;  %v10798_v19 = vld [vmem:[%s14531_s5 + $0x84] ss:$8 sps:$4 sm:$0xff]  }
 0x47d   :  { %v7068_v12 = vmax.f32 %v7036_v52, 0.0  ;;  %v7038_v39 = vadd.f32 %v14186_v57, %v6947_v61  ;;  %v6949_v43 = vpop.f32.mrb[23].mxu1  ;;  %7493 = vmatmul.mubr.bf16.gmra.mrb[44].mxu0 %v7227_v51 }
 0x47e   :  { %v7069_v4 = vmax.f32 %v7037_v17, 0.0  ;;  %v7039_v29 = vadd.f32 %v14189_v3, %v6949_v43  ;;  %7720 = vmatpush1.bf16.msra.mxu0 %v10784_v35 }
 0x47f   :  { %v7070_v27 = vmax.f32 %v7038_v39, 0.0  ;;  %7721 = vmatprep.subr.bf16.mxu0 %v10792_v45  ;;  %v14322_v21 = vpack.c.bf16 %v7068_v12, %v7066_v50  ;;  %v14325_v51 = vld [vmem:[#allocation3 + $0xb8] sm:$0xff]  ;;  %v10796_v50 = vld [vmem:[%s14531_s5 + $0x80] ss:$8 sps:$4 sm:$0xff]  }
 0x480   :  { %7102 = vst.msk [vmem:[#allocation3 + $0xd8] sm:$0xff] %vm128_vm6, %v7069_v4  ;;  %v7071_v52 = vmax.f32 %v7039_v29, 0.0  ;;  %v10804_v29 = vld [vmem:[%s14531_s5 + $0x94] ss:$8 sps:$4 sm:$0xff]  }
 0x481   :  { %v14327_v17 = vld [vmem:[#allocation3 + $0xc8] sm:$0xff]  ;;  %v7231_v43 = vpack.c.bf16 %v7070_v27, %v7068_v12 }
 0x482   :  { %7104 = vst.msk [vmem:[#allocation3 + $0xe8] sm:$0xff] %vm128_vm6, %v7071_v52  ;;  %v6953_v35 = vpop.f32.mrb[24].mxu1  ;;  %v7230_v45 = vpack.c.bf16 %v14327_v17, %v14325_v51  ;;  %7722 = vmatpush1.bf16.msra.mxu0 %v10790_v28 }
 0x483   :  { %v7040_v61 = vadd.f32 %v14186_v57, %v6953_v35  ;;  %v6955_v4 = vpop.f32.mrb[25].mxu1  ;;  %7723 = vmatprep.subr.bf16.mxu0 %v10798_v19  ;;  %v10802_v19 = vld [vmem:[%s14531_s5 + $0x90] ss:$8 sps:$4 sm:$0xff]  }
 0x484   :  { %v7041_v12 = vadd.f32 %v14189_v3, %v6955_v4  ;;  %v6957_v39 = vpop.f32.mrb[26].mxu1  ;;  %9047 = vmatprep.mubr.msk.bf16.mxu0 %vm128_vm6, %v7230_v45  ;;  %v10810_v4 = vld [vmem:[%s14531_s5 + $0xa4] ss:$8 sps:$4 sm:$0xff]  }
 0x485   :  { %v7072_v52 = vmax.f32 %v7040_v61, 0.0  ;;  %v7042_v28 = vadd.f32 %v14186_v57, %v6957_v39  ;;  %v6959_v6 = vpop.f32.mrb[27].mxu1  ;;  %7503 = vmatmul.mubr.bf16.gmra.mrb[48].mxu0 %v7229_v55 }
 0x486   :  { %v7073_v5 = vmax.f32 %v7041_v12, 0.0  ;;  %v7043_v9 = vadd.f32 %v14189_v3, %v6959_v6  ;;  %7724 = vmatpush1.bf16.msra.mxu0 %v10796_v50 }
 0x487   :  { %v7074_v35 = vmax.f32 %v7042_v28, 0.0  ;;  %7725 = vmatprep.subr.bf16.mxu0 %v10804_v29  ;;  %v14349_v45 = vpack.c.bf16 %v7072_v52, %v7070_v27  ;;  %v14352_v55 = vld [vmem:[#allocation3 + $0xd8] sm:$0xff]  ;;  %v10808_v27 = vld [vmem:[%s14531_s5 + $0xa0] ss:$8 sps:$4 sm:$0xff]  }
 0x488   :  { %7106 = vst.msk [vmem:[#allocation3 + $0xf8] sm:$0xff] %vm128_vm6, %v7073_v5  ;;  %v7075_v61 = vmax.f32 %v7043_v9, 0.0  ;;  %v10819_v9 = vld [vmem:[%s14531_s5 + $0xb4] ss:$8 sps:$4 sm:$0xff]  }
 0x489   :  { %v14354_v12 = vld [vmem:[#allocation3 + $0xe8] sm:$0xff]  ;;  %v7233_v6 = vpack.c.bf16 %v7074_v35, %v7072_v52 }
 0x48a   :  { %7108 = vst.msk [vmem:[#allocation3 + $0x108] sm:$0xff] %vm128_vm6, %v7075_v61  ;;  %v6963_v50 = vpop.f32.mrb[28].mxu1  ;;  %v7232_v29 = vpack.c.bf16 %v14354_v12, %v14352_v55  ;;  %7726 = vmatpush1.bf16.msra.mxu0 %v10802_v19 }
 0x48b   :  { %v7044_v39 = vadd.f32 %v14186_v57, %v6963_v50  ;;  %v6965_v5 = vpop.f32.mrb[29].mxu1  ;;  %7727 = vmatprep.subr.bf16.mxu0 %v10810_v4  ;;  %v10817_v4 = vld [vmem:[%s14531_s5 + $0xb0] ss:$8 sps:$4 sm:$0xff]  }
 0x48c   :  { %v7045_v52 = vadd.f32 %v14189_v3, %v6965_v5  ;;  %v6967_v28 = vpop.f32.mrb[30].mxu1  ;;  %9048 = vmatprep.mubr.msk.bf16.mxu0 %vm128_vm6, %v7232_v29  ;;  %v10822_v29 = vld [vmem:[%s14531_s5 + $0xc4] ss:$8 sps:$4 sm:$0xff]   ;;  %v7852_v5 = vld [vmem:[#allocation3 + $0x138] sm:$0xff] }
 0x48d   :  { %v7076_v61 = vmax.f32 %v7044_v39, 0.0  ;;  %v7046_v19 = vadd.f32 %v14186_v57, %v6967_v28  ;;  %v6969_v23 = vpop.f32.mrb[31].mxu1  ;;  %7513 = vmatmul.mubr.bf16.gmra.mrb[52].mxu0 %v7231_v43  ;;  %v7114_v28 = vld [vmem:[#allocation3 + $0x8] sm:$0xff] }
 0x48e   :  { %v7077_v20 = vmax.f32 %v7045_v52, 0.0  ;;  %v7047_v14 = vadd.f32 %v14189_v3, %v6969_v23  ;;  %7728 = vmatpush1.bf16.msra.mxu0 %v10808_v27  ;;  %v10825_v27 = vld [vmem:[%s14531_s5 + $0xd4] ss:$8 sps:$4 sm:$0xff]  }
 0x48f   :  { %v14373_v50 = vpack.c.bf16 %v7076_v61, %v7074_v35  ;;  %v7078_v7 = vmax.f32 %v7046_v19, 0.0  ;;  %7729 = vmatprep.subr.bf16.mxu0 %v10819_v9  ;;  %v14379_v43 = vld [vmem:[#allocation3 + $0xf8] sm:$0xff]  ;;  %v10820_v35 = vld [vmem:[%s14531_s5 + $0xc0] ss:$8 sps:$4 sm:$0xff]  }
 0x490   :  { %7110 = vst.msk [vmem:[#allocation3 + $0x118] sm:$0xff] %vm128_vm6, %v7077_v20  ;;  %v7079_v57 = vmax.f32 %v7047_v14, 0.0  ;;  %v10823_v14 = vld [vmem:[%s14531_s5 + $0xd0] ss:$8 sps:$4 sm:$0xff]  }
 0x491   :  { %v7216_v39 = vld [vmem:[#allocation3 + $0x108] sm:$0xff]  ;;  %v7235_v3 = vpack.c.bf16 %v7078_v7, %v7076_v61 }
 0x492   :  { %7112 = vst.msk [vmem:[#allocation3 + $0x128] sm:$0xff] %vm128_vm6, %v7079_v57  ;;  %v7234_v23 = vpack.c.bf16 %v7216_v39, %v14379_v43  ;;  %7730 = vmatpush1.bf16.msra.mxu0 %v10817_v4  ;;  %v7867_v4 = vpack.c.bf16 %v13977_v60, %v7078_v7  ;;  %v14561_v7 = vld [vmem:[#allocation7_spill] sm:$0xff] }
 0x493   :  { %7731 = vmatprep.subr.bf16.mxu0 %v10822_v29  ;;  %v14553_v29 = vmax.f32 %v14192_v58, 0.0 }
 0x494   :  { %9049 = vmatprep.mubr.msk.bf16.mxu0 %vm128_vm6, %v7234_v23 }
 0x495   :  { %7523 = vmatmul.mubr.bf16.gmra.mrb[56].mxu0 %v7233_v6  ;;  %v7146_v6 = vpack.c.bf16 %v14209_v59, %v7114_v28  ;;  %v7145_v57 = vpack.c.bf16 %v14553_v29, %v13977_v60  ;;  %v14562_v59 = vld [vmem:[#allocation8_spill] sm:$0xff] }
 0x496   :  { %7732 = vmatpush1.bf16.msra.mxu0 %v10820_v35 }
 0x497   :  { %v7848_v20 = vld [vmem:[#allocation3 + $0x118] sm:$0xff]  ;;  %7733 = vmatprep.subr.bf16.mxu0 %v10825_v27 }
 0x498   :  { %v7866_v9 = vpack.c.bf16 %v7848_v20, %v7216_v39  ;;  %v7148_v39 = vpack.c.bf16 %v14236_v38, %v14211_v46 }
 0x499   :  { %v7220_v52 = vld [vmem:[#allocation3 + $0x128] sm:$0xff] }
 0x49a   :  { %9149 = vmatprep.mubr.msk.bf16.mxu1 %vm128_vm6, %v7866_v9  ;;  %v7236_v61 = vpack.c.bf16 %v7220_v52, %v7848_v20  ;;  %v7868_v19 = vpack.c.bf16 %v7852_v5, %v7220_v52  ;;  %7734 = vmatpush1.bf16.msra.mxu0 %v10823_v14 }
 0x49b   :  { %8155 = vmatmul.mubr.bf16.vlgmr.msra.gmra.mrb[32].mxu1 %v14373_v50  ;;  %8062 = vmatprep.subr.bf16.mxu0 %v14019_v62  ;;  %v7150_v62 = vpack.c.bf16 %v14266_v8, %v14238_v25 }
 0x49c   :  { %9050 = vmatprep.mubr.msk.bf16.mxu0 %vm128_vm6, %v7236_v61  ;;  %9150 = vmatprep.mubr.msk.bf16.mxu1 %vm128_vm6, %v7868_v19 }
 0x49d   :  { %7533 = vmatmul.mubr.bf16.gmra.mrb[60].mxu0 %v7235_v3 }
 0x49e   :  { %9079 = vmatprep.mubr.msk.bf16.mxu0 %vm128_vm6, %v7146_v6 }
 0x4a3   :  { %8165 = vmatmul.mubr.bf16.gmra.mrb[36].mxu1 %v7867_v4 }
 0x4a5   :  { %7740 = vmatmul.mubr.bf16.vlgmr.msra.gmra.mrb[32].mxu0 %v7145_v57 }
 0x4a6   :  { %9080 = vmatprep.mubr.msk.bf16.mxu0 %vm128_vm6, %v7148_v39  ;;  %8063 = vmatpush1.bf16.msra.mxu0 %v14014_v30  ;;  %v7152_v30 = vpack.c.bf16 %v14296_v37, %v14268_v16 }
 0x4a7   :  { %8064 = vmatprep.subr.bf16.mxu0 %v14034_v2 }
 0x4aa   :  { %8065 = vmatpush1.bf16.msra.mxu0 %v14029_v33  ;;  %v7130_v33 = vld [vmem:[#allocation3 + $0xa8] sm:$0xff] }
 0x4ab   :  { %8066 = vmatprep.subr.bf16.mxu0 %v14046_v42  ;;  %v7154_v2 = vpack.c.bf16 %v14325_v51, %v7130_v33 }
 0x4ad   :  { %7750 = vmatmul.mubr.bf16.gmra.mrb[36].mxu0 %v14206_v26 }
 0x4ae   :  { %9081 = vmatprep.mubr.msk.bf16.mxu0 %vm128_vm6, %v7150_v62  ;;  %8067 = vmatpush1.bf16.msra.mxu0 %v14041_v10  ;;  %v14554_v10 = vmax.f32 %v14279_v13, 0.0 }
 0x4af   :  { %8068 = vmatprep.subr.bf16.mxu0 %v14058_v48  ;;  %v7158_v48 = vpack.c.bf16 %v14379_v43, %v14354_v12 }
 0x4b0   :  { %v7153_v42 = vpack.c.bf16 %v14554_v10, %v13977_v60 }
 0x4b2   :  { %8069 = vmatpush1.bf16.msra.mxu0 %v14053_v18  ;;  %v7156_v18 = vpack.c.bf16 %v14352_v55, %v14327_v17 }
 0x4b3   :  { %8070 = vmatprep.subr.bf16.mxu0 %v14070_v0  ;;  %v14556_v0 = vld [vmem:[#allocation10_spill] sm:$0xff] }
 0x4b5   :  { %7760 = vmatmul.mubr.bf16.gmra.mrb[40].mxu0 %v14233_v24 }
 0x4b6   :  { %9082 = vmatprep.mubr.msk.bf16.mxu0 %vm128_vm6, %v7152_v30  ;;  %8071 = vmatpush1.bf16.msra.mxu0 %v14065_v34  ;;  %v14555_v34 = vld [vmem:[#allocation9_spill] sm:$0xff] }
 0x4b7   :  { %8072 = vmatprep.subr.bf16.mxu0 %v14075_v63  ;;  %v14557_v63 = vld [vmem:[#allocation11_spill] sm:$0xff] }
 0x4ba   :  { %8073 = vmatpush1.bf16.msra.mxu0 %v14082_v36  ;;  %v7836_v36 = vld [vmem:[#allocation3 + $0x98] sm:$0xff] }
 0x4bb   :  { %8074 = vmatprep.subr.bf16.mxu0 %v14094_v54 }
 0x4bd   :  { %7770 = vmatmul.mubr.bf16.gmra.mrb[44].mxu0 %v14263_v22 }
 0x4be   :  { %9083 = vmatprep.mubr.msk.bf16.mxu0 %vm128_vm6, %v7154_v2  ;;  %8075 = vmatpush1.bf16.msra.mxu0 %v14089_v15  ;;  %v14558_v15 = vld [vmem:[#allocation13_spill] sm:$0xff] }
 0x4bf   :  { %8076 = vmatprep.subr.bf16.mxu0 %v14100_v41  ;;  %v7860_v54 = vpack.c.bf16 %v7836_v36, %v14558_v15  ;;  %v14559_v41 = vld [vmem:[#allocation12_spill] sm:$0xff] }
 0x4c2   :  { %8077 = vmatpush1.bf16.msra.mxu0 %v14106_v49  ;;  %v14560_v49 = vmax.f32 %v14559_v41, 0.0 }
 0x4c3   :  { %8078 = vmatprep.subr.bf16.mxu0 %v14118_v44 }
 0x4c5   :  { %7780 = vmatmul.mubr.bf16.gmra.mrb[48].mxu0 %v7153_v42 }
 0x4c6   :  { %9084 = vmatprep.mubr.msk.bf16.mxu0 %vm128_vm6, %v7156_v18  ;;  %8079 = vmatpush1.bf16.msra.mxu0 %v14113_v53  ;;  %v7859_v53 = vpack.c.bf16 %v13977_v60, %v14560_v49  ;;  %v8207_v60 = vld [vmem:[%s14532_s6] sm:$0x3]  ;;  %s10854_s6 = smov [#allocation4]  }
 0x4c7   :  { %8080 = vmatprep.subr.bf16.mxu0 %v14124_v40  ;;  %v14477_v58 = vrot.slane %v8207_v60, %v14561_v7  ;;  %v14480_v46 = vrot.slane %v8207_v60, %v14562_v59  ;;  %s8320_s15 = sshll.u32 %s10854_s6, 4  ;;  %s8321_s15 = int_to_ptr.vmem [resolvable:$true] %s8320_s15 }
 0x4c8   :  { %s10828_s4 = scalar_lea.vmem %s8321_s15, 8192  ;;  %p10833_p1 = scmp.lt.s32.totalorder %s8321_s15, %s8321_s15 }
 0x4c9   :  { %p10829_p0 = scmp.ne.s32.totalorder %s8321_s15, %s10828_s4  ;;  %p10834_p2 = scmp.lt.s32.totalorder %s10828_s4, %s10828_s4 }
 0x4ca   :  { %8081 = vmatpush1.bf16.msra.mxu0 %v14130_v31 }
 0x4cb   :  { %8082 = vmatprep.subr.bf16.mxu0 %v14142_v1  ;;  %p10835_p3 = por %p10834_p2, %p10833_p1 }
 0x4cd   :  { %7790 = vmatmul.mubr.bf16.gmra.mrb[52].mxu0 %v14322_v21  ;;  %p10836_p4 = pnand %p10835_p3, %p10829_p0 }
 0x4ce   :  { %9085 = vmatprep.mubr.msk.bf16.mxu0 %vm128_vm6, %v7158_v48  ;;  %8083 = vmatpush1.bf16.msra.mxu0 %v14137_v32 }
 0x4cf   :  { %8084 = vmatprep.subr.bf16.mxu0 %v14148_v56 }
 0x4d2   :  { %8085 = vmatpush1.bf16.msra.mxu0 %v14154_v47 }
 0x4d3   :  { %8086 = vmatprep.subr.bf16.mxu0 %v14160_v11 }
 0x4d5   :  { %7800 = vmatmul.mubr.bf16.gmra.mrb[56].mxu0 %v14349_v45 }
 0x4d6   :  { %9086 = vmatprep.mubr.msk.bf16.mxu0 %vm128_vm6, %v7866_v9  ;;  %8087 = vmatpush1.bf16.msra.mxu0 %v14555_v34 }
 0x4d7   :  { %8088 = vmatprep.subr.bf16.mxu0 %v14556_v0 }
 0x4da   :  { %8089 = vmatpush1.bf16.msra.mxu0 %v14557_v63 }
 0x4dd   :  { %7810 = vmatmul.mubr.bf16.gmra.mrb[60].mxu0 %v14373_v50 }
 0x4de   :  { %9143 = vmatprep.mubr.msk.bf16.mxu0 %vm128_vm6, %v7148_v39 }
 0x4e5   :  { %8095 = vmatmul.mubr.bf16.vlgmr.msra.gmra.mrb[32].mxu0 %v14206_v26 }
 0x4e6   :  { %9144 = vmatprep.mubr.msk.bf16.mxu0 %vm128_vm6, %v7150_v62 }
 0x4ed   :  { %8105 = vmatmul.mubr.bf16.gmra.mrb[36].mxu0 %v14233_v24 }
 0x4ee   :  { %9145 = vmatprep.mubr.msk.bf16.mxu0 %vm128_vm6, %v7152_v30 }
 0x4f5   :  { %8115 = vmatmul.mubr.bf16.gmra.mrb[40].mxu0 %v14263_v22 }
 0x4f6   :  { %9146 = vmatprep.mubr.msk.bf16.mxu0 %vm128_vm6, %v7860_v54 }
 0x4fd   :  { %8125 = vmatmul.mubr.bf16.gmra.mrb[44].mxu0 %v7859_v53 }
 0x4fe   :  { %9147 = vmatprep.mubr.msk.bf16.mxu0 %vm128_vm6, %v7156_v18 }
 0x505   :  { %8135 = vmatmul.mubr.bf16.gmra.mrb[48].mxu0 %v14322_v21 }
 0x506   :  { %9148 = vmatprep.mubr.msk.bf16.mxu0 %vm128_vm6, %v7158_v48 }
 0x50d   :  { %8145 = vmatmul.mubr.bf16.gmra.mrb[52].mxu0 %v14349_v45 }
 0x56e   :  { %v8156_v44 = vpop.f32.mrb[32].mxu1 }
 0x56f   :  { %v8158_v40 = vpop.f32.mrb[33].mxu1 }
 0x570   :  { %v8160_v31 = vpop.f32.mrb[34].mxu1 }
 0x571   :  { %v8162_v32 = vpop.f32.mrb[35].mxu1 }
 0x576   :  { %v8166_v1 = vpop.f32.mrb[36].mxu1 }
 0x577   :  { %v8168_v56 = vpop.f32.mrb[37].mxu1 }
 0x578   :  { %v8170_v47 = vpop.f32.mrb[38].mxu1 }
 0x579   :  { %v8172_v11 = vpop.f32.mrb[39].mxu1 }
 0x5a8   :  { %v7801_v26 = vpop.f32.mrb[56].mxu0 }
 0x5a9   :  { %v9723_v24 = vadd.f32 %v8156_v44, %v7801_v26  ;;  %v7803_v38 = vpop.f32.mrb[57].mxu0 }
 0x5aa   :  { %v9724_v25 = vadd.f32 %v8158_v40, %v7803_v38  ;;  %v7805_v22 = vpop.f32.mrb[58].mxu0 }
 0x5ab   :  { %v8243_v8 = vadd.f32 %v9723_v24, %v14477_v58  ;;  %v9725_v16 = vadd.f32 %v8160_v31, %v7805_v22  ;;  %v7807_v13 = vpop.f32.mrb[59].mxu0 }
 0x5ac   :  { %v8244_v37 = vadd.f32 %v9724_v25, %v14480_v46  ;;  %v9726_v21 = vadd.f32 %v8162_v32, %v7807_v13 }
 0x5ad   :  { %v8275_v51 = vmax.f32 %v8243_v8, 0.0  ;;  %v8245_v17 = vadd.f32 %v9725_v16, %v14477_v58 }
 0x5ae   :  { %v8276_v45 = vmax.f32 %v8244_v37, 0.0  ;;  %v8246_v55 = vadd.f32 %v9726_v21, %v14480_v46 }
 0x5af   :  { %8307 = vst [vmem:[#allocation4 + $0x180] sm:$0xff] %v8275_v51  ;;  %v8277_v12 = vmax.f32 %v8245_v17, 0.0 }
 0x5b0   :  { %8308 = vst [vmem:[#allocation4 + $0x188] sm:$0xff] %v8276_v45  ;;  %v8278_v50 = vmax.f32 %v8246_v55, 0.0  ;;  %v7811_v43 = vpop.f32.mrb[60].mxu0 }
 0x5b1   :  { %8309 = vst [vmem:[#allocation4 + $0x1a0] sm:$0xff] %v8277_v12  ;;  %v9727_v3 = vadd.f32 %v8166_v1, %v7811_v43  ;;  %v7813_v23 = vpop.f32.mrb[61].mxu0 }
 0x5b2   :  { %8310 = vst [vmem:[#allocation4 + $0x1a8] sm:$0xff] %v8278_v50  ;;  %v9728_v35 = vadd.f32 %v8168_v56, %v7813_v23  ;;  %v7815_v27 = vpop.f32.mrb[62].mxu0 }
 0x5b3   :  { %v8247_v14 = vadd.f32 %v9727_v3, %v14477_v58  ;;  %v9729_v20 = vadd.f32 %v8170_v47, %v7815_v27  ;;  %v7817_v5 = vpop.f32.mrb[63].mxu0 }
 0x5b4   :  { %v8248_v9 = vadd.f32 %v9728_v35, %v14480_v46  ;;  %v9730_v52 = vadd.f32 %v8172_v11, %v7817_v5 }
 0x5b5   :  { %v8279_v28 = vmax.f32 %v8247_v14, 0.0  ;;  %v8249_v61 = vadd.f32 %v9729_v20, %v14477_v58 }
 0x5b6   :  { %v8280_v19 = vmax.f32 %v8248_v9, 0.0  ;;  %v8250_v6 = vadd.f32 %v9730_v52, %v14480_v46 }
 0x5b7   :  { %8311 = vst [vmem:[#allocation4 + $0x1c0] sm:$0xff] %v8279_v28  ;;  %v8281_v4 = vmax.f32 %v8249_v61, 0.0 }
 0x5b8   :  { %8312 = vst [vmem:[#allocation4 + $0x1c8] sm:$0xff] %v8280_v19  ;;  %v8282_v29 = vmax.f32 %v8250_v6, 0.0  ;;  %v8096_v57 = vpop.f32.mrb[32].mxu0 }
 0x5b9   :  { %8313 = vst [vmem:[#allocation4 + $0x1e0] sm:$0xff] %v8281_v4  ;;  %v8219_v39 = vadd.f32 %v14477_v58, %v8096_v57  ;;  %v8098_v62 = vpop.f32.mrb[33].mxu0 }
 0x5ba   :  { %8314 = vst [vmem:[#allocation4 + $0x1e8] sm:$0xff] %v8282_v29  ;;  %v8220_v30 = vadd.f32 %v14480_v46, %v8098_v62  ;;  %v8100_v33 = vpop.f32.mrb[34].mxu0 }
 0x5bb   :  { %v8251_v2 = vmax.f32 %v8219_v39, 0.0  ;;  %v8221_v10 = vadd.f32 %v14477_v58, %v8100_v33  ;;  %v8102_v42 = vpop.f32.mrb[35].mxu0 }
 0x5bc   :  { %v8252_v18 = vmax.f32 %v8220_v30, 0.0  ;;  %v8222_v48 = vadd.f32 %v14480_v46, %v8102_v42 }
 0x5bd   :  { %8283 = vst [vmem:[#allocation4] sm:$0xff] %v8251_v2  ;;  %v8253_v34 = vmax.f32 %v8221_v10, 0.0 }
 0x5be   :  { %8284 = vst [vmem:[#allocation4 + $0x8] sm:$0xff] %v8252_v18  ;;  %v8254_v0 = vmax.f32 %v8222_v48, 0.0 }
 0x5bf   :  { %8285 = vst [vmem:[#allocation4 + $0x20] sm:$0xff] %v8253_v34 }
 0x5c0   :  { %8286 = vst [vmem:[#allocation4 + $0x28] sm:$0xff] %v8254_v0  ;;  %v8106_v63 = vpop.f32.mrb[36].mxu0 }
 0x5c1   :  { %v8223_v36 = vadd.f32 %v14477_v58, %v8106_v63  ;;  %v8108_v15 = vpop.f32.mrb[37].mxu0 }
 0x5c2   :  { %v8224_v54 = vadd.f32 %v14480_v46, %v8108_v15  ;;  %v8110_v41 = vpop.f32.mrb[38].mxu0 }
 0x5c3   :  { %v8255_v49 = vmax.f32 %v8223_v36, 0.0  ;;  %v8225_v53 = vadd.f32 %v14477_v58, %v8110_v41  ;;  %v8112_v44 = vpop.f32.mrb[39].mxu0 }
 0x5c4   :  { %v8256_v40 = vmax.f32 %v8224_v54, 0.0  ;;  %v8226_v31 = vadd.f32 %v14480_v46, %v8112_v44 }
 0x5c5   :  { %8287 = vst [vmem:[#allocation4 + $0x40] sm:$0xff] %v8255_v49  ;;  %v8257_v32 = vmax.f32 %v8225_v53, 0.0 }
 0x5c6   :  { %8288 = vst [vmem:[#allocation4 + $0x48] sm:$0xff] %v8256_v40  ;;  %v8258_v1 = vmax.f32 %v8226_v31, 0.0 }
 0x5c7   :  { %8289 = vst [vmem:[#allocation4 + $0x60] sm:$0xff] %v8257_v32 }
 0x5c8   :  { %8290 = vst [vmem:[#allocation4 + $0x68] sm:$0xff] %v8258_v1  ;;  %v8116_v56 = vpop.f32.mrb[40].mxu0 }
 0x5c9   :  { %v8227_v47 = vadd.f32 %v14477_v58, %v8116_v56  ;;  %v8118_v11 = vpop.f32.mrb[41].mxu0 }
 0x5ca   :  { %v8228_v60 = vadd.f32 %v14480_v46, %v8118_v11  ;;  %v8120_v7 = vpop.f32.mrb[42].mxu0 }
 0x5cb   :  { %v8259_v26 = vmax.f32 %v8227_v47, 0.0  ;;  %v8229_v59 = vadd.f32 %v14477_v58, %v8120_v7  ;;  %v8122_v24 = vpop.f32.mrb[43].mxu0 }
 0x5cc   :  { %v8260_v38 = vmax.f32 %v8228_v60, 0.0  ;;  %v8230_v25 = vadd.f32 %v14480_v46, %v8122_v24 }
 0x5cd   :  { %8291 = vst [vmem:[#allocation4 + $0x80] sm:$0xff] %v8259_v26  ;;  %v8261_v22 = vmax.f32 %v8229_v59, 0.0 }
 0x5ce   :  { %8292 = vst [vmem:[#allocation4 + $0x88] sm:$0xff] %v8260_v38  ;;  %v8262_v8 = vmax.f32 %v8230_v25, 0.0 }
 0x5cf   :  { %8293 = vst [vmem:[#allocation4 + $0xa0] sm:$0xff] %v8261_v22 }
 0x5d0   :  { %8294 = vst [vmem:[#allocation4 + $0xa8] sm:$0xff] %v8262_v8  ;;  %v8126_v16 = vpop.f32.mrb[44].mxu0 }
 0x5d1   :  { %v8231_v13 = vadd.f32 %v14477_v58, %v8126_v16  ;;  %v8128_v37 = vpop.f32.mrb[45].mxu0 }
 0x5d2   :  { %v8232_v21 = vadd.f32 %v14480_v46, %v8128_v37  ;;  %v8130_v51 = vpop.f32.mrb[46].mxu0 }
 0x5d3   :  { %v8263_v17 = vmax.f32 %v8231_v13, 0.0  ;;  %v8233_v45 = vadd.f32 %v14477_v58, %v8130_v51  ;;  %v8132_v55 = vpop.f32.mrb[47].mxu0 }
 0x5d4   :  { %v8264_v12 = vmax.f32 %v8232_v21, 0.0  ;;  %v8234_v50 = vadd.f32 %v14480_v46, %v8132_v55 }
 0x5d5   :  { %8295 = vst [vmem:[#allocation4 + $0xc0] sm:$0xff] %v8263_v17  ;;  %v8265_v43 = vmax.f32 %v8233_v45, 0.0 }
 0x5d6   :  { %8296 = vst [vmem:[#allocation4 + $0xc8] sm:$0xff] %v8264_v12  ;;  %v8266_v3 = vmax.f32 %v8234_v50, 0.0 }
 0x5d7   :  { %8297 = vst [vmem:[#allocation4 + $0xe0] sm:$0xff] %v8265_v43 }
 0x5d8   :  { %8298 = vst [vmem:[#allocation4 + $0xe8] sm:$0xff] %v8266_v3  ;;  %v8136_v23 = vpop.f32.mrb[48].mxu0 }
 0x5d9   :  { %v8235_v35 = vadd.f32 %v14477_v58, %v8136_v23  ;;  %v8138_v27 = vpop.f32.mrb[49].mxu0 }
 0x5da   :  { %v8236_v14 = vadd.f32 %v14480_v46, %v8138_v27  ;;  %v8140_v20 = vpop.f32.mrb[50].mxu0 }
 0x5db   :  { %v8267_v5 = vmax.f32 %v8235_v35, 0.0  ;;  %v8237_v9 = vadd.f32 %v14477_v58, %v8140_v20  ;;  %v8142_v52 = vpop.f32.mrb[51].mxu0 }
 0x5dc   :  { %v8268_v28 = vmax.f32 %v8236_v14, 0.0  ;;  %v8238_v61 = vadd.f32 %v14480_v46, %v8142_v52 }
 0x5dd   :  { %8299 = vst [vmem:[#allocation4 + $0x100] sm:$0xff] %v8267_v5  ;;  %v8269_v19 = vmax.f32 %v8237_v9, 0.0 }
 0x5de   :  { %8300 = vst [vmem:[#allocation4 + $0x108] sm:$0xff] %v8268_v28  ;;  %v8270_v6 = vmax.f32 %v8238_v61, 0.0 }
 0x5df   :  { %8301 = vst [vmem:[#allocation4 + $0x120] sm:$0xff] %v8269_v19 }
 0x5e0   :  { %8302 = vst [vmem:[#allocation4 + $0x128] sm:$0xff] %v8270_v6  ;;  %v8146_v4 = vpop.f32.mrb[52].mxu0 }
 0x5e1   :  { %v8239_v29 = vadd.f32 %v14477_v58, %v8146_v4  ;;  %v8148_v57 = vpop.f32.mrb[53].mxu0 }
 0x5e2   :  { %v8240_v39 = vadd.f32 %v14480_v46, %v8148_v57  ;;  %v8150_v62 = vpop.f32.mrb[54].mxu0 }
 0x5e3   :  { %v8271_v30 = vmax.f32 %v8239_v29, 0.0  ;;  %v8241_v33 = vadd.f32 %v14477_v58, %v8150_v62  ;;  %v8152_v2 = vpop.f32.mrb[55].mxu0 }
 0x5e4   :  { %v8272_v10 = vmax.f32 %v8240_v39, 0.0  ;;  %v8242_v42 = vadd.f32 %v14480_v46, %v8152_v2 }
 0x5e5   :  { %8303 = vst [vmem:[#allocation4 + $0x140] sm:$0xff] %v8271_v30  ;;  %v8273_v18 = vmax.f32 %v8241_v33, 0.0 }
 0x5e6   :  { %8304 = vst [vmem:[#allocation4 + $0x148] sm:$0xff] %v8272_v10  ;;  %v8274_v48 = vmax.f32 %v8242_v42, 0.0 }
 0x5e7   :  { %8305 = vst [vmem:[#allocation4 + $0x160] sm:$0xff] %v8273_v18 }
 0x5e8   :  { %8306 = vst [vmem:[#allocation4 + $0x168] sm:$0xff] %v8274_v48 }
 0x5e9   :  { %10839 = shalt.err (!%p10836_p4)
}
 0x5ea   :  { %s10840_s17 = scalar_lea.hbm %s14533_s7, 8192 }
 0x5eb   :  { %p10841_p5 = scmp.ne.s32.totalorder %s14533_s7, %s10840_s17  ;;  %p10844_p6 = scmp.lt.u32.totalorder %s10840_s17, %s14533_s7 }
 0x5ed   :  { %p10846_p7 = pnand %p10844_p6, %p10841_p5 }
 0x5ef   :  { %10849 = shalt.err (!%p10846_p7)
}
 0x5f0   :  { %s10855_s21 = smov 512   ;;  %s10856_s22 = smov 32  }
 0x5f1   :  { %8326 = dma.vmem_to_hbm [thread:$0]  %s8321_s15, 8192, %s14533_s7, [#allocation5], %s10855_s21, %s10855_s21, %s10856_s22  }
 0x5f2   :  { %10850 = dma.done.wait [#allocation5], 8192  }
 0x5f3   :  { %10851 = vsyncadd [#allocation5], 4294959104 }
 0x5f4   :  { %8330 = vsyncpa [#allocation5], 1 }

</bundles_post_ra>
